<compile_context>
chip_gen: v6e
topology: v6e:2x2x1
jax: 0.10.0
libtpu: 0.0.40
codegen_flags: <defaults>
</compile_context>

<pallas_src>
import functools
import math

import jax
import jax.numpy as jnp
from jax import lax
from jax.experimental import pallas as pl
from jax.experimental.pallas import tpu as pltpu

LEAK = 0.2


def _leaky_relu(x):
    return jnp.where(x > 0, x, LEAK * x)


def _im2col(padded, H, W, C):
    # padded: (H+2, W+2, C) -> (H*W, 9*C), tap-major (k = dy*3 + dx).
    cols = []
    for k in range(9):
        dy, dx = k // 3, k % 3
        cols.append(padded[dy:dy + H, dx:dx + W, :].reshape(H * W, C))
    return jnp.concatenate(cols, axis=-1)


def _block_kernel(xpad_ref, w1_ref, b1_ref, w2_ref, b2_ref, alpha_ref,
                  o_ref, h1pad_ref, *, H, W, Cin, Cout):
    # xpad_ref : (1, H+2, W+2, Cin)  spatially zero-padded input (f32)
    # w1_ref   : (9*Cin, Cout)       conv1 weights, tap-major, bf16
    # w2_ref   : (9*Cout, Cout)      conv2 weights, tap-major, bf16
    # b1/b2    : (1, Cout)           biases (f32)
    # alpha    : (1, Cout)           ReZero per-channel gate (f32)
    # o_ref    : (1, H, W*Cout)      lane-dense output
    # h1pad_ref: VMEM scratch (H+2, W+2, Cout) f32, padded intermediate
    xpad = xpad_ref[0]                                         # (H+2, W+2, Cin)

    # ---- conv1: one MXU matmul over K = 9*Cin (bf16 operands, f32 acc) ----
    p1 = _im2col(xpad.astype(jnp.bfloat16), H, W, Cin)         # (H*W, 9*Cin)
    acc1 = jnp.dot(p1, w1_ref[...], preferred_element_type=jnp.float32)
    h1 = _leaky_relu(acc1 + b1_ref[...]).reshape(H, W, Cout)

    # ---- re-pad intermediate: zero only the 1-px border (interior is fully
    # overwritten every step; cannot gate on program_id==0 because with a
    # "parallel" batch axis a second TensorCore never sees program 0) ----
    zrow = jnp.zeros((1, W + 2, Cout), jnp.float32)
    zcol = jnp.zeros((H + 2, 1, Cout), jnp.float32)
    h1pad_ref[pl.ds(0, 1), :, :] = zrow
    h1pad_ref[pl.ds(H + 1, 1), :, :] = zrow
    h1pad_ref[:, pl.ds(0, 1), :] = zcol
    h1pad_ref[:, pl.ds(W + 1, 1), :] = zcol
    h1pad_ref[pl.ds(1, H), pl.ds(1, W), :] = h1
    h1pad = h1pad_ref[...]

    # ---- conv2: one MXU matmul over K = 9*Cout ----
    p2 = _im2col(h1pad.astype(jnp.bfloat16), H, W, Cout)       # (H*W, 9*Cout)
    acc2 = jnp.dot(p2, w2_ref[...], preferred_element_type=jnp.float32)
    h2 = _leaky_relu(acc2 + b2_ref[...]).reshape(H, W, Cout)

    # ---- ReZero: residual taken from the interior of xpad (no xres input) ----
    alpha = alpha_ref[...][None, :, :]                         # (1, 1, Cout)
    branch = alpha * h2
    xint = xpad[1:H + 1, 1:W + 1, :]                           # (H, W, Cin) f32
    if Cout > Cin:
        res = jnp.concatenate(
            [xint, jnp.zeros((H, W, Cout - Cin), jnp.float32)], axis=-1)
    else:
        res = xint
    out = res + branch
    # lane-dense store: last dim is W*Cout (>= 128 in typical configs)
    o_ref[0] = out.reshape(H, W * Cout)


def stylegan2_discriminator_block(x_nchw, w1, b1, w2, b2, alpha):
    """x_nchw: (N, Cin, H, W) float32.  Returns (N, Cout, H, W)."""
    N, Cin, H, W = x_nchw.shape
    Cout = w1.shape[0]
    assert Cout >= Cin, "block only widens channels (matches PyTorch usage)"

    # equalized-lr scaling (lr_equal): weight * sqrt(2 / fan_in)
    scale1 = math.sqrt(2.0 / (Cin * 9))
    scale2 = math.sqrt(2.0 / (Cout * 9))

    # ---- glue: layout + padding + weight re-arrangement (plain JAX) ----
    x = jnp.transpose(x_nchw, (0, 2, 3, 1)).astype(jnp.float32)       # NHWC
    xpad = jnp.pad(x, ((0, 0), (1, 1), (1, 1), (0, 0)))               # spatial pad
    # (Cout, Cin, 3, 3) -> (ky, kx, Cin, Cout) -> (9*Cin, Cout), bf16 for MXU
    w1r = jnp.transpose(w1 * scale1, (2, 3, 1, 0)) \
             .reshape(9 * Cin, Cout).astype(jnp.bfloat16)
    w2r = jnp.transpose(w2 * scale2, (2, 3, 1, 0)) \
             .reshape(9 * Cout, Cout).astype(jnp.bfloat16)
    b1r = b1.reshape(1, Cout).astype(jnp.float32)
    b2r = b2.reshape(1, Cout).astype(jnp.float32)
    alphar = alpha.reshape(1, Cout).astype(jnp.float32)

    kernel = functools.partial(_block_kernel, H=H, W=W, Cin=Cin, Cout=Cout)
    out_flat = pl.pallas_call(
        kernel,
        out_shape=jax.ShapeDtypeStruct((N, H, W * Cout), jnp.float32),
        grid_spec=pltpu.PrefetchScalarGridSpec(
            num_scalar_prefetch=0,
            grid=(N,),
            in_specs=[
                pl.BlockSpec((1, H + 2, W + 2, Cin), lambda b: (b, 0, 0, 0)),
                pl.BlockSpec((9 * Cin, Cout), lambda b: (0, 0)),
                pl.BlockSpec((1, Cout), lambda b: (0, 0)),
                pl.BlockSpec((9 * Cout, Cout), lambda b: (0, 0)),
                pl.BlockSpec((1, Cout), lambda b: (0, 0)),
                pl.BlockSpec((1, Cout), lambda b: (0, 0)),
            ],
            out_specs=pl.BlockSpec((1, H, W * Cout), lambda b: (b, 0, 0)),
            scratch_shapes=[pltpu.VMEM((H + 2, W + 2, Cout), jnp.float32)],
        ),
        compiler_params=pltpu.CompilerParams(
            dimension_semantics=("parallel",)),
    )(xpad, w1r, b1r, w2r, b2r, alphar)

    out_nhwc = out_flat.reshape(N, H, W, Cout)
    return jnp.transpose(out_nhwc, (0, 3, 1, 2))                      # back to NCHW


# ---- pure-JAX reference (NCHW, mirrors the PyTorch forward, f32 throughout) ----
def reference_forward(x, w1, b1, w2, b2, alpha):
    Cin = x.shape[1]
    Cout = w1.shape[0]
    scale1 = math.sqrt(2.0 / (Cin * 9))
    scale2 = math.sqrt(2.0 / (Cout * 9))

    def conv(h, w, b, s):
        y = lax.conv_general_dilated(h, w * s, (1, 1), "SAME",
                                     dimension_numbers=("NCHW", "OIHW", "NCHW"))
        return y + b[None, :, None, None]

    out = _leaky_relu(conv(x, w1, b1, scale1))
    out = _leaky_relu(conv(out, w2, b2, scale2))
    if Cout > Cin:
        pad = jnp.zeros((x.shape[0], Cout - Cin, x.shape[2], x.shape[3]), x.dtype)
        x = jnp.concatenate([x, pad], axis=1)
    return x + alpha[None, :, None, None] * out


if __name__ == "__main__":
    N, Cin, H, W = 2, 4, 16, 16
    Cout = 8

    key = jax.random.PRNGKey(0)
    k1, k2, kx = jax.random.split(key, 3)
    # lr_equal conv weights: standard-normal init, scaled by sqrt(2/fan_in) at call time
    w1 = jax.random.normal(k1, (Cout, Cin, 3, 3), jnp.float32)
    w2 = jax.random.normal(k2, (Cout, Cout, 3, 3), jnp.float32)
    b1 = 0.01 * jnp.arange(Cout, dtype=jnp.float32)
    b2 = -0.02 * jnp.arange(Cout, dtype=jnp.float32)
    # ReZero initializes alpha to zeros; use a small constant so the conv branch
    # actually contributes to the output in this synthetic test.
    alpha = jnp.full((Cout,), 0.1, jnp.float32)

    x = jax.random.normal(kx, (N, Cin, H, W), jnp.float32)

    out = stylegan2_discriminator_block(x, w1, b1, w2, b2, alpha)
    out = jax.block_until_ready(out)

    ref = reference_forward(x, w1, b1, w2, b2, alpha)
    assert out.shape == (N, Cout, H, W), out.shape
    max_err = float(jnp.max(jnp.abs(out - ref)))
    # matmuls use bf16 operands with f32 accumulation -> small tolerance needed
    assert jnp.allclose(out, ref, atol=5e-2, rtol=5e-2), f"max_err={max_err}"
    print("KERNEL_OK")
</pallas_src>

<mosaic_0001>
module attributes {stable_mosaic.version = 11 : i64} {
  func.func @_block_kernel(%arg0: i32, %arg1: memref<1x18x18x4xf32, #tpu.memory_space<vmem>>, %arg2: memref<36x8xbf16, #tpu.memory_space<vmem>>, %arg3: memref<1x8xf32, #tpu.memory_space<vmem>>, %arg4: memref<72x8xbf16, #tpu.memory_space<vmem>>, %arg5: memref<1x8xf32, #tpu.memory_space<vmem>>, %arg6: memref<1x8xf32, #tpu.memory_space<vmem>>, %arg7: memref<1x16x128xf32, #tpu.memory_space<vmem>>, %arg8: memref<18x18x8xf32, #tpu.memory_space<vmem>>) attributes {dimension_semantics = [#tpu.dimension_semantics<parallel>], iteration_bounds = array<i64: 2>, scalar_prefetch = 0 : i64, scratch_operands = 1 : i64, tpu.core_type = #tpu.core_type<tc>, window_params = [{transform_indices = @transform_0, window_bounds = array<i64: 1, 18, 18, 4>}, {pipeline_mode = #tpu.pipeline_mode<synchronous>, transform_indices = @transform_1, window_bounds = array<i64: 36, 8>}, {pipeline_mode = #tpu.pipeline_mode<synchronous>, transform_indices = @transform_2, window_bounds = array<i64: 1, 8>}, {pipeline_mode = #tpu.pipeline_mode<synchronous>, transform_indices = @transform_3, window_bounds = array<i64: 72, 8>}, {pipeline_mode = #tpu.pipeline_mode<synchronous>, transform_indices = @transform_4, window_bounds = array<i64: 1, 8>}, {pipeline_mode = #tpu.pipeline_mode<synchronous>, transform_indices = @transform_5, window_bounds = array<i64: 1, 8>}, {transform_indices = @transform_6, window_bounds = array<i64: 1, 16, 128>}]} {
    %c0 = arith.constant 0 : index
    %c0_0 = arith.constant 0 : index
    %c0_1 = arith.constant 0 : index
    %c0_2 = arith.constant 0 : index
    %0 = vector.load %arg1[%c0, %c0_0, %c0_1, %c0_2] : memref<1x18x18x4xf32, #tpu.memory_space<vmem>>, vector<1x18x18x4xf32>
    %1 = vector.shape_cast %0 : vector<1x18x18x4xf32> to vector<18x18x4xf32>
    %2 = arith.truncf %1 : vector<18x18x4xf32> to vector<18x18x4xbf16>
    %3 = vector.extract_strided_slice %2 {offsets = [0, 0, 0], sizes = [16, 16, 4], strides = [1, 1, 1]} : vector<18x18x4xbf16> to vector<16x16x4xbf16>
    %4 = vector.shape_cast %3 : vector<16x16x4xbf16> to vector<256x4xbf16>
    %5 = vector.extract_strided_slice %2 {offsets = [0, 1, 0], sizes = [16, 16, 4], strides = [1, 1, 1]} : vector<18x18x4xbf16> to vector<16x16x4xbf16>
    %6 = vector.shape_cast %5 : vector<16x16x4xbf16> to vector<256x4xbf16>
    %7 = vector.extract_strided_slice %2 {offsets = [0, 2, 0], sizes = [16, 16, 4], strides = [1, 1, 1]} : vector<18x18x4xbf16> to vector<16x16x4xbf16>
    %8 = vector.shape_cast %7 : vector<16x16x4xbf16> to vector<256x4xbf16>
    %9 = vector.extract_strided_slice %2 {offsets = [1, 0, 0], sizes = [16, 16, 4], strides = [1, 1, 1]} : vector<18x18x4xbf16> to vector<16x16x4xbf16>
    %10 = vector.shape_cast %9 : vector<16x16x4xbf16> to vector<256x4xbf16>
    %11 = vector.extract_strided_slice %2 {offsets = [1, 1, 0], sizes = [16, 16, 4], strides = [1, 1, 1]} : vector<18x18x4xbf16> to vector<16x16x4xbf16>
    %12 = vector.shape_cast %11 : vector<16x16x4xbf16> to vector<256x4xbf16>
    %13 = vector.extract_strided_slice %2 {offsets = [1, 2, 0], sizes = [16, 16, 4], strides = [1, 1, 1]} : vector<18x18x4xbf16> to vector<16x16x4xbf16>
    %14 = vector.shape_cast %13 : vector<16x16x4xbf16> to vector<256x4xbf16>
    %15 = vector.extract_strided_slice %2 {offsets = [2, 0, 0], sizes = [16, 16, 4], strides = [1, 1, 1]} : vector<18x18x4xbf16> to vector<16x16x4xbf16>
    %16 = vector.shape_cast %15 : vector<16x16x4xbf16> to vector<256x4xbf16>
    %17 = vector.extract_strided_slice %2 {offsets = [2, 1, 0], sizes = [16, 16, 4], strides = [1, 1, 1]} : vector<18x18x4xbf16> to vector<16x16x4xbf16>
    %18 = vector.shape_cast %17 : vector<16x16x4xbf16> to vector<256x4xbf16>
    %19 = vector.extract_strided_slice %2 {offsets = [2, 2, 0], sizes = [16, 16, 4], strides = [1, 1, 1]} : vector<18x18x4xbf16> to vector<16x16x4xbf16>
    %20 = vector.shape_cast %19 : vector<16x16x4xbf16> to vector<256x4xbf16>
    %21 = tpu.concatenate %4, %6, %8, %10, %12, %14, %16, %18, %20 in 1 : vector<256x4xbf16>, vector<256x4xbf16>, vector<256x4xbf16>, vector<256x4xbf16>, vector<256x4xbf16>, vector<256x4xbf16>, vector<256x4xbf16>, vector<256x4xbf16>, vector<256x4xbf16> -> vector<256x36xbf16>
    %c0_3 = arith.constant 0 : index
    %c0_4 = arith.constant 0 : index
    %22 = vector.load %arg2[%c0_3, %c0_4] : memref<36x8xbf16, #tpu.memory_space<vmem>>, vector<36x8xbf16>
    %cst = arith.constant dense<0.000000e+00> : vector<256x8xf32>
    %23 = tpu.matmul %21, %22, %cst {dimension_numbers = #tpu.dot_dimension_numbers<[1], [0], [0], [1], [0, 0, 1, 1], [], []>} : vector<256x36xbf16>, vector<36x8xbf16>, vector<256x8xf32> -> vector<256x8xf32>
    %c0_5 = arith.constant 0 : index
    %c0_6 = arith.constant 0 : index
    %24 = vector.load %arg3[%c0_5, %c0_6] : memref<1x8xf32, #tpu.memory_space<vmem>>, vector<1x8xf32>
    %25 = vector.broadcast %24 : vector<1x8xf32> to vector<256x8xf32>
    %26 = arith.addf %23, %25 : vector<256x8xf32>
    %cst_7 = arith.constant 0.000000e+00 : f32
    %27 = vector.broadcast %cst_7 : f32 to vector<256x8xf32>
    %28 = arith.cmpf ogt, %26, %27 : vector<256x8xf32>
    %cst_8 = arith.constant 2.000000e-01 : f32
    %29 = vector.broadcast %cst_8 : f32 to vector<256x8xf32>
    %30 = arith.mulf %29, %26 : vector<256x8xf32>
    %31 = arith.select %28, %26, %30 : vector<256x8xi1>, vector<256x8xf32>
    %32 = vector.shape_cast %31 : vector<256x8xf32> to vector<16x16x8xf32>
    %cst_9 = arith.constant 0.000000e+00 : f32
    %33 = vector.broadcast %cst_9 : f32 to vector<1x18x8xf32>
    %cst_10 = arith.constant 0.000000e+00 : f32
    %34 = vector.broadcast %cst_10 : f32 to vector<18x1x8xf32>
    %c0_11 = arith.constant 0 : index
    %c0_12 = arith.constant 0 : index
    %c0_13 = arith.constant 0 : index
    %35 = vector.load %arg8[%c0_11, %c0_12, %c0_13] : memref<18x18x8xf32, #tpu.memory_space<vmem>>, vector<1x18x8xf32>
    tpu.vector_store %arg8[%c0_11, %c0_12, %c0_13], %33 {strides = array<i32>} : memref<18x18x8xf32, #tpu.memory_space<vmem>>, vector<1x18x8xf32>,
    %c17 = arith.constant 17 : index
    %c0_14 = arith.constant 0 : index
    %c0_15 = arith.constant 0 : index
    %36 = vector.load %arg8[%c17, %c0_14, %c0_15] : memref<18x18x8xf32, #tpu.memory_space<vmem>>, vector<1x18x8xf32>
    tpu.vector_store %arg8[%c17, %c0_14, %c0_15], %33 {strides = array<i32>} : memref<18x18x8xf32, #tpu.memory_space<vmem>>, vector<1x18x8xf32>,
    %c0_16 = arith.constant 0 : index
    %c0_17 = arith.constant 0 : index
    %c0_18 = arith.constant 0 : index
    %37 = vector.load %arg8[%c0_16, %c0_17, %c0_18] : memref<18x18x8xf32, #tpu.memory_space<vmem>>, vector<18x1x8xf32>
    tpu.vector_store %arg8[%c0_16, %c0_17, %c0_18], %34 {strides = array<i32>} : memref<18x18x8xf32, #tpu.memory_space<vmem>>, vector<18x1x8xf32>,
    %c0_19 = arith.constant 0 : index
    %c17_20 = arith.constant 17 : index
    %c0_21 = arith.constant 0 : index
    %38 = vector.load %arg8[%c0_19, %c17_20, %c0_21] : memref<18x18x8xf32, #tpu.memory_space<vmem>>, vector<18x1x8xf32>
    tpu.vector_store %arg8[%c0_19, %c17_20, %c0_21], %34 {strides = array<i32>} : memref<18x18x8xf32, #tpu.memory_space<vmem>>, vector<18x1x8xf32>,
    %c1 = arith.constant 1 : index
    %c1_22 = arith.constant 1 : index
    %c0_23 = arith.constant 0 : index
    %39 = vector.load %arg8[%c1, %c1_22, %c0_23] : memref<18x18x8xf32, #tpu.memory_space<vmem>>, vector<16x16x8xf32>
    tpu.vector_store %arg8[%c1, %c1_22, %c0_23], %32 {strides = array<i32>} : memref<18x18x8xf32, #tpu.memory_space<vmem>>, vector<16x16x8xf32>,
    %c0_24 = arith.constant 0 : index
    %c0_25 = arith.constant 0 : index
    %c0_26 = arith.constant 0 : index
    %40 = vector.load %arg8[%c0_24, %c0_25, %c0_26] : memref<18x18x8xf32, #tpu.memory_space<vmem>>, vector<18x18x8xf32>
    %41 = arith.truncf %40 : vector<18x18x8xf32> to vector<18x18x8xbf16>
    %42 = vector.extract_strided_slice %41 {offsets = [0, 0, 0], sizes = [16, 16, 8], strides = [1, 1, 1]} : vector<18x18x8xbf16> to vector<16x16x8xbf16>
    %43 = vector.shape_cast %42 : vector<16x16x8xbf16> to vector<256x8xbf16>
    %44 = vector.extract_strided_slice %41 {offsets = [0, 1, 0], sizes = [16, 16, 8], strides = [1, 1, 1]} : vector<18x18x8xbf16> to vector<16x16x8xbf16>
    %45 = vector.shape_cast %44 : vector<16x16x8xbf16> to vector<256x8xbf16>
    %46 = vector.extract_strided_slice %41 {offsets = [0, 2, 0], sizes = [16, 16, 8], strides = [1, 1, 1]} : vector<18x18x8xbf16> to vector<16x16x8xbf16>
    %47 = vector.shape_cast %46 : vector<16x16x8xbf16> to vector<256x8xbf16>
    %48 = vector.extract_strided_slice %41 {offsets = [1, 0, 0], sizes = [16, 16, 8], strides = [1, 1, 1]} : vector<18x18x8xbf16> to vector<16x16x8xbf16>
    %49 = vector.shape_cast %48 : vector<16x16x8xbf16> to vector<256x8xbf16>
    %50 = vector.extract_strided_slice %41 {offsets = [1, 1, 0], sizes = [16, 16, 8], strides = [1, 1, 1]} : vector<18x18x8xbf16> to vector<16x16x8xbf16>
    %51 = vector.shape_cast %50 : vector<16x16x8xbf16> to vector<256x8xbf16>
    %52 = vector.extract_strided_slice %41 {offsets = [1, 2, 0], sizes = [16, 16, 8], strides = [1, 1, 1]} : vector<18x18x8xbf16> to vector<16x16x8xbf16>
    %53 = vector.shape_cast %52 : vector<16x16x8xbf16> to vector<256x8xbf16>
    %54 = vector.extract_strided_slice %41 {offsets = [2, 0, 0], sizes = [16, 16, 8], strides = [1, 1, 1]} : vector<18x18x8xbf16> to vector<16x16x8xbf16>
    %55 = vector.shape_cast %54 : vector<16x16x8xbf16> to vector<256x8xbf16>
    %56 = vector.extract_strided_slice %41 {offsets = [2, 1, 0], sizes = [16, 16, 8], strides = [1, 1, 1]} : vector<18x18x8xbf16> to vector<16x16x8xbf16>
    %57 = vector.shape_cast %56 : vector<16x16x8xbf16> to vector<256x8xbf16>
    %58 = vector.extract_strided_slice %41 {offsets = [2, 2, 0], sizes = [16, 16, 8], strides = [1, 1, 1]} : vector<18x18x8xbf16> to vector<16x16x8xbf16>
    %59 = vector.shape_cast %58 : vector<16x16x8xbf16> to vector<256x8xbf16>
    %60 = tpu.concatenate %43, %45, %47, %49, %51, %53, %55, %57, %59 in 1 : vector<256x8xbf16>, vector<256x8xbf16>, vector<256x8xbf16>, vector<256x8xbf16>, vector<256x8xbf16>, vector<256x8xbf16>, vector<256x8xbf16>, vector<256x8xbf16>, vector<256x8xbf16> -> vector<256x72xbf16>
    %c0_27 = arith.constant 0 : index
    %c0_28 = arith.constant 0 : index
    %61 = vector.load %arg4[%c0_27, %c0_28] : memref<72x8xbf16, #tpu.memory_space<vmem>>, vector<72x8xbf16>
    %cst_29 = arith.constant dense<0.000000e+00> : vector<256x8xf32>
    %62 = tpu.matmul %60, %61, %cst_29 {dimension_numbers = #tpu.dot_dimension_numbers<[1], [0], [0], [1], [0, 0, 1, 1], [], []>} : vector<256x72xbf16>, vector<72x8xbf16>, vector<256x8xf32> -> vector<256x8xf32>
    %c0_30 = arith.constant 0 : index
    %c0_31 = arith.constant 0 : index
    %63 = vector.load %arg5[%c0_30, %c0_31] : memref<1x8xf32, #tpu.memory_space<vmem>>, vector<1x8xf32>
    %64 = vector.broadcast %63 : vector<1x8xf32> to vector<256x8xf32>
    %65 = arith.addf %62, %64 : vector<256x8xf32>
    %cst_32 = arith.constant 0.000000e+00 : f32
    %66 = vector.broadcast %cst_32 : f32 to vector<256x8xf32>
    %67 = arith.cmpf ogt, %65, %66 : vector<256x8xf32>
    %cst_33 = arith.constant 2.000000e-01 : f32
    %68 = vector.broadcast %cst_33 : f32 to vector<256x8xf32>
    %69 = arith.mulf %68, %65 : vector<256x8xf32>
    %70 = arith.select %67, %65, %69 : vector<256x8xi1>, vector<256x8xf32>
    %71 = vector.shape_cast %70 : vector<256x8xf32> to vector<16x16x8xf32>
    %c0_34 = arith.constant 0 : index
    %c0_35 = arith.constant 0 : index
    %72 = vector.load %arg6[%c0_34, %c0_35] : memref<1x8xf32, #tpu.memory_space<vmem>>, vector<1x8xf32>
    %73 = vector.shape_cast %72 : vector<1x8xf32> to vector<1x1x8xf32>
    %74 = vector.broadcast %73 : vector<1x1x8xf32> to vector<16x16x8xf32>
    %75 = arith.mulf %74, %71 : vector<16x16x8xf32>
    %76 = vector.extract_strided_slice %1 {offsets = [1, 1, 0], sizes = [16, 16, 4], strides = [1, 1, 1]} : vector<18x18x4xf32> to vector<16x16x4xf32>
    %cst_36 = arith.constant 0.000000e+00 : f32
    %77 = vector.broadcast %cst_36 : f32 to vector<16x16x4xf32>
    %78 = tpu.concatenate %76, %77 in 2 : vector<16x16x4xf32>, vector<16x16x4xf32> -> vector<16x16x8xf32>
    %79 = arith.addf %78, %75 : vector<16x16x8xf32>
    %80 = vector.shape_cast %79 : vector<16x16x8xf32> to vector<16x128xf32>
    %c0_37 = arith.constant 0 : index
    %c0_38 = arith.constant 0 : index
    %c0_39 = arith.constant 0 : index
    %81 = vector.load %arg7[%c0_37, %c0_38, %c0_39] : memref<1x16x128xf32, #tpu.memory_space<vmem>>, vector<1x16x128xf32>
    %82 = vector.shape_cast %81 : vector<1x16x128xf32> to vector<16x128xf32>
    %83 = vector.shape_cast %80 : vector<16x128xf32> to vector<1x16x128xf32>
    tpu.vector_store %arg7[%c0_37, %c0_38, %c0_39], %83 {strides = array<i32>} : memref<1x16x128xf32, #tpu.memory_space<vmem>>, vector<1x16x128xf32>,
    return
  }
  func.func @transform_0(%arg0: i32) -> (i32, i32, i32, i32) {
    %c0_i32 = arith.constant 0 : i32
    %c0_i32_0 = arith.constant 0 : i32
    %c0_i32_1 = arith.constant 0 : i32
    %c0_i32_2 = arith.constant 0 : i32
    return %arg0, %c0_i32, %c0_i32_0, %c0_i32_1 : i32, i32, i32, i32
  }
  func.func @transform_1(%arg0: i32) -> (i32, i32) {
    %c0_i32 = arith.constant 0 : i32
    %c0_i32_0 = arith.constant 0 : i32
    %c0_i32_1 = arith.constant 0 : i32
    return %c0_i32, %c0_i32_0 : i32, i32
  }
  func.func @transform_2(%arg0: i32) -> (i32, i32) {
    %c0_i32 = arith.constant 0 : i32
    %c0_i32_0 = arith.constant 0 : i32
    %c0_i32_1 = arith.constant 0 : i32
    return %c0_i32, %c0_i32_0 : i32, i32
  }
  func.func @transform_3(%arg0: i32) -> (i32, i32) {
    %c0_i32 = arith.constant 0 : i32
    %c0_i32_0 = arith.constant 0 : i32
    %c0_i32_1 = arith.constant 0 : i32
    return %c0_i32, %c0_i32_0 : i32, i32
  }
  func.func @transform_4(%arg0: i32) -> (i32, i32) {
    %c0_i32 = arith.constant 0 : i32
    %c0_i32_0 = arith.constant 0 : i32
    %c0_i32_1 = arith.constant 0 : i32
    return %c0_i32, %c0_i32_0 : i32, i32
  }
  func.func @transform_5(%arg0: i32) -> (i32, i32) {
    %c0_i32 = arith.constant 0 : i32
    %c0_i32_0 = arith.constant 0 : i32
    %c0_i32_1 = arith.constant 0 : i32
    return %c0_i32, %c0_i32_0 : i32, i32
  }
  func.func @transform_6(%arg0: i32) -> (i32, i32, i32) {
    %c0_i32 = arith.constant 0 : i32
    %c0_i32_0 = arith.constant 0 : i32
    %c0_i32_1 = arith.constant 0 : i32
    return %arg0, %c0_i32, %c0_i32_0 : i32, i32, i32
  }
}

</mosaic_0001>

<bundles_post_ra>
// kernel: tpu_custom_call.1
= control target key start
LH: loop header
LB: loop body
LE: loop exit
PB: predicated region body
PF: predicated region fallthrough
CT: control target
= control target key end

     0   :  { %11 = vsyncpa [#allocation4], 0  ;;  %s6532_s0 = inlined_call_operand.vmem [shape: f32[2,18,18,4], index: 0, kind: input, shape index: {}]   ;;  %s6533_s1 = inlined_call_operand.vmem [shape: bf16[36,8], index: 1, kind: input, shape index: {}]   ;;  %s6534_s2 = inlined_call_operand.vmem [shape: f32[1,8], index: 2, kind: input, shape index: {}]   ;;  %s6535_s3 = inlined_call_operand.vmem [shape: bf16[72,8], index: 3, kind: input, shape index: {}]   ;;  %s6536_s4 = inlined_call_operand.vmem [shape: f32[1,8], index: 4, kind: input, shape index: {}]   ;;  %s6537_s5 = inlined_call_operand.vmem [shape: f32[1,8], index: 5, kind: input, shape index: {}]   ;;  %s6538_s6 = inlined_call_operand.hbm [shape: f32[2,16,128], index: 6, kind: output, shape index: {}]  }
   0x1   :  { %13 = vsyncpa [#allocation4 + $0x1], 0  ;;  %s4438_s21 = smov 0   ;;  %s4440_s22 = smov 0  }
   0x2   :  { %s4442_s23 = smov 0   ;;  %s4444_s24 = smov 0  }
   0x3 LB: > { %s4459_s25 = sadd.s32 4294967295, %s4377_s24   ;;  %s4020_s26 = sadd.s32 4294967294, %s4377_s24   ;;  %s4377_s24 = sphi %s4444_s24, %s6552_s24   ;;  %s4373_s23 = sphi %s4442_s23, %s6551_s23   ;;  %s4369_s22 = sphi %s4440_s22, %s6550_s22   ;;  %s4365_s21 = sphi %s4438_s21, %s6549_s21  }
   0x4   : > { %s4463_s27 = sadd.s32 1, %s4377_s24   ;;  %s157_s28 = sadd.s32 1, %s4373_s23 }
   0x5   : > { %s154_s29 = ssub.s32 %s4377_s24, %s4463_s27  ;;  %p167_p0 = scmp.ne.s32.totalorder %s4373_s23, %s4369_s22 }
   0x6   : > { %p155_p1 = scmp.eq.s32.totalorder %s154_s29, 0  ;;  %p168_p2 = scmp.eq.s32.totalorder %s4459_s25, 1 }
   0x7   : > { %p173_p3 = scmp.ne.s32.totalorder %s4369_s22, %s4365_s21  ;;  %p174_p4 = scmp.eq.s32.totalorder %s4020_s26, 1 }
   0x8   : > { %s4474_s30 = scalar_select %p155_p1, %s4373_s23, %s157_s28  }
   0x9   : > { %p4476_p5 = por %p168_p2, %p167_p0  ;;  %p4480_p6 = por %p174_p4, %p173_p3 }
   0xa   : > { %p4023_p7 = scmp.ge.s32.totalorder %s4377_s24, 1  ;;  %p215_p8 = scmp.lt.s32.totalorder %s4377_s24, 3 }
   0xc   : > { %p216_p9 = pnand %p4023_p7, %p215_p8 }
   0xd   : > { %p245_p10 = scmp.lt.s32.totalorder (!%p216_p9), %s4459_s25, 1  ;;  %s4379_s14 = smov (!%p216_p9), 12  }
   0xe   : > { %219 = sbr.rel (%p216_p9) target bundleno = 1183 (0x49f), region = 44  ;;  %s4380_s15 = smov (!%p216_p9), 20  }
   0xf   : > { %s4381_s16 = smov (!%p216_p9), 8   ;;  %s4382_s17 = smov (!%p216_p9), 4  }
  0x10   : > { %s4383_s18 = smov (!%p216_p9), 16   ;;  %s4384_s19 = smov (!%p216_p9), 24  }
  0x11   : > { %s4385_s20 = smov (!%p216_p9), 28   ;;  %s4390_s26 = smov (!%p216_p9), 64  }
  0x12   : > { %s4391_s28 = smov (!%p216_p9), 56   ;;  %s4396_s29 = smov (!%p216_p9), 88  }
  0x13   : > { %s246_s9 = scalar_select %p245_p10, %s4459_s25, 1  ;;  %vm566_vm0 = vcmask 1046528   ;;  %vm341_vm1 = vsmask.f32 7424  ;;  %vm1229_vm2 = vcmask 1041408   ;;  %vm905_vm3 = vcmask 31744  }
  0x14   : > { %v4260_v62 = vld [vmem:[%s6533_s1 + $0x10] ss:$0 sps:$4 sm:$0x33]   ;;  %vm938_vm4 = vcmask 64512   ;;  %vm971_vm5 = vcmask 97280   ;;  %vm1004_vm6 = vcmask 130048  }
  0x15   : > { %s4197_s10 = smul.u32 432, %s246_s9  ;;  %4195 = vmatprep.subr.msk.bf16.mxu0 %vm1229_vm2, %v4260_v62  ;;  %vm1037_vm7 = vcmask 162816   ;;  %vm1070_vm8 = vcmask 195584   ;;  %vm1103_vm9 = vcmask 228352   ;;  %vm1136_vm10 = vcmask 261120   ;;  %s6541_s9 = smov 96  }
  0x16   : > { %vm1196_vm11 = vcmask 293888   ;;  %vm1498_vm12 = vcmask 57344   ;;  %vm1492_vm13 = vcmask 58368   ;;  %s4398_s11 = smov 104   ;;  %s4399_s12 = smov 112  }
  0x17   : > { %s4491_s13 = scalar_lea.vmem %s6532_s0, %s4197_s10  ;;  %s4386_s10 = smov 32  }
  0x18   : > { %v257_v0 = vld [vmem:[%s4491_s13 + $0x30] sm:$0xff]  ;;  %v258_v1 = vld [vmem:[%s4491_s13 + $0x38] sm:$0xff]  ;;  %v255_v4 = vld [vmem:[%s4491_s13 + $0x20] sm:$0xff] }
  0x19   : > { %v254_v2 = vld [vmem:[%s4491_s13 + $0x18] sm:$0xff]  ;;  %v4496_v3 = vpack.c.bf16 %v258_v1, %v257_v0  ;;  %v256_v5 = vld [vmem:[%s4491_s13 + $0x28] sm:$0x3]  ;;  %v251_v6 = vld [vmem:[%s4491_s13] sm:$0xff] }
  0x1a   : > { %v4501_v7 = vpack.c.bf16 %v255_v4, %v254_v2  ;;  %v308_v8 = vpack.c.bf16 %v256_v5, %v256_v5  ;;  %v252_v9 = vld [vmem:[%s4491_s13 + $0x8] sm:$0xff]  ;;  %v253_v10 = vld [vmem:[%s4491_s13 + $0x10] sm:$0x3]  ;;  %v259_v11 = vld [vmem:[%s4491_s13 + $0x40] sm:$0x3]  ;;  %v1231_v5 = vsel %vm1229_vm2, %v4260_v62, 0 }
  0x1b   : > { %715 = vrot.lane.b32.xlu1 %v4496_v3, %s4379_s14  ;;  %v4508_v12 = vpack.c.bf16 %v252_v9, %v251_v6  ;;  %v306_v13 = vpack.c.bf16 %v253_v10, %v253_v10  ;;  %v310_v14 = vpack.c.bf16 %v259_v11, %v259_v11  ;;  %v573_v25 = vrot.slane %v4496_v3, 1  ;;  %v260_v27 = vld [vmem:[%s4491_s13 + $0x48] sm:$0xff]  ;;  %v261_v28 = vld [vmem:[%s4491_s13 + $0x50] sm:$0xff]  ;;  %v262_v41 = vld [vmem:[%s4491_s13 + $0x58] sm:$0x3]  ;;  %4116 = vmatpush3.bf16.msra.mxu0 %v1231_v5 }
  0x1c   : > { %713 = vrot.lane.b32.xlu0 %v4501_v7, %s4379_s14  ;;  %v570_v15 = vrot.slane %v4501_v7, 1  ;;  %v571_v16 = vrot.slane %v308_v8, 1  ;;  %v355_v17 = vshrl.u32 %v4501_v7, 16  ;;  %v357_v18 = vshll.u32 %v4501_v7, 16  ;;  %v263_v57 = vld [vmem:[%s4491_s13 + $0x60] sm:$0xff]  ;;  %v264_v58 = vld [vmem:[%s4491_s13 + $0x68] sm:$0xff] }
  0x1d   : > { %v567_v19 = vrot.slane %v4508_v12, 1  ;;  %v568_v20 = vrot.slane %v306_v13, 1  ;;  %v343_v21 = vshrl.u32 %v4508_v12, 16  ;;  %v345_v22 = vshll.u32 %v4508_v12, 16  ;;  %v265_v63 = vld [vmem:[%s4491_s13 + $0x70] sm:$0x3] }
  0x1e   : > { %v572_v23 = vsel %vm566_vm0, %v570_v15, %v571_v16  ;;  %v350_v24 = vshll.u32 %v306_v13, 16  ;;  %v359_v26 = vrot.slane %v357_v18, 1  ;;  %v574_v31 = vrot.slane %v310_v14, 1  ;;  %v4261_v0 = vld [vmem:[%s6533_s1 + $0x8] sm:$0xff]   ;;  %v4262_v6 = vld [vmem:[%s6533_s1] sm:$0xff]   ;;  %v266_v11 = vld [vmem:[%s4491_s13 + $0x78] sm:$0xff] }
  0x1f   : > { %v569_v29 = vsel %vm566_vm0, %v567_v19, %v568_v20  ;;  %v347_v30 = vrot.slane %v345_v22, 1  ;;  %v362_v32 = vshll.u32 %v308_v8, 16  ;;  %v367_v35 = vshrl.u32 %v4496_v3, 16  ;;  %4117 = vmatprep.subr.bf16.mxu0 %v4261_v0  ;;  %v267_v13 = vld [vmem:[%s4491_s13 + $0x80] sm:$0xff] }
  0x20   : > { %777 = vrot.lane.b32.xlu0 %v572_v23, %s4380_s15  ;;  %681 = vrot.lane.b32.xlu1 %v569_v29, %s4381_s16  ;;  %v352_v33 = vrot.slane %v350_v24, 1  ;;  %v360_v34 = vor.u32 %v359_v26, %v355_v17  ;;  %v369_v36 = vshll.u32 %v4496_v3, 16  ;;  %v374_v39 = vshll.u32 %v310_v14, 16  ;;  %v268_v17 = vld [vmem:[%s4491_s13 + $0x88] sm:$0x3]  ;;  %v275_v62 = vld [vmem:[%s4491_s13 + $0xc0] sm:$0xff] }
  0x21   : > { %v348_v37 = vor.u32 %v347_v30, %v343_v21  ;;  %v364_v38 = vrot.slane %v362_v32, 1  ;;  %v4527_v40 = vpack.c.bf16 %v261_v28, %v260_v27  ;;  %v575_v44 = vsel %vm566_vm0, %v573_v25, %v574_v31  ;;  %4118 = vmatpush3.bf16.msra.mxu0 %v4261_v0  ;;  %v269_v30 = vld [vmem:[%s4491_s13 + $0x90] sm:$0xff]  ;;  %v270_v31 = vld [vmem:[%s4491_s13 + $0x98] sm:$0xff] }
  0x22   : > { %v371_v42 = vrot.slane %v369_v36, 1  ;;  %v312_v45 = vpack.c.bf16 %v262_v41, %v262_v41  ;;  %v376_v48 = vrot.slane %v374_v39, 1  ;;  %v4552_v61 = vpack.c.bf16 %v264_v58, %v263_v57  ;;  %4119 = vmatprep.subr.bf16.mxu0 %v4262_v6 }
  0x23   : > { %v353_v43 = vsel %vm341_vm1, %v348_v37, %v352_v33  ;;  %v365_v46 = vsel %vm341_vm1, %v360_v34, %v364_v38  ;;  %v381_v49 = vshll.u32 %v4527_v40, 16  ;;  %v379_v51 = vshrl.u32 %v4527_v40, 16 }
  0x24   : > { %683 = vrot.lane.b32.xlu1 %v572_v23, %s4381_s16  ;;  %649 = vrot.lane.b32.xlu0 %v353_v43, %s4382_s17  ;;  %v372_v47 = vor.u32 %v371_v42, %v367_v35  ;;  %v386_v53 = vshll.u32 %v312_v45, 16  ;;  %v576_v59 = vrot.slane %v4527_v40, 1  ;;  %v577_v60 = vrot.slane %v312_v45, 1  ;;  %v271_v35 = vld [vmem:[%s4491_s13 + $0xa0] sm:$0x3]  ;;  %v272_v43 = vld [vmem:[%s4491_s13 + $0xa8] sm:$0xff] }
  0x25   : > { %v383_v52 = vrot.slane %v381_v49, 1  ;;  %v314_v2 = vpack.c.bf16 %v265_v63, %v265_v63  ;;  %v393_v4 = vshll.u32 %v4552_v61, 16  ;;  %v391_v8 = vshrl.u32 %v4552_v61, 16  ;;  %4120 = vmatpush3.bf16.msra.mxu0 %v4262_v6  ;;  %v276_v63 = vld [vmem:[%s4491_s13 + $0xc8] sm:$0xff] }
  0x26   : > { %v377_v50 = vsel %vm341_vm1, %v372_v47, %v376_v48  ;;  %v388_v55 = vrot.slane %v386_v53, 1  ;;  %v578_v1 = vsel %vm566_vm0, %v576_v59, %v577_v60  ;;  %v4575_v16 = vpack.c.bf16 %v267_v13, %v266_v11  ;;  %v274_v48 = vld [vmem:[%s4491_s13 + $0xb8] sm:$0x3] }
  0x27   : > { %v384_v54 = vor.u32 %v383_v52, %v379_v51  ;;  %v395_v9 = vrot.slane %v393_v4, 1  ;;  %v398_v10 = vshll.u32 %v314_v2, 16  ;;  %v579_v18 = vrot.slane %v4552_v61, 1  ;;  %v277_v4 = vld [vmem:[%s4491_s13 + $0xd0] sm:$0x3]  ;;  %v278_v13 = vld [vmem:[%s4491_s13 + $0xd8] sm:$0xff] }
  0x28   : > { %779 = vrot.lane.b32.xlu1 %v575_v44, %s4380_s15  ;;  %651 = vrot.lane.b32.xlu0 %v365_v46, %s4382_s17  ;;  %v580_v20 = vrot.slane %v314_v2, 1  ;;  %v316_v21 = vpack.c.bf16 %v268_v17, %v268_v17  ;;  %v405_v22 = vshll.u32 %v4575_v16, 16  ;;  %v403_v24 = vshrl.u32 %v4575_v16, 16 }
  0x29   : > { %v389_v56 = vsel %vm341_vm1, %v384_v54, %v388_v55  ;;  %v396_v14 = vor.u32 %v395_v9, %v391_v8  ;;  %v400_v15 = vrot.slane %v398_v10, 1  ;;  %v582_v32 = vrot.slane %v4575_v16, 1 }
  0x2a   : > { %v581_v23 = vsel %vm566_vm0, %v579_v18, %v580_v20  ;;  %v407_v25 = vrot.slane %v405_v22, 1  ;;  %v410_v26 = vshll.u32 %v316_v21, 16  ;;  %v583_v33 = vrot.slane %v316_v21, 1 }
  0x2b   : > { %v401_v19 = vsel %vm341_vm1, %v396_v14, %v400_v15  ;;  %v4601_v34 = vpack.c.bf16 %v270_v31, %v269_v30  ;;  %v318_v37 = vpack.c.bf16 %v271_v35, %v271_v35  ;;  %v320_v52 = vpack.c.bf16 %v274_v48, %v274_v48  ;;  %v279_v14 = vld [vmem:[%s4491_s13 + $0xe0] sm:$0xff] }
  0x2c   : > { %747 = vrot.lane.b32.xlu1 %v377_v50, %s4383_s18  ;;  %745 = vrot.lane.b32.xlu0 %v365_v46, %s4383_s18  ;;  %v408_v27 = vor.u32 %v407_v25, %v403_v24  ;;  %v412_v28 = vrot.slane %v410_v26, 1  ;;  %v584_v36 = vsel %vm566_vm0, %v582_v32, %v583_v33  ;;  %v4641_v2 = vpack.c.bf16 %v276_v63, %v275_v62 }
  0x2d   : > { %v417_v38 = vshll.u32 %v4601_v34, 16  ;;  %v415_v39 = vshrl.u32 %v4601_v34, 16  ;;  %v422_v42 = vshll.u32 %v318_v37, 16  ;;  %v585_v49 = vrot.slane %v4601_v34, 1 }
  0x2e   : > { %v413_v29 = vsel %vm341_vm1, %v408_v27, %v412_v28  ;;  %v586_v51 = vrot.slane %v318_v37, 1  ;;  %v434_v57 = vshll.u32 %v320_v52, 16  ;;  %v322_v6 = vpack.c.bf16 %v277_v4, %v277_v4  ;;  %v281_v37 = vld [vmem:[%s4491_s13 + $0xf0] sm:$0xff] }
  0x2f   : > { %v419_v41 = vrot.slane %v417_v38, 1  ;;  %v424_v46 = vrot.slane %v422_v42, 1  ;;  %v441_v8 = vshll.u32 %v4641_v2, 16  ;;  %v439_v9 = vshrl.u32 %v4641_v2, 16  ;;  %v282_v38 = vld [vmem:[%s4491_s13 + $0xf8] sm:$0xff] }
  0x30   : > { %811 = vrot.lane.b32.xlu1 %v4527_v40, %s4384_s19  ;;  %809 = vrot.lane.b32.xlu0 %v4496_v3, %s4384_s19  ;;  %v587_v54 = vsel %vm566_vm0, %v585_v49, %v586_v51  ;;  %v436_v59 = vrot.slane %v434_v57, 1  ;;  %v446_v11 = vshll.u32 %v322_v6, 16  ;;  %v4655_v18 = vpack.c.bf16 %v279_v14, %v278_v13 }
  0x31   : > { %v420_v45 = vor.u32 %v419_v41, %v415_v39  ;;  %v443_v10 = vrot.slane %v441_v8, 1  ;;  %v591_v22 = vrot.slane %v4641_v2, 1  ;;  %v4681_v42 = vpack.c.bf16 %v282_v38, %v281_v37 }
  0x32   : > { %v448_v17 = vrot.slane %v446_v11, 1  ;;  %v453_v24 = vshll.u32 %v4655_v18, 16  ;;  %v451_v26 = vshrl.u32 %v4655_v18, 16  ;;  %v594_v39 = vrot.slane %v4655_v18, 1 }
  0x33   : > { %v444_v15 = vor.u32 %v443_v10, %v439_v9  ;;  %v465_v49 = vshll.u32 %v4681_v42, 16 }
  0x34   : > { %843 = vrot.lane.b32.xlu1 %v389_v56, %s4385_s20  ;;  %841 = vrot.lane.b32.xlu0 %v377_v50, %s4385_s20  ;;  %v455_v27 = vrot.slane %v453_v24, 1 }
  0x35   : > { %v449_v21 = vsel %vm341_vm1, %v444_v15, %v448_v17 }
  0x36   : > { %v456_v30 = vor.u32 %v455_v27, %v451_v26 }
  0x38   : > { %653 = vrot.lane.b32.xlu1 %v377_v50, %s4382_s17  ;;  %873 = vrot.lane.b32.xlu0 %v575_v44, %s4386_s10  ;;  %v425_v50 = vsel %vm341_vm1, %v420_v45, %v424_v46  ;;  %v283_v45 = vld [vmem:[%s4491_s13 + $0x100] sm:$0x3] }
  0x39   : > { %v326_v48 = vpack.c.bf16 %v283_v45, %v283_v45  ;;  %v287_v45 = vld [vmem:[%s4491_s13 + $0x120] sm:$0xff] }
  0x3b   : > { %v598_v9 = vrot.slane %v326_v48, 1 }
  0x3c   : > { %655 = vrot.lane.b32.xlu1 %v389_v56, %s4382_s17  ;;  %875 = vrot.lane.b32.xlu0 %v578_v1, %s4386_s10 }
  0x40   : > { %687 = vrot.lane.b32.xlu1 %v578_v1, %s4381_s16  ;;  %685 = vrot.lane.b32.xlu0 %v575_v44, %s4381_s16  ;;  %v273_v44 = vld [vmem:[%s4491_s13 + $0xb0] sm:$0xff] }
  0x41   : > { %v4615_v47 = vpack.c.bf16 %v273_v44, %v272_v43 }
  0x43   : > { %v429_v53 = vshll.u32 %v4615_v47, 16  ;;  %v427_v55 = vshrl.u32 %v4615_v47, 16  ;;  %v588_v0 = vrot.slane %v4615_v47, 1 }
  0x44   : > { %719 = vrot.lane.b32.xlu1 %v4552_v61, %s4379_s14  ;;  %717 = vrot.lane.b32.xlu0 %v4527_v40, %s4379_s14 }
  0x48   : > { %751 = vrot.lane.b32.xlu1 %v401_v19, %s4383_s18  ;;  %749 = vrot.lane.b32.xlu0 %v389_v56, %s4383_s18  ;;  %v431_v56 = vrot.slane %v429_v53, 1  ;;  %v467_v53 = vrot.slane %v465_v49, 1 }
  0x4a   : > { %v432_v58 = vor.u32 %v431_v56, %v427_v55 }
  0x4c   : > { %783 = vrot.lane.b32.xlu1 %v581_v23, %s4380_s15  ;;  %781 = vrot.lane.b32.xlu0 %v578_v1, %s4380_s15  ;;  %v437_v60 = vsel %vm341_vm1, %v432_v58, %v436_v59  ;;  %v589_v1 = vrot.slane %v320_v52, 1  ;;  %v463_v52 = vshrl.u32 %v4681_v42, 16  ;;  %v284_v58 = vld [vmem:[%s4491_s13 + $0x108] sm:$0xff]  ;;  %v285_v59 = vld [vmem:[%s4491_s13 + $0x110] sm:$0xff] }
  0x4e   : > { %v590_v5 = vsel %vm566_vm0, %v588_v0, %v589_v1  ;;  %v468_v63 = vor.u32 %v467_v53, %v463_v52  ;;  %v4700_v1 = vpack.c.bf16 %v285_v59, %v284_v58  ;;  %v289_v53 = vld [vmem:[%s4491_s13 + $0x130] sm:$0x3] }
  0x50   : > { %815 = vrot.lane.b32.xlu1 %v4575_v16, %s4384_s19  ;;  %813 = vrot.lane.b32.xlu0 %v4552_v61, %s4384_s19  ;;  %v477_v14 = vshll.u32 %v4700_v1, 16 }
  0x54   : > { %847 = vrot.lane.b32.xlu1 %v413_v29, %s4385_s20  ;;  %845 = vrot.lane.b32.xlu0 %v401_v19, %s4385_s20 }
  0x58   : > { %657 = vrot.lane.b32.xlu1 %v401_v19, %s4382_s17  ;;  %877 = vrot.lane.b32.xlu0 %v581_v23, %s4386_s10  ;;  %v280_v19 = vld [vmem:[%s4491_s13 + $0xe8] sm:$0x3] }
  0x59   : > { %v324_v20 = vpack.c.bf16 %v280_v19, %v280_v19 }
  0x5b   : > { %v458_v28 = vshll.u32 %v324_v20, 16  ;;  %v595_v41 = vrot.slane %v324_v20, 1 }
  0x5c   : > { %659 = vrot.lane.b32.xlu1 %v413_v29, %s4382_s17  ;;  %879 = vrot.lane.b32.xlu0 %v584_v36, %s4386_s10 }
  0x5d   : > { %v460_v31 = vrot.slane %v458_v28, 1  ;;  %v596_v46 = vsel %vm566_vm0, %v594_v39, %v595_v41 }
  0x5f   : > { %v461_v33 = vsel %vm341_vm1, %v456_v30, %v460_v31 }
  0x60   : > { %691 = vrot.lane.b32.xlu1 %v584_v36, %s4381_s16  ;;  %689 = vrot.lane.b32.xlu0 %v581_v23, %s4381_s16  ;;  %v592_v23 = vrot.slane %v322_v6, 1 }
  0x62   : > { %v593_v25 = vsel %vm566_vm0, %v591_v22, %v592_v23  ;;  %v475_v22 = vshrl.u32 %v4700_v1, 16 }
  0x64   : > { %723 = vrot.lane.b32.xlu1 %v4601_v34, %s4379_s14  ;;  %721 = vrot.lane.b32.xlu0 %v4575_v16, %s4379_s14 }
  0x68   : > { %755 = vrot.lane.b32.xlu1 %v425_v50, %s4383_s18  ;;  %753 = vrot.lane.b32.xlu0 %v413_v29, %s4383_s18 }
  0x6c   : > { %787 = vrot.lane.b32.xlu1 %v587_v54, %s4380_s15  ;;  %785 = vrot.lane.b32.xlu0 %v584_v36, %s4380_s15 }
  0x70   : > { %819 = vrot.lane.b32.xlu1 %v4615_v47, %s4384_s19  ;;  %817 = vrot.lane.b32.xlu0 %v4601_v34, %s4384_s19 }
  0x74   : > { %851 = vrot.lane.b32.xlu1 %v437_v60, %s4385_s20  ;;  %849 = vrot.lane.b32.xlu0 %v425_v50, %s4385_s20 }
  0x78   : > { %661 = vrot.lane.b32.xlu1 %v425_v50, %s4382_s17  ;;  %881 = vrot.lane.b32.xlu0 %v587_v54, %s4386_s10 }
  0x7c   : > { %663 = vrot.lane.b32.xlu1 %v437_v60, %s4382_s17  ;;  %883 = vrot.lane.b32.xlu0 %v590_v5, %s4386_s10 }
  0x80   : > { %695 = vrot.lane.b32.xlu1 %v590_v5, %s4381_s16  ;;  %693 = vrot.lane.b32.xlu0 %v587_v54, %s4381_s16  ;;  %v470_v54 = vshll.u32 %v326_v48, 16  ;;  %v600_v48 = vrot.slane %v4700_v1, 1 }
  0x82   : > { %v472_v0 = vrot.slane %v470_v54, 1 }
  0x84   : > { %727 = vrot.lane.b32.xlu1 %v4641_v2, %s4379_s14  ;;  %725 = vrot.lane.b32.xlu0 %v4615_v47, %s4379_s14  ;;  %v473_v11 = vsel %vm341_vm1, %v468_v63, %v472_v0 }
  0x88   : > { %759 = vrot.lane.b32.xlu1 %v449_v21, %s4383_s18  ;;  %757 = vrot.lane.b32.xlu0 %v437_v60, %s4383_s18 }
  0x8c   : > { %791 = vrot.lane.b32.xlu1 %v593_v25, %s4380_s15  ;;  %789 = vrot.lane.b32.xlu0 %v590_v5, %s4380_s15  ;;  %v286_v5 = vld [vmem:[%s4491_s13 + $0x118] sm:$0x3] }
  0x8d   : > { %v716_v29 = vpop.permute.xlu1 %715  ;;  %v328_v13 = vpack.c.bf16 %v286_v5, %v286_v5 }
  0x8e   : > { %v714_v32 = vpop.permute.xlu0 %713 }
  0x8f   : > { %v482_v26 = vshll.u32 %v328_v13, 16  ;;  %v601_v49 = vrot.slane %v328_v13, 1 }
  0x90   : > { %823 = vrot.lane.b32.xlu1 %v4655_v18, %s4384_s19  ;;  %821 = vrot.lane.b32.xlu0 %v4641_v2, %s4384_s19 }
  0x91   : > { %v602_v54 = vsel %vm566_vm0, %v600_v48, %v601_v49 }
  0x92   : > { %v778_v35 = vpop.permute.xlu0 %777  ;;  %v682_v36 = vpop.permute.xlu1 %681 }
  0x94   : > { %855 = vrot.lane.b32.xlu1 %v461_v33, %s4385_s20  ;;  %853 = vrot.lane.b32.xlu0 %v449_v21, %s4385_s20 }
  0x96   : > { %v684_v43 = vpop.permute.xlu1 %683  ;;  %v650_v44 = vpop.permute.xlu0 %649 }
  0x97   : > { %v907_v55 = vsel %vm905_vm3, %v4508_v12, %v650_v44 }
  0x98   : > { %665 = vrot.lane.b32.xlu1 %v449_v21, %s4382_s17  ;;  %885 = vrot.lane.b32.xlu0 %v593_v25, %s4386_s10  ;;  %v940_v62 = vsel %vm938_vm4, %v907_v55, %v682_v36  ;;  %v330_v55 = vpack.c.bf16 %v289_v53, %v289_v53  ;;  %v293_v53 = vld [vmem:[%s4491_s13 + $0x150] sm:$0xff] }
  0x99   : > { %v973_v8 = vsel %vm971_vm5, %v940_v62, %v714_v32 }
  0x9a   : > { %v780_v50 = vpop.permute.xlu1 %779  ;;  %v652_v51 = vpop.permute.xlu0 %651  ;;  %v494_v62 = vshll.u32 %v330_v55, 16 }
  0x9b   : > { %v909_v60 = vsel %vm905_vm3, %v4501_v7, %v652_v51  ;;  %v597_v7 = vrot.slane %v4681_v42, 1 }
  0x9c   : > { %667 = vrot.lane.b32.xlu1 %v461_v33, %s4382_s17  ;;  %887 = vrot.lane.b32.xlu0 %v596_v46, %s4386_s10  ;;  %v942_v6 = vsel %vm938_vm4, %v909_v60, %v684_v43 }
  0x9d   : > { %v975_v15 = vsel %vm971_vm5, %v942_v6, %v716_v29  ;;  %v599_v21 = vsel %vm566_vm0, %v597_v7, %v598_v9  ;;  %v496_v6 = vrot.slane %v494_v62, 1 }
  0x9e   : > { %v748_v56 = vpop.permute.xlu1 %747  ;;  %v746_v57 = vpop.permute.xlu0 %745 }
  0x9f   : > { %v1006_v10 = vsel %vm1004_vm6, %v973_v8, %v746_v57  ;;  %v1008_v23 = vsel %vm1004_vm6, %v975_v15, %v748_v56 }
  0xa0   : > { %699 = vrot.lane.b32.xlu1 %v596_v46, %s4381_s16  ;;  %697 = vrot.lane.b32.xlu0 %v593_v25, %s4381_s16  ;;  %v1039_v20 = vsel %vm1037_vm7, %v1006_v10, %v778_v35  ;;  %v479_v25 = vrot.slane %v477_v14, 1  ;;  %v1041_v31 = vsel %vm1037_vm7, %v1008_v23, %v780_v50  ;;  %v484_v35 = vrot.slane %v482_v26, 1  ;;  %v292_v10 = vld [vmem:[%s4491_s13 + $0x148] sm:$0x3] }
  0xa1   : > { %v604_v14 = vrot.slane %v330_v55, 1 }
  0xa2   : > { %v812_v12 = vpop.permute.xlu1 %811  ;;  %v810_v4 = vpop.permute.xlu0 %809 }
  0xa3   : > { %v1072_v24 = vsel %vm1070_vm8, %v1039_v20, %v810_v4  ;;  %v1074_v32 = vsel %vm1070_vm8, %v1041_v31, %v812_v12  ;;  %v290_v12 = vld [vmem:[%s4491_s13 + $0x138] sm:$0xff]  ;;  %v291_v4 = vld [vmem:[%s4491_s13 + $0x140] sm:$0xff] }
  0xa4   : > { %731 = vrot.lane.b32.xlu1 %v4681_v42, %s4379_s14  ;;  %729 = vrot.lane.b32.xlu0 %v4655_v18, %s4379_s14  ;;  %v4755_v8 = vpack.c.bf16 %v291_v4, %v290_v12 }
  0xa6   : > { %v844_v17 = vpop.permute.xlu1 %843  ;;  %v842_v19 = vpop.permute.xlu0 %841  ;;  %v501_v20 = vshll.u32 %v4755_v8, 16  ;;  %v606_v55 = vrot.slane %v4755_v8, 1 }
  0xa7   : > { %v1105_v27 = vsel %vm1103_vm9, %v1072_v24, %v842_v19  ;;  %v1107_v36 = vsel %vm1103_vm9, %v1074_v32, %v844_v17  ;;  %v332_v19 = vpack.c.bf16 %v292_v10, %v292_v10 }
  0xa8   : > { %763 = vrot.lane.b32.xlu1 %v473_v11, %s4383_s18  ;;  %761 = vrot.lane.b32.xlu0 %v461_v33, %s4383_s18  ;;  %v480_v33 = vor.u32 %v479_v25, %v475_v22 }
  0xaa   : > { %v654_v28 = vpop.permute.xlu1 %653  ;;  %v874_v29 = vpop.permute.xlu0 %873  ;;  %v485_v41 = vsel %vm341_vm1, %v480_v33, %v484_v35 }
  0xab   : > { %v1138_v30 = vsel %vm1136_vm10, %v1105_v27, %v874_v29  ;;  %v499_v27 = vshrl.u32 %v4755_v8, 16  ;;  %v503_v29 = vrot.slane %v501_v20, 1 }
  0xac   : > { %795 = vrot.lane.b32.xlu1 %v599_v21, %s4380_s15  ;;  %793 = vrot.lane.b32.xlu0 %v596_v46, %s4380_s15  ;;  %v288_v46 = vld [vmem:[%s4491_s13 + $0x128] sm:$0xff] }
  0xad   : > { %4121 = vmatprep.mubr.msk.bf16.mxu0 %vm1196_vm11, %v1138_v30  ;;  %v4741_v50 = vpack.c.bf16 %v288_v46, %v287_v45  ;;  %v506_v30 = vshll.u32 %v332_v19, 16 }
  0xae   : > { %v656_v37 = vpop.permute.xlu1 %655  ;;  %v876_v38 = vpop.permute.xlu0 %875 }
  0xaf   : > { %v1140_v39 = vsel %vm1136_vm10, %v1107_v36, %v876_v38  ;;  %v489_v56 = vshll.u32 %v4741_v50, 16  ;;  %v487_v59 = vshrl.u32 %v4741_v50, 16  ;;  %v603_v13 = vrot.slane %v4741_v50, 1 }
  0xb0   : > { %827 = vrot.lane.b32.xlu1 %v4700_v1, %s4384_s19  ;;  %825 = vrot.lane.b32.xlu0 %v4681_v42, %s4384_s19 }
  0xb1   : > { %4122 = vmatmul.mubr.msk.bf16.vlgmr.msra.gmra.mxu0 %vm1196_vm11, %v1140_v39  ;;  %v491_v60 = vrot.slane %v489_v56, 1  ;;  %v605_v26 = vsel %vm566_vm0, %v603_v13, %v604_v14  ;;  %v607_v56 = vrot.slane %v332_v19, 1  ;;  %v297_v13 = vld [vmem:[%s4491_s13 + $0x170] sm:$0xff] }
  0xb2   : > { %v688_v43 = vpop.permute.xlu1 %687  ;;  %v686_v44 = vpop.permute.xlu0 %685 }
  0xb3   : > { %v492_v5 = vor.u32 %v491_v60, %v487_v59  ;;  %v295_v60 = vld [vmem:[%s4491_s13 + $0x160] sm:$0x3]  ;;  %v608_v62 = vsel %vm566_vm0, %v606_v55, %v607_v56 }
  0xb4   : > { %859 = vrot.lane.b32.xlu1 %v485_v41, %s4385_s20  ;;  %857 = vrot.lane.b32.xlu0 %v473_v11, %s4385_s20 }
  0xb5   : > { %v497_v17 = vsel %vm341_vm1, %v492_v5, %v496_v6 }
  0xb6   : > { %v720_v51 = vpop.permute.xlu1 %719  ;;  %v718_v52 = vpop.permute.xlu0 %717 }
  0xb8   : > { %669 = vrot.lane.b32.xlu1 %v473_v11, %s4382_s17  ;;  %889 = vrot.lane.b32.xlu0 %v599_v21, %s4386_s10  ;;  %v911_v11 = vsel %vm905_vm3, %v4496_v3, %v654_v28 }
  0xb9   : > { %v944_v15 = vsel %vm938_vm4, %v911_v11, %v686_v44  ;;  %v296_v11 = vld [vmem:[%s4491_s13 + $0x168] sm:$0xff] }
  0xba   : > { %v752_v57 = vpop.permute.xlu1 %751  ;;  %v750_v58 = vpop.permute.xlu0 %749  ;;  %v977_v3 = vsel %vm971_vm5, %v944_v15, %v718_v52 }
  0xbb   : > { %v1010_v24 = vsel %vm1004_vm6, %v977_v3, %v750_v58 }
  0xbc   : > { %671 = vrot.lane.b32.xlu1 %v485_v41, %s4382_s17  ;;  %891 = vrot.lane.b32.xlu0 %v602_v54, %s4386_s10 }
  0xbe   : > { %v784_v63 = vpop.permute.xlu1 %783  ;;  %v782_v0 = vpop.permute.xlu0 %781 }
  0xbf   : > { %v1043_v25 = vsel %vm1037_vm7, %v1010_v24, %v782_v0 }
  0xc0   : > { %703 = vrot.lane.b32.xlu1 %v602_v54, %s4381_s16  ;;  %701 = vrot.lane.b32.xlu0 %v599_v21, %s4381_s16  ;;  %v913_v21 = vsel %vm905_vm3, %v4527_v40, %v656_v37 }
  0xc1   : > { %v946_v28 = vsel %vm938_vm4, %v913_v21, %v688_v43  ;;  %v508_v43 = vrot.slane %v506_v30, 1  ;;  %v298_v21 = vld [vmem:[%s4491_s13 + $0x178] sm:$0x3] }
  0xc2   : > { %v816_v7 = vpop.permute.xlu1 %815  ;;  %v814_v9 = vpop.permute.xlu0 %813  ;;  %v979_v31 = vsel %vm971_vm5, %v946_v28, %v720_v51 }
  0xc3   : > { %v1076_v40 = vsel %vm1070_vm8, %v1043_v25, %v814_v9  ;;  %v1012_v36 = vsel %vm1004_vm6, %v979_v31, %v752_v57 }
  0xc4   : > { %735 = vrot.lane.b32.xlu1 %v4741_v50, %s4379_s14  ;;  %733 = vrot.lane.b32.xlu0 %v4700_v1, %s4379_s14  ;;  %v1045_v38 = vsel %vm1037_vm7, %v1012_v36, %v784_v63  ;;  %v334_v63 = vpack.c.bf16 %v295_v60, %v295_v60 }
  0xc5   : > { %v1078_v39 = vsel %vm1070_vm8, %v1045_v38, %v816_v7 }
  0xc6   : > { %v848_v22 = vpop.permute.xlu1 %847  ;;  %v846_v23 = vpop.permute.xlu0 %845  ;;  %v518_v7 = vshll.u32 %v334_v63, 16 }
  0xc7   : > { %v1109_v32 = vsel %vm1103_vm9, %v1076_v40, %v846_v23  ;;  %v1111_v44 = vsel %vm1103_vm9, %v1078_v39, %v848_v22  ;;  %v610_v23 = vrot.slane %v334_v63, 1  ;;  %v300_v63 = vld [vmem:[%s4491_s13 + $0x188] sm:$0xff] }
  0xc8   : > { %767 = vrot.lane.b32.xlu1 %v497_v17, %s4383_s18  ;;  %765 = vrot.lane.b32.xlu0 %v485_v41, %s4383_s18  ;;  %v504_v41 = vor.u32 %v503_v29, %v499_v27  ;;  %v520_v15 = vrot.slane %v518_v7, 1  ;;  %v301_v7 = vld [vmem:[%s4491_s13 + $0x190] sm:$0x3] }
  0xca   : > { %v658_v33 = vpop.permute.xlu1 %657  ;;  %v878_v35 = vpop.permute.xlu0 %877  ;;  %v509_v49 = vsel %vm341_vm1, %v504_v41, %v508_v43 }
  0xcb   : > { %v1142_v37 = vsel %vm1136_vm10, %v1109_v32, %v878_v35  ;;  %v915_v3 = vsel %vm905_vm3, %v4552_v61, %v658_v33 }
  0xcc   : > { %799 = vrot.lane.b32.xlu1 %v605_v26, %s4380_s15  ;;  %797 = vrot.lane.b32.xlu0 %v602_v54, %s4380_s15  ;;  %v294_v54 = vld [vmem:[%s4491_s13 + $0x158] sm:$0xff] }
  0xcd   : > { %4125 = vmatprep.mubr.msk.bf16.mxu0 %vm1196_vm11, %v1142_v37  ;;  %v4801_v57 = vpack.c.bf16 %v294_v54, %v293_v53 }
  0xce   : > { %v660_v45 = vpop.permute.xlu1 %659  ;;  %v880_v46 = vpop.permute.xlu0 %879 }
  0xcf   : > { %v1144_v48 = vsel %vm1136_vm10, %v1111_v44, %v880_v46  ;;  %v513_v0 = vshll.u32 %v4801_v57, 16  ;;  %v511_v5 = vshrl.u32 %v4801_v57, 16  ;;  %v609_v22 = vrot.slane %v4801_v57, 1 }
  0xd0   : > { %831 = vrot.lane.b32.xlu1 %v4755_v8, %s4384_s19  ;;  %829 = vrot.lane.b32.xlu0 %v4741_v50, %s4384_s19  ;;  %v917_v61 = vsel %vm905_vm3, %v4575_v16, %v660_v45  ;;  %v4387_v46 = vmov 0.0  }
  0xd1   : > { %4126 = vmatmul.mubr.msk.bf16.gmra.mxu0 %vm1196_vm11, %v1144_v48  ;;  %v515_v6 = vrot.slane %v513_v0, 1  ;;  %v4845_v32 = vsel %vm566_vm0, %v609_v22, %v610_v23  ;;  %1490 = vst.msk [vmem:[#allocation2] sm:$0xff] %vm938_vm4, %v4387_v46  ;;  %1491 = vst.msk [vmem:[#allocation2 + $0x8] sm:$0xff] %vm938_vm4, %v4387_v46 }
  0xd2   : > { %v692_v51 = vpop.permute.xlu1 %691  ;;  %v690_v52 = vpop.permute.xlu0 %689  ;;  %1495 = vst.msk [vmem:[#allocation2 + $0x198] sm:$0xff] %vm938_vm4, %v4387_v46  ;;  %1496 = vst.msk [vmem:[#allocation2 + $0x1a0] sm:$0xff] %vm938_vm4, %v4387_v46 }
  0xd3   : > { %v516_v14 = vor.u32 %v515_v6, %v511_v5  ;;  %v948_v24 = vsel %vm938_vm4, %v915_v3, %v690_v52  ;;  %v950_v16 = vsel %vm938_vm4, %v917_v61, %v692_v51  ;;  %1499 = vst.msk [vmem:[#allocation2] sm:$0x1] %vm1498_vm12, %v4387_v46  ;;  %1500 = vst.msk [vmem:[#allocation2 + $0x18] sm:$0x1] %vm1498_vm12, %v4387_v46  ;;  %v303_v3 = vld [vmem:[%s4491_s13 + $0x1a0] sm:$0xff] }
  0xd4   : > { %863 = vrot.lane.b32.xlu1 %v509_v49, %s4385_s20  ;;  %861 = vrot.lane.b32.xlu0 %v497_v17, %s4385_s20  ;;  %1501 = vst.msk [vmem:[#allocation2 + $0x30] sm:$0x1] %vm1498_vm12, %v4387_v46  ;;  %1502 = vst.msk [vmem:[#allocation2 + $0x48] sm:$0x1] %vm1498_vm12, %v4387_v46 }
  0xd5   : > { %v4829_v25 = vsel %vm341_vm1, %v516_v14, %v520_v15  ;;  %1503 = vst.msk [vmem:[#allocation2 + $0x60] sm:$0x1] %vm1498_vm12, %v4387_v46  ;;  %1504 = vst.msk [vmem:[#allocation2 + $0x78] sm:$0x1] %vm1498_vm12, %v4387_v46 }
  0xd6   : > { %v724_v58 = vpop.permute.xlu1 %723  ;;  %v722_v59 = vpop.permute.xlu0 %721  ;;  %1505 = vst.msk [vmem:[#allocation2 + $0x90] sm:$0x1] %vm1498_vm12, %v4387_v46  ;;  %1506 = vst.msk [vmem:[#allocation2 + $0xa8] sm:$0x1] %vm1498_vm12, %v4387_v46 }
  0xd7   : > { %v981_v28 = vsel %vm971_vm5, %v948_v24, %v722_v59  ;;  %v983_v38 = vsel %vm971_vm5, %v950_v16, %v724_v58  ;;  %1507 = vst.msk [vmem:[#allocation2 + $0xc0] sm:$0x1] %vm1498_vm12, %v4387_v46  ;;  %1508 = vst.msk [vmem:[#allocation2 + $0xd8] sm:$0x1] %vm1498_vm12, %v4387_v46 }
  0xd8   : > { %673 = vrot.lane.b32.xlu1 %v497_v17, %s4382_s17  ;;  %893 = vrot.lane.b32.xlu0 %v605_v26, %s4386_s10  ;;  %v4815_v17 = vpack.c.bf16 %v297_v13, %v296_v11  ;;  %1509 = vst.msk [vmem:[#allocation2 + $0xf0] sm:$0x1] %vm1498_vm12, %v4387_v46  ;;  %1510 = vst.msk [vmem:[#allocation2 + $0x108] sm:$0x1] %vm1498_vm12, %v4387_v46 }
  0xd9   : > { %1511 = vst.msk [vmem:[#allocation2 + $0x120] sm:$0x1] %vm1498_vm12, %v4387_v46  ;;  %1512 = vst.msk [vmem:[#allocation2 + $0x138] sm:$0x1] %vm1498_vm12, %v4387_v46 }
  0xda   : > { %v756_v12 = vpop.permute.xlu1 %755  ;;  %v754_v4 = vpop.permute.xlu0 %753  ;;  %v525_v27 = vshll.u32 %v4815_v17, 16  ;;  %v523_v33 = vshrl.u32 %v4815_v17, 16  ;;  %1513 = vst.msk [vmem:[#allocation2 + $0x150] sm:$0x1] %vm1498_vm12, %v4387_v46  ;;  %1514 = vst.msk [vmem:[#allocation2 + $0x168] sm:$0x1] %vm1498_vm12, %v4387_v46 }
  0xdb   : > { %v1014_v30 = vsel %vm1004_vm6, %v981_v28, %v754_v4  ;;  %v1016_v44 = vsel %vm1004_vm6, %v983_v38, %v756_v12  ;;  %1515 = vst.msk [vmem:[#allocation2 + $0x180] sm:$0x1] %vm1498_vm12, %v4387_v46  ;;  %1518 = vst.msk [vmem:[#allocation2 + $0x29] sm:$0x1] %vm1498_vm12, %v4387_v46  ;;  %v612_v0 = vrot.slane %v4815_v17, 1  ;;  %v1568_v38 = vld [vmem:[#allocation2] sm:$0xff] }
  0xdc   : > { %675 = vrot.lane.b32.xlu1 %v509_v49, %s4382_s17  ;;  %895 = vrot.lane.b32.xlu0 %v608_v62, %s4386_s10  ;;  %v527_v36 = vrot.slane %v525_v27, 1  ;;  %1519 = vst.msk [vmem:[#allocation2 + $0x41] sm:$0x1] %vm1498_vm12, %v4387_v46  ;;  %1520 = vst.msk [vmem:[#allocation2 + $0x59] sm:$0x1] %vm1498_vm12, %v4387_v46 }
  0xdd   : > { %1521 = vst.msk [vmem:[#allocation2 + $0x71] sm:$0x1] %vm1498_vm12, %v4387_v46  ;;  %1522 = vst.msk [vmem:[#allocation2 + $0x89] sm:$0x1] %vm1498_vm12, %v4387_v46  ;;  %v304_v27 = vld [vmem:[%s4491_s13 + $0x1a8] sm:$0x3] }
  0xde   : > { %v788_v9 = vpop.permute.xlu1 %787  ;;  %v786_v10 = vpop.permute.xlu0 %785  ;;  %1523 = vst.msk [vmem:[#allocation2 + $0xa1] sm:$0x1] %vm1498_vm12, %v4387_v46  ;;  %1524 = vst.msk [vmem:[#allocation2 + $0xb9] sm:$0x1] %vm1498_vm12, %v4387_v46  ;;  %v528_v51 = vor.u32 %v527_v36, %v523_v33 }
  0xdf   : > { %v1047_v31 = vsel %vm1037_vm7, %v1014_v30, %v786_v10  ;;  %v1049_v48 = vsel %vm1037_vm7, %v1016_v44, %v788_v9  ;;  %1525 = vst.msk [vmem:[#allocation2 + $0xd1] sm:$0x1] %vm1498_vm12, %v4387_v46  ;;  %1526 = vst.msk [vmem:[#allocation2 + $0xe9] sm:$0x1] %vm1498_vm12, %v4387_v46  ;;  %v338_v10 = vpack.c.bf16 %v301_v7, %v301_v7 }
  0xe0   : > { %707 = vrot.lane.b32.xlu1 %v608_v62, %s4381_s16  ;;  %705 = vrot.lane.b32.xlu0 %v605_v26, %s4381_s16  ;;  %v4831_v26 = vpack.c.bf16 %v298_v21, %v298_v21  ;;  %1527 = vst.msk [vmem:[#allocation2 + $0x101] sm:$0x1] %vm1498_vm12, %v4387_v46  ;;  %1528 = vst.msk [vmem:[#allocation2 + $0x119] sm:$0x1] %vm1498_vm12, %v4387_v46  ;;  %v302_v21 = vld [vmem:[%s4491_s13 + $0x198] sm:$0xff] }
  0xe1   : > { %1529 = vst.msk [vmem:[#allocation2 + $0x131] sm:$0x1] %vm1498_vm12, %v4387_v46  ;;  %1530 = vst.msk [vmem:[#allocation2 + $0x149] sm:$0x1] %vm1498_vm12, %v4387_v46  ;;  %v4939_v24 = vpack.c.bf16 %v303_v3, %v302_v21  ;;  %v630_v16 = vrot.slane %v338_v10, 1 }
  0xe2   : > { %v4817_v19 = vpop.permute.xlu1 %819  ;;  %v818_v20 = vpop.permute.xlu0 %817  ;;  %v530_v37 = vshll.u32 %v4831_v26, 16  ;;  %1531 = vst.msk [vmem:[#allocation2 + $0x161] sm:$0x1] %vm1498_vm12, %v4387_v46  ;;  %1532 = vst.msk [vmem:[#allocation2 + $0x179] sm:$0x1] %vm1498_vm12, %v4387_v46  ;;  %v613_v12 = vrot.slane %v4831_v26, 1 }
  0xe3   : > { %v1080_v35 = vsel %vm1070_vm8, %v1047_v31, %v818_v20  ;;  %1533 = vst.msk [vmem:[#allocation2 + $0x191] sm:$0x1] %vm1498_vm12, %v4387_v46  ;;  %1516 = vst.msk [vmem:[#allocation2 + $0x198] sm:$0x1] %vm1498_vm12, %v4387_v46  ;;  %v623_v20 = vshll.u32 %v338_v10, 16  ;;  %v635_v30 = vshll.u32 %v4939_v24, 16 }
  0xe4   : > { %739 = vrot.lane.b32.xlu1 %v4801_v57, %s4379_s14  ;;  %737 = vrot.lane.b32.xlu0 %v4755_v8, %s4379_s14  ;;  %v532_v52 = vrot.slane %v530_v37, 1  ;;  %1493 = vst.msk [vmem:[#allocation2 + $0x10] sm:$0x3] %vm1492_vm13, %v4387_v46  ;;  %1497 = vst.msk [vmem:[#allocation2 + $0x1a8] sm:$0x3] %vm1492_vm13, %v4387_v46  ;;  %v614_v9 = vsel %vm566_vm0, %v612_v0, %v613_v12  ;;  %v633_v44 = vshrl.u32 %v4939_v24, 16 }
  0xe5   : > { %1517 = vst.msk [vmem:[#allocation2 + $0x11] sm:$0x1] %vm1498_vm12, %v4387_v46  ;;  %1534 = vst.msk [vmem:[#allocation2 + $0x1a9] sm:$0x1] %vm1498_vm12, %v4387_v46  ;;  %v625_v26 = vrot.slane %v623_v20, 1  ;;  %vm2556_vm13 = vcmask 1043456  }
  0xe6   : > { %v4837_v40 = vpop.permute.xlu1 %851  ;;  %v850_v29 = vpop.permute.xlu0 %849  ;;  %v533_v58 = vsel %vm341_vm1, %v528_v51, %v532_v52 }
  0xe7   : > { %v1113_v39 = vsel %vm1103_vm9, %v1080_v35, %v850_v29  ;;  %v340_v29 = vpack.c.bf16 %v304_v27, %v304_v27 }
  0xe8   : > { %771 = vrot.lane.b32.xlu1 %v4829_v25, %s4383_s18  ;;  %769 = vrot.lane.b32.xlu0 %v509_v49, %s4383_s18  ;;  %v1082_v49 = vsel %vm1070_vm8, %v1049_v48, %v4817_v19 }
  0xe9   : > { %v1115_v53 = vsel %vm1103_vm9, %v1082_v49, %v4837_v40  ;;  %v640_v46 = vshll.u32 %v340_v29, 16 }
  0xea   : > { %v4853_v41 = vpop.permute.xlu1 %661  ;;  %v882_v43 = vpop.permute.xlu0 %881 }
  0xeb   : > { %v1146_v45 = vsel %vm1136_vm10, %v1113_v39, %v882_v43  ;;  %v919_v40 = vsel %vm905_vm3, %v4601_v34, %v4853_v41  ;;  %v1569_v39 = vld [vmem:[#allocation2 + $0x8] sm:$0xff] }
  0xec   : > { %803 = vrot.lane.b32.xlu1 %v4845_v32, %s4380_s15  ;;  %801 = vrot.lane.b32.xlu0 %v608_v62, %s4380_s15  ;;  %v299_v62 = vld [vmem:[%s4491_s13 + $0x180] sm:$0xff]  ;;  %v4964_v51 = vpack.c.bf16 %v1569_v39, %v1568_v38 }
  0xed   : > { %4129 = vmatprep.mubr.msk.bf16.mxu0 %vm1196_vm11, %v1146_v45  ;;  %v4922_v4 = vpack.c.bf16 %v300_v63, %v299_v62  ;;  %v637_v45 = vrot.slane %v635_v30, 1  ;;  %v642_v63 = vrot.slane %v640_v46, 1 }
  0xee   : > { %v664_v54 = vpop.permute.xlu1 %663  ;;  %v884_v55 = vpop.permute.xlu0 %883  ;;  %v1882_v27 = vrot.slane %v4964_v51, 1 }
  0xef   : > { %v1148_v56 = vsel %vm1136_vm10, %v1115_v53, %v884_v55  ;;  %v618_v11 = vshll.u32 %v4922_v4, 16  ;;  %v616_v15 = vshrl.u32 %v4922_v4, 16  ;;  %v629_v33 = vrot.slane %v4922_v4, 1 }
  0xf0   : > { %835 = vrot.lane.b32.xlu1 %v4815_v17, %s4384_s19  ;;  %833 = vrot.lane.b32.xlu0 %v4801_v57, %s4384_s19  ;;  %v921_v35 = vsel %vm905_vm3, %v4615_v47, %v664_v54 }
  0xf1   : > { %4130 = vmatmul.mubr.msk.bf16.gmra.mxu0 %vm1196_vm11, %v1148_v56  ;;  %v620_v19 = vrot.slane %v618_v11, 1  ;;  %v631_v49 = vsel %vm566_vm0, %v629_v33, %v630_v16  ;;  %v1570_v56 = vld [vmem:[#allocation2 + $0x10] sm:$0x3] }
  0xf2   : > { %v696_v59 = vpop.permute.xlu1 %695  ;;  %v694_v60 = vpop.permute.xlu0 %693  ;;  %v1623_v12 = vpack.c.bf16 %v1570_v56, %v1570_v56 }
  0xf3   : > { %v952_v31 = vsel %vm938_vm4, %v919_v40, %v694_v60  ;;  %v954_v47 = vsel %vm938_vm4, %v921_v35, %v696_v59  ;;  %v638_v59 = vor.u32 %v637_v45, %v633_v44 }
  0xf4   : > { %867 = vrot.lane.b32.xlu1 %v533_v58, %s4385_s20  ;;  %865 = vrot.lane.b32.xlu0 %v4829_v25, %s4385_s20  ;;  %v1666_v20 = vshll.u32 %v1623_v12, 16 }
  0xf6   : > { %v728_v5 = vpop.permute.xlu1 %727  ;;  %v726_v6 = vpop.permute.xlu0 %725 }
  0xf7   : > { %v985_v34 = vsel %vm971_vm5, %v952_v31, %v726_v6  ;;  %v987_v52 = vsel %vm971_vm5, %v954_v47, %v728_v5  ;;  %v1661_v5 = vshll.u32 %v4964_v51, 16 }
  0xf8   : > { %677 = vrot.lane.b32.xlu1 %v4829_v25, %s4382_s17  ;;  %897 = vrot.lane.b32.xlu0 %v4845_v32, %s4386_s10  ;;  %v621_v25 = vor.u32 %v620_v19, %v616_v15  ;;  %v1659_v15 = vshrl.u32 %v4964_v51, 16 }
  0xf9   : > { %v1663_v19 = vrot.slane %v1661_v5, 1 }
  0xfa   : > { %v760_v13 = vpop.permute.xlu1 %759  ;;  %v758_v14 = vpop.permute.xlu0 %757 }
  0xfb   : > { %v1018_v41 = vsel %vm1004_vm6, %v985_v34, %v758_v14  ;;  %v647_v14 = vrot.slane %v340_v29, 1 }
  0xfc   : > { %679 = vrot.lane.b32.xlu1 %v533_v58, %s4382_s17  ;;  %899 = vrot.lane.b32.xlu0 %v614_v9, %s4386_s10  ;;  %s4388_s17 = smov 48  }
  0xfe   : > { %v792_v22 = vpop.permute.xlu1 %791  ;;  %v790_v23 = vpop.permute.xlu0 %789 }
  0xff   : > { %v1051_v43 = vsel %vm1037_vm7, %v1018_v41, %v790_v23  ;;  %v1668_v23 = vrot.slane %v1666_v20, 1 }
 0x100   : > { %711 = vrot.lane.b32.xlu1 %v614_v9, %s4381_s16  ;;  %709 = vrot.lane.b32.xlu0 %v4845_v32, %s4381_s16  ;;  %v626_v32 = vsel %vm341_vm1, %v621_v25, %v625_v26 }
 0x102   : > { %v824_v61 = vpop.permute.xlu1 %823  ;;  %v822_v28 = vpop.permute.xlu0 %821 }
 0x103   : > { %v1084_v48 = vsel %vm1070_vm8, %v1051_v43, %v822_v28 }
 0x104   : > { %743 = vrot.lane.b32.xlu1 %v4922_v4, %s4379_s14  ;;  %741 = vrot.lane.b32.xlu0 %v4815_v17, %s4379_s14  ;;  %s4394_s14 = smov 72  }
 0x106   : > { %v856_v36 = vpop.permute.xlu1 %855  ;;  %v854_v37 = vpop.permute.xlu0 %853 }
 0x107   : > { %v1117_v53 = vsel %vm1103_vm9, %v1084_v48, %v854_v37 }
 0x108   : > { %775 = vrot.lane.b32.xlu1 %v626_v32, %s4383_s18  ;;  %773 = vrot.lane.b32.xlu0 %v533_v58, %s4383_s18  ;;  %v1020_v58 = vsel %vm1004_vm6, %v987_v52, %v760_v13  ;;  %v646_v13 = vrot.slane %v4939_v24, 1 }
 0x109   : > { %v1053_v62 = vsel %vm1037_vm7, %v1020_v58, %v792_v22 }
 0x10a   : > { %v666_v54 = vpop.permute.xlu1 %665  ;;  %v886_v55 = vpop.permute.xlu0 %885  ;;  %v1086_v0 = vsel %vm1070_vm8, %v1053_v62, %v824_v61  ;;  %v648_v22 = vsel %vm566_vm0, %v646_v13, %v647_v14  ;;  %v1883_v61 = vrot.slane %v1623_v12, 1 }
 0x10b   : > { %v1150_v60 = vsel %vm1136_vm10, %v1117_v53, %v886_v55  ;;  %v1119_v6 = vsel %vm1103_vm9, %v1086_v0, %v856_v36  ;;  %v923_v16 = vsel %vm905_vm3, %v4641_v2, %v666_v54 }
 0x10c   : > { %807 = vrot.lane.b32.xlu1 %v631_v49, %s4380_s15  ;;  %805 = vrot.lane.b32.xlu0 %v614_v9, %s4380_s15  ;;  %v643_v9 = vsel %vm341_vm1, %v638_v59, %v642_v63  ;;  %v1884_v29 = vsel %vm566_vm0, %v1882_v27, %v1883_v61  ;;  %s4395_s15 = smov 80  }
 0x10d   : > { %4133 = vmatprep.mubr.msk.bf16.mxu0 %vm1196_vm11, %v1150_v60 }
 0x10e   : > { %v668_v7 = vpop.permute.xlu1 %667  ;;  %v888_v10 = vpop.permute.xlu0 %887 }
 0x10f   : > { %v1152_v11 = vsel %vm1136_vm10, %v1119_v6, %v888_v10  ;;  %v925_v34 = vsel %vm905_vm3, %v4655_v18, %v668_v7 }
 0x110   : > { %839 = vrot.lane.b32.xlu1 %v4939_v24, %s4384_s19  ;;  %837 = vrot.lane.b32.xlu0 %v4922_v4, %s4384_s19  ;;  %v1664_v4 = vor.u32 %v1663_v19, %v1659_v15 }
 0x111   : > { %4134 = vmatmul.mubr.msk.bf16.gmra.mxu0 %vm1196_vm11, %v1152_v11 }
 0x112   : > { %v700_v21 = vpop.permute.xlu1 %699  ;;  %v698_v3 = vpop.permute.xlu0 %697  ;;  %v1669_v24 = vsel %vm341_vm1, %v1664_v4, %v1668_v23 }
 0x113   : > { %v956_v35 = vsel %vm938_vm4, %v923_v16, %v698_v3  ;;  %v958_v43 = vsel %vm938_vm4, %v925_v34, %v700_v21 }
 0x114   : > { %871 = vrot.lane.b32.xlu1 %v643_v9, %s4385_s20  ;;  %869 = vrot.lane.b32.xlu0 %v626_v32, %s4385_s20  ;;  %s4389_s20 = smov 40  }
 0x116   : > { %v732_v25 = vpop.permute.xlu1 %731  ;;  %v730_v26 = vpop.permute.xlu0 %729 }
 0x117   : > { %v989_v36 = vsel %vm971_vm5, %v956_v35, %v730_v26  ;;  %v991_v45 = vsel %vm971_vm5, %v958_v43, %v732_v25 }
 0x118   : > { %903 = vrot.lane.b32.xlu1 %v648_v22, %s4386_s10  ;;  %901 = vrot.lane.b32.xlu0 %v631_v49, %s4386_s10 }
 0x11a   : > { %v764_v28 = vpop.permute.xlu1 %763  ;;  %v762_v40 = vpop.permute.xlu0 %761 }
 0x11b   : > { %v1022_v39 = vsel %vm1004_vm6, %v989_v36, %v762_v40  ;;  %v1024_v18 = vsel %vm1004_vm6, %v991_v45, %v764_v28 }
 0x11c   : > { %1964 = vrot.lane.b32.xlu0 %v1669_v24, %s4381_s16 }
 0x11e   : > { %v796_v30 = vpop.permute.xlu1 %795  ;;  %v794_v31 = vpop.permute.xlu0 %793 }
 0x11f   : > { %v1055_v41 = vsel %vm1037_vm7, %v1022_v39, %v794_v31  ;;  %v1057_v49 = vsel %vm1037_vm7, %v1024_v18, %v796_v30 }
 0x120   : > { %1996 = vrot.lane.b32.xlu0 %v1884_v29, %s4383_s18 }
 0x122   : > { %v828_v32 = vpop.permute.xlu1 %827  ;;  %v826_v33 = vpop.permute.xlu0 %825 }
 0x123   : > { %v1088_v44 = vsel %vm1070_vm8, %v1055_v41, %v826_v33  ;;  %v1090_v52 = vsel %vm1070_vm8, %v1057_v49, %v828_v32 }
 0x126   : > { %v860_v37 = vpop.permute.xlu1 %859  ;;  %v858_v38 = vpop.permute.xlu0 %857 }
 0x127   : > { %v1121_v2 = vsel %vm1103_vm9, %v1088_v44, %v858_v38  ;;  %v1123_v53 = vsel %vm1103_vm9, %v1090_v52, %v860_v37 }
 0x12a   : > { %v670_v46 = vpop.permute.xlu1 %669  ;;  %v890_v47 = vpop.permute.xlu0 %889 }
 0x12b   : > { %v1154_v48 = vsel %vm1136_vm10, %v1121_v2, %v890_v47  ;;  %v927_v10 = vsel %vm905_vm3, %v4681_v42, %v670_v46 }
 0x12c   : > { %4137 = vmatprep.mubr.msk.bf16.mxu0 %vm1196_vm11, %v1154_v48 }
 0x12e   : > { %v672_v54 = vpop.permute.xlu1 %671  ;;  %v892_v55 = vpop.permute.xlu0 %891 }
 0x12f   : > { %v1156_v56 = vsel %vm1136_vm10, %v1123_v53, %v892_v55  ;;  %v929_v9 = vsel %vm905_vm3, %v4700_v1, %v672_v54 }
 0x130   : > { %4138 = vmatmul.mubr.msk.bf16.gmra.mxu0 %vm1196_vm11, %v1156_v56 }
 0x132   : > { %v704_v58 = vpop.permute.xlu1 %703  ;;  %v702_v60 = vpop.permute.xlu0 %701 }
 0x133   : > { %v960_v11 = vsel %vm938_vm4, %v927_v10, %v702_v60  ;;  %v962_v21 = vsel %vm938_vm4, %v929_v9, %v704_v58 }
 0x136   : > { %v736_v62 = vpop.permute.xlu1 %735  ;;  %v734_v59 = vpop.permute.xlu0 %733 }
 0x137   : > { %v993_v13 = vsel %vm971_vm5, %v960_v11, %v734_v59  ;;  %v995_v22 = vsel %vm971_vm5, %v962_v21, %v736_v62  ;;  %v5058_v59 = vld [vmem:[%s6534_s2] ss:$0 sm:$0xff] }
 0x13a   : > { %v768_v63 = vpop.permute.xlu1 %767  ;;  %v766_v0 = vpop.permute.xlu0 %765 }
 0x13b   : > { %v1026_v19 = vsel %vm1004_vm6, %v993_v13, %v766_v0  ;;  %v1028_v1 = vsel %vm1004_vm6, %v995_v22, %v768_v63 }
 0x13e   : > { %v800_v12 = vpop.permute.xlu1 %799  ;;  %v798_v5 = vpop.permute.xlu0 %797 }
 0x13f   : > { %v1059_v20 = vsel %vm1037_vm7, %v1026_v19, %v798_v5  ;;  %v1061_v26 = vsel %vm1037_vm7, %v1028_v1, %v800_v12 }
 0x142   : > { %v832_v6 = vpop.permute.xlu1 %831  ;;  %v830_v7 = vpop.permute.xlu0 %829 }
 0x143   : > { %v1092_v3 = vsel %vm1070_vm8, %v1059_v20, %v830_v7  ;;  %v1094_v24 = vsel %vm1070_vm8, %v1061_v26, %v832_v6 }
 0x146   : > { %v864_v14 = vpop.permute.xlu1 %863  ;;  %v862_v15 = vpop.permute.xlu0 %861 }
 0x147   : > { %v1125_v42 = vsel %vm1103_vm9, %v1092_v3, %v862_v15  ;;  %v1127_v27 = vsel %vm1103_vm9, %v1094_v24, %v864_v14 }
 0x14a   : > { %v674_v4 = vpop.permute.xlu1 %673  ;;  %v894_v23 = vpop.permute.xlu0 %893 }
 0x14b   : > { %v1158_v25 = vsel %vm1136_vm10, %v1125_v42, %v894_v23  ;;  %v931_v38 = vsel %vm905_vm3, %v4741_v50, %v674_v4 }
 0x14c   : > { %4141 = vmatprep.mubr.msk.bf16.mxu0 %vm1196_vm11, %v1158_v25 }
 0x14e   : > { %v676_v61 = vpop.permute.xlu1 %675  ;;  %v896_v28 = vpop.permute.xlu0 %895 }
 0x14f   : > { %v1160_v40 = vsel %vm1136_vm10, %v1127_v27, %v896_v28  ;;  %v933_v41 = vsel %vm905_vm3, %v4755_v8, %v676_v61 }
 0x150   : > { %4142 = vmatmul.mubr.msk.bf16.gmra.mxu0 %vm1196_vm11, %v1160_v40 }
 0x152   : > { %v708_v29 = vpop.permute.xlu1 %707  ;;  %v706_v30 = vpop.permute.xlu0 %705 }
 0x153   : > { %v964_v39 = vsel %vm938_vm4, %v931_v38, %v706_v30  ;;  %v966_v47 = vsel %vm938_vm4, %v933_v41, %v708_v29 }
 0x156   : > { %v740_v31 = vpop.permute.xlu1 %739  ;;  %v738_v32 = vpop.permute.xlu0 %737 }
 0x157   : > { %v997_v43 = vsel %vm971_vm5, %v964_v39, %v738_v32  ;;  %v999_v48 = vsel %vm971_vm5, %v966_v47, %v740_v31 }
 0x15a   : > { %v772_v33 = vpop.permute.xlu1 %771  ;;  %v770_v16 = vpop.permute.xlu0 %769 }
 0x15b   : > { %v1030_v2 = vsel %vm1004_vm6, %v997_v43, %v770_v16  ;;  %v1032_v8 = vsel %vm1004_vm6, %v999_v48, %v772_v33 }
 0x15e   : > { %v804_v35 = vpop.permute.xlu1 %803  ;;  %v802_v34 = vpop.permute.xlu0 %801 }
 0x15f   : > { %v1063_v46 = vsel %vm1037_vm7, %v1030_v2, %v802_v34  ;;  %v1065_v54 = vsel %vm1037_vm7, %v1032_v8, %v804_v35 }
 0x162   : > { %v836_v36 = vpop.permute.xlu1 %835  ;;  %v834_v37 = vpop.permute.xlu0 %833 }
 0x163   : > { %v1096_v18 = vsel %vm1070_vm8, %v1063_v46, %v834_v37  ;;  %v1098_v55 = vsel %vm1070_vm8, %v1065_v54, %v836_v36 }
 0x166   : > { %v868_v44 = vpop.permute.xlu1 %867  ;;  %v866_v45 = vpop.permute.xlu0 %865 }
 0x167   : > { %v1129_v50 = vsel %vm1103_vm9, %v1096_v18, %v866_v45  ;;  %v1131_v56 = vsel %vm1103_vm9, %v1098_v55, %v868_v44 }
 0x16a   : > { %v678_v49 = vpop.permute.xlu1 %677  ;;  %v898_v52 = vpop.permute.xlu0 %897 }
 0x16b   : > { %v1162_v53 = vsel %vm1136_vm10, %v1129_v50, %v898_v52  ;;  %v935_v31 = vsel %vm905_vm3, %v4801_v57, %v678_v49 }
 0x16c   : > { %4145 = vmatprep.mubr.msk.bf16.mxu0 %vm1196_vm11, %v1162_v53 }
 0x16e   : > { %v680_v58 = vpop.permute.xlu1 %679  ;;  %v900_v60 = vpop.permute.xlu0 %899 }
 0x16f   : > { %v1164_v62 = vsel %vm1136_vm10, %v1131_v56, %v900_v60  ;;  %v937_v27 = vsel %vm905_vm3, %v4815_v17, %v680_v58 }
 0x170   : > { %4146 = vmatmul.mubr.msk.bf16.gmra.mxu0 %vm1196_vm11, %v1164_v62 }
 0x171   : > { %v4123_v63 = vpop.f32.mrf.mxu0 }
 0x172   : > { %v1276_v0 = vadd.f32 %v4123_v63, %v5058_v59  ;;  %v712_v12 = vpop.permute.xlu1 %711  ;;  %v710_v5 = vpop.permute.xlu0 %709 }
 0x173   : > { %v1267_v6 = vpop.f32.mrf.mxu0  ;;  %v970_v32 = vsel %vm938_vm4, %v937_v27, %v712_v12  ;;  %v968_v35 = vsel %vm938_vm4, %v935_v31, %v710_v5 }
 0x174   : > { %vm1396_vm14 = vcmp.gt.f32.partialorder %v1276_v0, 0.0  ;;  %v1428_v7 = vmul.f32 0.2, %v1276_v0  ;;  %v1268_v10 = vadd.f32 %v5058_v59, %v1267_v6 }
 0x175   : > { %v4124_v11 = vpop.f32.mrf.mxu0 }
 0x176   : > { %v1460_v9 = vsel %vm1396_vm14, %v1276_v0, %v1428_v7  ;;  %vm1394_vm15 = vcmp.gt.f32.partialorder %v1268_v10, 0.0  ;;  %v1426_v13 = vmul.f32 0.2, %v1268_v10  ;;  %v1279_v14 = vadd.f32 %v4124_v11, %v5058_v59  ;;  %v744_v15 = vpop.permute.xlu1 %743  ;;  %v742_v19 = vpop.permute.xlu0 %741 }
 0x177   : > { %1538 = vst.msk [vmem:[#allocation2 + $0x31] sm:$0xff] %vm938_vm4, %v1460_v9  ;;  %v1270_v20 = vpop.f32.mrf.mxu0  ;;  %v1003_v34 = vsel %vm971_vm5, %v970_v32, %v744_v15  ;;  %v1001_v43 = vsel %vm971_vm5, %v968_v35, %v742_v19 }
 0x178   : > { %v1458_v21 = vsel %vm1394_vm15, %v1268_v10, %v1426_v13  ;;  %vm1397_vm2 = vcmp.gt.f32.partialorder %v1279_v14, 0.0  ;;  %v1429_v3 = vmul.f32 0.2, %v1279_v14  ;;  %v1271_v22 = vadd.f32 %v5058_v59, %v1270_v20 }
 0x179   : > { %1536 = vst.msk [vmem:[#allocation2 + $0x19] sm:$0xff] %vm938_vm4, %v1458_v21 }
 0x17a   : > { %v1461_v42 = vsel %vm1397_vm2, %v1279_v14, %v1429_v3  ;;  %vm1395_vm12 = vcmp.gt.f32.partialorder %v1271_v22, 0.0  ;;  %v1427_v4 = vmul.f32 0.2, %v1271_v22  ;;  %v776_v23 = vpop.permute.xlu1 %775  ;;  %v774_v1 = vpop.permute.xlu0 %773 }
 0x17b   : > { %1539 = vst.msk [vmem:[#allocation2 + $0x39] sm:$0xff] %vm938_vm4, %v1461_v42  ;;  %v1036_v44 = vsel %vm1004_vm6, %v1003_v34, %v776_v23  ;;  %v1034_v47 = vsel %vm1004_vm6, %v1001_v43, %v774_v1 }
 0x17c   : > { %v1459_v25 = vsel %vm1395_vm12, %v1271_v22, %v1427_v4 }
 0x17d   : > { %1537 = vst.msk [vmem:[#allocation2 + $0x21] sm:$0xff] %vm938_vm4, %v1459_v25 }
 0x17e   : > { %v808_v26 = vpop.permute.xlu1 %807  ;;  %v806_v24 = vpop.permute.xlu0 %805  ;;  %v1574_v40 = vld [vmem:[#allocation2 + $0x30] sm:$0xff] }
 0x17f   : > { %v1069_v18 = vsel %vm1037_vm7, %v1036_v44, %v808_v26  ;;  %v1067_v50 = vsel %vm1037_vm7, %v1034_v47, %v806_v24  ;;  %v4264_v44 = vld [vmem:[%s6535_s3 + $0x18] sm:$0xff]  }
 0x180   : > { %v1571_v36 = vld [vmem:[#allocation2 + $0x18] sm:$0xff] }
 0x182   : > { %v840_v61 = vpop.permute.xlu1 %839  ;;  %v838_v28 = vpop.permute.xlu0 %837  ;;  %v1575_v29 = vld [vmem:[#allocation2 + $0x38] sm:$0xff]  ;;  %v1576_v30 = vld [vmem:[#allocation2 + $0x40] sm:$0x3] }
 0x183   : > { %v5074_v33 = vpack.c.bf16 %v1575_v29, %v1574_v40  ;;  %v1627_v16 = vpack.c.bf16 %v1576_v30, %v1576_v30  ;;  %v1102_v53 = vsel %vm1070_vm8, %v1069_v18, %v840_v61  ;;  %v1100_v54 = vsel %vm1070_vm8, %v1067_v50, %v838_v28 }
 0x184   : > { %v1572_v37 = vld [vmem:[#allocation2 + $0x20] sm:$0xff]  ;;  %v1573_v17 = vld [vmem:[#allocation2 + $0x28] sm:$0x3] }
 0x185   : > { %2030 = vrot.lane.b32.xlu1 %v5074_v33, %s4384_s19  ;;  %2124 = vrot.lane.b32.xlu0 %v5074_v33, %s4388_s17  ;;  %v1888_v57 = vrot.slane %v5074_v33, 1  ;;  %v1889_v38 = vrot.slane %v1627_v16, 1  ;;  %v5083_v39 = vpack.c.bf16 %v1572_v37, %v1571_v36  ;;  %v5085_v41 = vpack.c.bf16 %v1573_v17, %v1573_v17  ;;  %v4263_v17 = vld [vmem:[%s6535_s3 + $0x20] ss:$0 sps:$4 sm:$0xff]  }
 0x186   : > { %v872_v45 = vpop.permute.xlu1 %871  ;;  %v870_v2 = vpop.permute.xlu0 %869  ;;  %v1685_v46 = vshll.u32 %v5074_v33, 16  ;;  %v1683_v62 = vshrl.u32 %v5074_v33, 16  ;;  %v1690_v63 = vshll.u32 %v1627_v16, 16  ;;  %4196 = vmatprep.subr.msk.bf16.mxu1 %vm2556_vm13, %v4263_v17  ;;  %v2558_v43 = vsel %vm2556_vm13, %v4263_v17, 0 }
 0x187   : > { %v1890_v48 = vsel %vm566_vm0, %v1888_v57, %v1889_v38  ;;  %v1885_v49 = vrot.slane %v5083_v39, 1  ;;  %v1886_v52 = vrot.slane %v5085_v41, 1  ;;  %v1135_v55 = vsel %vm1103_vm9, %v1102_v53, %v872_v45  ;;  %4154 = vmatpush3.bf16.msra.mxu1 %v2558_v43 }
 0x188   : > { %v1687_v8 = vrot.slane %v1685_v46, 1  ;;  %v1133_v56 = vsel %vm1103_vm9, %v1100_v54, %v870_v2  ;;  %v1692_v7 = vrot.slane %v1690_v63, 1  ;;  %v1673_v24 = vshll.u32 %v5083_v39, 16  ;;  %4155 = vmatprep.subr.bf16.mxu1 %v4264_v44  ;;  %v4265_v54 = vld [vmem:[%s6535_s3 + $0x10] sm:$0xff]  }
 0x189   : > { %2094 = vrot.lane.b32.xlu1 %v1890_v48, %s4389_s20  ;;  %2028 = vrot.lane.b32.xlu0 %v5083_v39, %s4384_s19  ;;  %v1887_v5 = vsel %vm566_vm0, %v1885_v49, %v1886_v52  ;;  %v1671_v40 = vshrl.u32 %v5083_v39, 16  ;;  %v1678_v29 = vshll.u32 %v5085_v41, 16 }
 0x18a   : > { %v904_v58 = vpop.permute.xlu1 %903  ;;  %v902_v60 = vpop.permute.xlu0 %901  ;;  %v1688_v6 = vor.u32 %v1687_v8, %v1683_v62  ;;  %v1675_v27 = vrot.slane %v1673_v24, 1 }
 0x18b   : > { %v1168_v0 = vsel %vm1136_vm10, %v1135_v55, %v904_v58  ;;  %v1166_v12 = vsel %vm1136_vm10, %v1133_v56, %v902_v60  ;;  %v1680_v16 = vrot.slane %v1678_v29, 1  ;;  %4156 = vmatpush3.bf16.msra.mxu1 %v4264_v44 }
 0x18c   : > { %4149 = vmatprep.mubr.msk.bf16.mxu0 %vm1196_vm11, %v1166_v12  ;;  %v1693_v10 = vsel %vm341_vm1, %v1688_v6, %v1692_v7  ;;  %v1676_v31 = vor.u32 %v1675_v27, %v1671_v40  ;;  %4157 = vmatprep.subr.bf16.mxu1 %v4265_v54  ;;  %v4266_v7 = vld [vmem:[%s6535_s3 + $0x8] sm:$0xff]  }
 0x18d   : > { %1998 = vrot.lane.b32.xlu1 %v1887_v5, %s4383_s18  ;;  %2188 = vrot.lane.b32.xlu0 %v1890_v48, %s4390_s26 }
 0x18e   : > { %4150 = vmatmul.mubr.msk.bf16.gmra.mxu0 %vm1196_vm11, %v1168_v0  ;;  %v1681_v35 = vsel %vm341_vm1, %v1676_v31, %v1680_v16 }
 0x18f   : > { %4158 = vmatpush3.bf16.msra.mxu1 %v4265_v54 }
 0x190   : > { %4159 = vmatprep.subr.bf16.mxu1 %v4266_v7 }
 0x191   : > { %2062 = vrot.lane.b32.xlu1 %v1693_v10, %s4386_s10  ;;  %v4127_v11 = vpop.f32.mrf.mxu0  ;;  %2000 = vrot.lane.b32.xlu0 %v1890_v48, %s4383_s18 }
 0x192   : > { %v1292_v9 = vadd.f32 %v4127_v11, %v5058_v59 }
 0x193   : > { %v1283_v13 = vpop.f32.mrf.mxu0  ;;  %4160 = vmatpush3.bf16.msra.mxu1 %v4266_v7 }
 0x194   : > { %vm1400_vm5 = vcmp.gt.f32.partialorder %v1292_v9, 0.0  ;;  %v1432_v14 = vmul.f32 0.2, %v1292_v9  ;;  %v1284_v15 = vadd.f32 %v5058_v59, %v1283_v13 }
 0x195   : > { %1968 = vrot.lane.b32.xlu1 %v1693_v10, %s4381_s16  ;;  %v4128_v19 = vpop.f32.mrf.mxu0  ;;  %2092 = vrot.lane.b32.xlu0 %v1887_v5, %s4389_s20 }
 0x196   : > { %v1464_v20 = vsel %vm1400_vm5, %v1292_v9, %v1432_v14  ;;  %vm1398_vm7 = vcmp.gt.f32.partialorder %v1284_v15, 0.0  ;;  %v1430_v21 = vmul.f32 0.2, %v1284_v15  ;;  %v1295_v3 = vadd.f32 %v4128_v19, %v5058_v59 }
 0x197   : > { %1542 = vst.msk [vmem:[#allocation2 + $0x61] sm:$0xff] %vm938_vm4, %v1464_v20  ;;  %v1286_v22 = vpop.f32.mrf.mxu0  ;;  %v4267_v20 = vld [vmem:[%s6535_s3] sm:$0xff]  }
 0x198   : > { %v1462_v42 = vsel %vm1398_vm7, %v1284_v15, %v1430_v21  ;;  %vm1401_vm9 = vcmp.gt.f32.partialorder %v1295_v3, 0.0  ;;  %v1433_v4 = vmul.f32 0.2, %v1295_v3  ;;  %v1287_v23 = vadd.f32 %v5058_v59, %v1286_v22  ;;  %4161 = vmatprep.subr.bf16.mxu1 %v4267_v20 }
 0x199   : > { %1540 = vst.msk [vmem:[#allocation2 + $0x49] sm:$0xff] %vm938_vm4, %v1462_v42  ;;  %2156 = vrot.lane.b32.xlu0 %v1693_v10, %s4391_s28  ;;  %4162 = vmatpush3.bf16.msra.mxu1 %v4267_v20 }
 0x19a   : > { %v1465_v1 = vsel %vm1401_vm9, %v1295_v3, %v1433_v4  ;;  %vm1399_vm11 = vcmp.gt.f32.partialorder %v1287_v23, 0.0  ;;  %v1431_v25 = vmul.f32 0.2, %v1287_v23 }
 0x19b   : > { %1543 = vst.msk [vmem:[#allocation2 + $0x69] sm:$0xff] %vm938_vm4, %v1465_v1 }
 0x19c   : > { %v1463_v26 = vsel %vm1399_vm11, %v1287_v23, %v1431_v25 }
 0x19d   : > { %1541 = vst.msk [vmem:[#allocation2 + $0x51] sm:$0xff] %vm938_vm4, %v1463_v26 }
 0x19e   : > { %v1580_v61 = vld [vmem:[#allocation2 + $0x60] sm:$0xff] }
 0x1a0   : > { %v1577_v57 = vld [vmem:[#allocation2 + $0x48] sm:$0xff] }
 0x1a2   : > { %v1581_v28 = vld [vmem:[#allocation2 + $0x68] sm:$0xff]  ;;  %v1582_v32 = vld [vmem:[#allocation2 + $0x70] sm:$0x3] }
 0x1a3   : > { %v5128_v30 = vpack.c.bf16 %v1581_v28, %v1580_v61  ;;  %v1631_v36 = vpack.c.bf16 %v1582_v32, %v1582_v32 }
 0x1a4   : > { %v1578_v34 = vld [vmem:[#allocation2 + $0x50] sm:$0xff]  ;;  %v1579_v37 = vld [vmem:[#allocation2 + $0x58] sm:$0x3] }
 0x1a5   : > { %2034 = vrot.lane.b32.xlu1 %v5128_v30, %s4384_s19  ;;  %2128 = vrot.lane.b32.xlu0 %v5128_v30, %s4388_s17  ;;  %v5140_v38 = vpack.c.bf16 %v1578_v34, %v1577_v57  ;;  %v1709_v41 = vshll.u32 %v5128_v30, 16  ;;  %v1894_v45 = vrot.slane %v5128_v30, 1  ;;  %v1895_v2 = vrot.slane %v1631_v36, 1 }
 0x1a6   : > { %v5147_v46 = vpack.c.bf16 %v1579_v37, %v1579_v37  ;;  %v1707_v52 = vshrl.u32 %v5128_v30, 16  ;;  %v1714_v8 = vshll.u32 %v1631_v36, 16 }
 0x1a7   : > { %v1711_v47 = vrot.slane %v1709_v41, 1  ;;  %v1896_v18 = vsel %vm566_vm0, %v1894_v45, %v1895_v2  ;;  %v1891_v48 = vrot.slane %v5140_v38, 1  ;;  %v1697_v3 = vshll.u32 %v5140_v38, 16 }
 0x1a8   : > { %v1892_v50 = vrot.slane %v5147_v46, 1  ;;  %v1716_v0 = vrot.slane %v1714_v8, 1  ;;  %v1695_v23 = vshrl.u32 %v5140_v38, 16  ;;  %v1702_v1 = vshll.u32 %v5147_v46, 16 }
 0x1a9   : > { %1966 = vrot.lane.b32.xlu1 %v1681_v35, %s4381_s16  ;;  %2060 = vrot.lane.b32.xlu0 %v1681_v35, %s4386_s10  ;;  %v1712_v56 = vor.u32 %v1711_v47, %v1707_v52  ;;  %v1699_v22 = vrot.slane %v1697_v3, 1 }
 0x1aa   : > { %v1893_v62 = vsel %vm566_vm0, %v1891_v48, %v1892_v50  ;;  %v1704_v27 = vrot.slane %v1702_v1, 1 }
 0x1ab   : > { %v1717_v11 = vsel %vm341_vm1, %v1712_v56, %v1716_v0  ;;  %v1700_v26 = vor.u32 %v1699_v22, %v1695_v23 }
 0x1ad   : > { %2126 = vrot.lane.b32.xlu1 %v5140_v38, %s4388_s17  ;;  %2032 = vrot.lane.b32.xlu0 %v5140_v38, %s4384_s19  ;;  %v1705_v61 = vsel %vm341_vm1, %v1700_v26, %v1704_v27 }
 0x1b1   : > { %2098 = vrot.lane.b32.xlu1 %v1896_v18, %s4389_s20  ;;  %v4131_v49 = vpop.f32.mrf.mxu0  ;;  %2192 = vrot.lane.b32.xlu0 %v1896_v18, %s4390_s26 }
 0x1b2   : > { %v1308_v53 = vadd.f32 %v4131_v49, %v5058_v59 }
 0x1b3   : > { %v1299_v55 = vpop.f32.mrf.mxu0 }
 0x1b4   : > { %vm1404_vm14 = vcmp.gt.f32.partialorder %v1308_v53, 0.0  ;;  %v1436_v58 = vmul.f32 0.2, %v1308_v53  ;;  %v1300_v60 = vadd.f32 %v5058_v59, %v1299_v55 }
 0x1b5   : > { %2002 = vrot.lane.b32.xlu1 %v1893_v62, %s4383_s18  ;;  %v4132_v63 = vpop.f32.mrf.mxu0  ;;  %2004 = vrot.lane.b32.xlu0 %v1896_v18, %s4383_s18 }
 0x1b6   : > { %v1468_v12 = vsel %vm1404_vm14, %v1308_v53, %v1436_v58  ;;  %vm1402_vm15 = vcmp.gt.f32.partialorder %v1300_v60, 0.0  ;;  %v1434_v5 = vmul.f32 0.2, %v1300_v60  ;;  %v1311_v6 = vadd.f32 %v4132_v63, %v5058_v59 }
 0x1b7   : > { %1546 = vst.msk [vmem:[#allocation2 + $0x91] sm:$0xff] %vm938_vm4, %v1468_v12  ;;  %v1302_v10 = vpop.f32.mrf.mxu0 }
 0x1b8   : > { %v1466_v9 = vsel %vm1402_vm15, %v1300_v60, %v1434_v5  ;;  %vm1405_vm2 = vcmp.gt.f32.partialorder %v1311_v6, 0.0  ;;  %v1437_v13 = vmul.f32 0.2, %v1311_v6  ;;  %v1303_v14 = vadd.f32 %v5058_v59, %v1302_v10 }
 0x1b9   : > { %1544 = vst.msk [vmem:[#allocation2 + $0x79] sm:$0xff] %vm938_vm4, %v1466_v9  ;;  %2066 = vrot.lane.b32.xlu1 %v1717_v11, %s4386_s10  ;;  %2190 = vrot.lane.b32.xlu0 %v1893_v62, %s4390_s26 }
 0x1ba   : > { %v1469_v15 = vsel %vm1405_vm2, %v1311_v6, %v1437_v13  ;;  %vm1403_vm12 = vcmp.gt.f32.partialorder %v1303_v14, 0.0  ;;  %v1435_v19 = vmul.f32 0.2, %v1303_v14 }
 0x1bb   : > { %1547 = vst.msk [vmem:[#allocation2 + $0x99] sm:$0xff] %vm938_vm4, %v1469_v15 }
 0x1bc   : > { %v1467_v21 = vsel %vm1403_vm12, %v1303_v14, %v1435_v19 }
 0x1bd   : > { %1545 = vst.msk [vmem:[#allocation2 + $0x81] sm:$0xff] %vm938_vm4, %v1467_v21  ;;  %1972 = vrot.lane.b32.xlu1 %v1717_v11, %s4381_s16  ;;  %2096 = vrot.lane.b32.xlu0 %v1893_v62, %s4389_s20 }
 0x1be   : > { %v1586_v42 = vld [vmem:[#allocation2 + $0x90] sm:$0xff] }
 0x1c0   : > { %v1583_v29 = vld [vmem:[#allocation2 + $0x78] sm:$0xff] }
 0x1c1   : > { %2160 = vrot.lane.b32.xlu0 %v1717_v11, %s4391_s28 }
 0x1c2   : > { %v1587_v4 = vld [vmem:[#allocation2 + $0x98] sm:$0xff]  ;;  %v1588_v24 = vld [vmem:[#allocation2 + $0xa0] sm:$0x3] }
 0x1c3   : > { %v5188_v25 = vpack.c.bf16 %v1587_v4, %v1586_v42  ;;  %v1635_v40 = vpack.c.bf16 %v1588_v24, %v1588_v24  ;;  %v5241_v4 = vpop.permute.xlu0 %1964 }
 0x1c4   : > { %v1584_v28 = vld [vmem:[#allocation2 + $0x80] sm:$0xff]  ;;  %v1585_v35 = vld [vmem:[#allocation2 + $0x88] sm:$0x3] }
 0x1c5   : > { %2038 = vrot.lane.b32.xlu1 %v5188_v25, %s4384_s19  ;;  %2132 = vrot.lane.b32.xlu0 %v5188_v25, %s4388_s17  ;;  %v5197_v31 = vpack.c.bf16 %v1584_v28, %v1583_v29  ;;  %v1900_v32 = vrot.slane %v5188_v25, 1  ;;  %v1901_v16 = vrot.slane %v1635_v40, 1  ;;  %v1633_v34 = vpack.c.bf16 %v1585_v35, %v1585_v35 }
 0x1c6   : > { %v1733_v36 = vshll.u32 %v5188_v25, 16  ;;  %v1731_v18 = vshrl.u32 %v5188_v25, 16  ;;  %v1738_v48 = vshll.u32 %v1635_v40, 16 }
 0x1c7   : > { %v1902_v37 = vsel %vm566_vm0, %v1900_v32, %v1901_v16  ;;  %v1897_v43 = vrot.slane %v5197_v31, 1  ;;  %v1898_v44 = vrot.slane %v1633_v34, 1  ;;  %v1721_v5 = vshll.u32 %v5197_v31, 16  ;;  %v5253_v29 = vpop.permute.xlu0 %1996 }
 0x1c8   : > { %v1735_v45 = vrot.slane %v1733_v36, 1  ;;  %v1740_v63 = vrot.slane %v1738_v48, 1  ;;  %v1719_v11 = vshrl.u32 %v5197_v31, 16  ;;  %v1726_v9 = vshll.u32 %v1633_v34, 16 }
 0x1c9   : > { %2158 = vrot.lane.b32.xlu1 %v1705_v61, %s4391_s28  ;;  %2064 = vrot.lane.b32.xlu0 %v1705_v61, %s4386_s10  ;;  %v1899_v53 = vsel %vm566_vm0, %v1897_v43, %v1898_v44  ;;  %v1723_v6 = vrot.slane %v1721_v5, 1 }
 0x1ca   : > { %v1736_v54 = vor.u32 %v1735_v45, %v1731_v18  ;;  %v1728_v19 = vrot.slane %v1726_v9, 1 }
 0x1cb   : > { %v1724_v14 = vor.u32 %v1723_v6, %v1719_v11 }
 0x1cc   : > { %v1741_v12 = vsel %vm341_vm1, %v1736_v54, %v1740_v63 }
 0x1cd   : > { %1970 = vrot.lane.b32.xlu1 %v1705_v61, %s4381_s16  ;;  %2036 = vrot.lane.b32.xlu0 %v5197_v31, %s4384_s19  ;;  %v1729_v20 = vsel %vm341_vm1, %v1724_v14, %v1728_v19 }
 0x1d1   : > { %2130 = vrot.lane.b32.xlu1 %v5197_v31, %s4388_s17  ;;  %v4135_v17 = vpop.f32.mrf.mxu0  ;;  %2196 = vrot.lane.b32.xlu0 %v1902_v37, %s4390_s26 }
 0x1d2   : > { %v1324_v57 = vadd.f32 %v4135_v17, %v5058_v59 }
 0x1d3   : > { %v1315_v41 = vpop.f32.mrf.mxu0 }
 0x1d4   : > { %vm1408_vm5 = vcmp.gt.f32.partialorder %v1324_v57, 0.0  ;;  %v1440_v2 = vmul.f32 0.2, %v1324_v57  ;;  %v1316_v46 = vadd.f32 %v5058_v59, %v1315_v41 }
 0x1d5   : > { %2102 = vrot.lane.b32.xlu1 %v1902_v37, %s4389_s20  ;;  %v4136_v47 = vpop.f32.mrf.mxu0  ;;  %2008 = vrot.lane.b32.xlu0 %v1902_v37, %s4383_s18 }
 0x1d6   : > { %v1472_v50 = vsel %vm1408_vm5, %v1324_v57, %v1440_v2  ;;  %vm1406_vm7 = vcmp.gt.f32.partialorder %v1316_v46, 0.0  ;;  %v1438_v49 = vmul.f32 0.2, %v1316_v46  ;;  %v1327_v52 = vadd.f32 %v4136_v47, %v5058_v59 }
 0x1d7   : > { %1550 = vst.msk [vmem:[#allocation2 + $0xc1] sm:$0xff] %vm938_vm4, %v1472_v50  ;;  %v1318_v8 = vpop.f32.mrf.mxu0 }
 0x1d8   : > { %v1470_v55 = vsel %vm1406_vm7, %v1316_v46, %v1438_v49  ;;  %vm1409_vm9 = vcmp.gt.f32.partialorder %v1327_v52, 0.0  ;;  %v1441_v56 = vmul.f32 0.2, %v1327_v52  ;;  %v1319_v58 = vadd.f32 %v5058_v59, %v1318_v8 }
 0x1d9   : > { %1548 = vst.msk [vmem:[#allocation2 + $0xa9] sm:$0xff] %vm938_vm4, %v1470_v55  ;;  %2006 = vrot.lane.b32.xlu1 %v1899_v53, %s4383_s18  ;;  %2194 = vrot.lane.b32.xlu0 %v1899_v53, %s4390_s26 }
 0x1da   : > { %v1473_v60 = vsel %vm1409_vm9, %v1327_v52, %v1441_v56  ;;  %vm1407_vm11 = vcmp.gt.f32.partialorder %v1319_v58, 0.0  ;;  %v1439_v62 = vmul.f32 0.2, %v1319_v58 }
 0x1db   : > { %1551 = vst.msk [vmem:[#allocation2 + $0xc9] sm:$0xff] %vm938_vm4, %v1473_v60 }
 0x1dc   : > { %v1471_v0 = vsel %vm1407_vm11, %v1319_v58, %v1439_v62  ;;  %vm2348_vm11 = vcmask 326656  }
 0x1dd   : > { %1549 = vst.msk [vmem:[#allocation2 + $0xb1] sm:$0xff] %vm938_vm4, %v1471_v0  ;;  %2070 = vrot.lane.b32.xlu1 %v1741_v12, %s4386_s10  ;;  %2100 = vrot.lane.b32.xlu0 %v1899_v53, %s4389_s20 }
 0x1de   : > { %v1592_v7 = vld [vmem:[#allocation2 + $0xc0] sm:$0xff] }
 0x1e0   : > { %v1589_v22 = vld [vmem:[#allocation2 + $0xa8] sm:$0xff] }
 0x1e1   : > { %1976 = vrot.lane.b32.xlu1 %v1741_v12, %s4381_s16  ;;  %2164 = vrot.lane.b32.xlu0 %v1741_v12, %s4391_s28 }
 0x1e2   : > { %v1593_v10 = vld [vmem:[#allocation2 + $0xc8] sm:$0xff]  ;;  %v1594_v15 = vld [vmem:[#allocation2 + $0xd0] sm:$0x3] }
 0x1e3   : > { %v5230_v13 = vpack.c.bf16 %v1593_v10, %v1592_v7  ;;  %v1639_v3 = vpack.c.bf16 %v1594_v15, %v1594_v15 }
 0x1e4   : > { %v1590_v21 = vld [vmem:[#allocation2 + $0xb0] sm:$0xff]  ;;  %v1591_v26 = vld [vmem:[#allocation2 + $0xb8] sm:$0x3] }
 0x1e5   : > { %2042 = vrot.lane.b32.xlu1 %v5230_v13, %s4384_s19  ;;  %2136 = vrot.lane.b32.xlu0 %v5230_v13, %s4388_s17  ;;  %v5239_v42 = vpack.c.bf16 %v1590_v21, %v1589_v22  ;;  %v1906_v23 = vrot.slane %v5230_v13, 1  ;;  %v1907_v1 = vrot.slane %v1639_v3, 1  ;;  %v1637_v61 = vpack.c.bf16 %v1591_v26, %v1591_v26 }
 0x1e6   : > { %v1757_v28 = vshll.u32 %v5230_v13, 16  ;;  %v1755_v45 = vshrl.u32 %v5230_v13, 16  ;;  %v1762_v2 = vshll.u32 %v1639_v3, 16 }
 0x1e7   : > { %v1908_v27 = vsel %vm566_vm0, %v1906_v23, %v1907_v1  ;;  %v1903_v36 = vrot.slane %v5239_v42, 1  ;;  %v1904_v37 = vrot.slane %v1637_v61, 1  ;;  %v1745_v52 = vshll.u32 %v5239_v42, 16 }
 0x1e8   : > { %v1759_v17 = vrot.slane %v1757_v28, 1  ;;  %v1764_v54 = vrot.slane %v1762_v2, 1  ;;  %v1743_v63 = vshrl.u32 %v5239_v42, 16  ;;  %v1750_v0 = vshll.u32 %v1637_v61, 16 }
 0x1e9   : > { %2162 = vrot.lane.b32.xlu1 %v1729_v20, %s4391_s28  ;;  %2068 = vrot.lane.b32.xlu0 %v1729_v20, %s4386_s10  ;;  %v1905_v50 = vsel %vm566_vm0, %v1903_v36, %v1904_v37  ;;  %v1747_v62 = vrot.slane %v1745_v52, 1 }
 0x1ea   : > { %v1760_v49 = vor.u32 %v1759_v17, %v1755_v45  ;;  %v1752_v7 = vrot.slane %v1750_v0, 1 }
 0x1eb   : > { %v1748_v12 = vor.u32 %v1747_v62, %v1743_v63 }
 0x1ec   : > { %v1765_v60 = vsel %vm341_vm1, %v1760_v49, %v1764_v54 }
 0x1ed   : > { %1974 = vrot.lane.b32.xlu1 %v1729_v20, %s4381_s16  ;;  %2040 = vrot.lane.b32.xlu0 %v5239_v42, %s4384_s19  ;;  %v1753_v14 = vsel %vm341_vm1, %v1748_v12, %v1752_v7 }
 0x1f0   : > { %v4139_v24 = vpop.f32.mrf.mxu0 }
 0x1f1   : > { %2134 = vrot.lane.b32.xlu1 %v5239_v42, %s4388_s17  ;;  %v1340_v40 = vadd.f32 %v4139_v24, %v5058_v59  ;;  %2200 = vrot.lane.b32.xlu0 %v1908_v27, %s4390_s26 }
 0x1f2   : > { %v1331_v32 = vpop.f32.mrf.mxu0 }
 0x1f3   : > { %vm1412_vm13 = vcmp.gt.f32.partialorder %v1340_v40, 0.0  ;;  %v1444_v16 = vmul.f32 0.2, %v1340_v40  ;;  %v1332_v35 = vadd.f32 %v5058_v59, %v1331_v32 }
 0x1f4   : > { %v4140_v34 = vpop.f32.mrf.mxu0 }
 0x1f5   : > { %v1476_v57 = vsel %vm1412_vm13, %v1340_v40, %v1444_v16  ;;  %vm1410_vm14 = vcmp.gt.f32.partialorder %v1332_v35, 0.0  ;;  %v1442_v41 = vmul.f32 0.2, %v1332_v35  ;;  %2106 = vrot.lane.b32.xlu1 %v1908_v27, %s4389_s20  ;;  %v1343_v43 = vadd.f32 %v4140_v34, %v5058_v59  ;;  %2012 = vrot.lane.b32.xlu0 %v1908_v27, %s4383_s18 }
 0x1f6   : > { %1554 = vst.msk [vmem:[#allocation2 + $0xf1] sm:$0xff] %vm938_vm4, %v1476_v57  ;;  %v1334_v44 = vpop.f32.mrf.mxu0  ;;  %vm2381_vm13 = vcmask 392192  }
 0x1f7   : > { %v1474_v46 = vsel %vm1410_vm14, %v1332_v35, %v1442_v41  ;;  %vm1413_vm15 = vcmp.gt.f32.partialorder %v1343_v43, 0.0  ;;  %v1445_v47 = vmul.f32 0.2, %v1343_v43  ;;  %v1335_v18 = vadd.f32 %v5058_v59, %v1334_v44  ;;  %v5263_v48 = vpop.permute.xlu0 %2124  ;;  %v5271_v55 = vpop.permute.xlu1 %2030 }
 0x1f8   : > { %1552 = vst.msk [vmem:[#allocation2 + $0xd9] sm:$0xff] %vm938_vm4, %v1474_v46  ;;  %vm2414_vm14 = vcmask 457728  }
 0x1f9   : > { %v1477_v8 = vsel %vm1413_vm15, %v1343_v43, %v1445_v47  ;;  %vm1411_vm2 = vcmp.gt.f32.partialorder %v1335_v18, 0.0  ;;  %v1443_v53 = vmul.f32 0.2, %v1335_v18  ;;  %2010 = vrot.lane.b32.xlu1 %v1905_v50, %s4383_s18  ;;  %2198 = vrot.lane.b32.xlu0 %v1905_v50, %s4390_s26  ;;  %vm6540_vm15 = vcmask 523264  }
 0x1fa   : > { %1555 = vst.msk [vmem:[#allocation2 + $0xf9] sm:$0xff] %vm938_vm4, %v1477_v8 }
 0x1fb   : > { %v1475_v56 = vsel %vm1411_vm2, %v1335_v18, %v1443_v53  ;;  %v5273_v58 = vpop.permute.xlu0 %2028  ;;  %v5280_v5 = vpop.permute.xlu1 %2094  ;;  %v2221_v18 = vsel %vm938_vm4, %v4964_v51, %v5241_v4  ;;  %vm6539_vm2 = vcmask 588800  }
 0x1fc   : > { %1553 = vst.msk [vmem:[#allocation2 + $0xe1] sm:$0xff] %vm938_vm4, %v1475_v56  ;;  %v2253_v12 = vsel %vm1004_vm6, %v2221_v18, %v5253_v29 }
 0x1fd   : > { %2074 = vrot.lane.b32.xlu1 %v1765_v60, %s4386_s10  ;;  %2104 = vrot.lane.b32.xlu0 %v1905_v50, %s4389_s20  ;;  %v1598_v28 = vld [vmem:[#allocation2 + $0xf0] sm:$0xff] }
 0x1ff   : > { %v5282_v6 = vpop.permute.xlu0 %2188  ;;  %v1595_v10 = vld [vmem:[#allocation2 + $0xd8] sm:$0xff]  ;;  %v5293_v22 = vpop.permute.xlu1 %1998 }
 0x201   : > { %1980 = vrot.lane.b32.xlu1 %v1765_v60, %s4381_s16  ;;  %2168 = vrot.lane.b32.xlu0 %v1765_v60, %s4391_s28  ;;  %v1599_v24 = vld [vmem:[#allocation2 + $0xf8] sm:$0xff]  ;;  %v1600_v36 = vld [vmem:[#allocation2 + $0x100] sm:$0x3] }
 0x202   : > { %v5301_v40 = vpack.c.bf16 %v1599_v24, %v1598_v28  ;;  %v1643_v44 = vpack.c.bf16 %v1600_v36, %v1600_v36 }
 0x203   : > { %v1596_v11 = vld [vmem:[#allocation2 + $0xe0] sm:$0xff]  ;;  %v1597_v9 = vld [vmem:[#allocation2 + $0xe8] sm:$0x3]  ;;  %v5295_v23 = vpop.permute.xlu0 %2000  ;;  %v5303_v16 = vpop.permute.xlu1 %2062 }
 0x204   : > { %v5287_v15 = vpack.c.bf16 %v1596_v11, %v1595_v10  ;;  %v1641_v19 = vpack.c.bf16 %v1597_v9, %v1597_v9  ;;  %v1781_v57 = vshll.u32 %v5301_v40, 16  ;;  %v1779_v56 = vshrl.u32 %v5301_v40, 16 }
 0x205   : > { %2166 = vrot.lane.b32.xlu1 %v1753_v14, %s4391_s28  ;;  %2072 = vrot.lane.b32.xlu0 %v1753_v14, %s4386_s10  ;;  %v1786_v60 = vshll.u32 %v1643_v44, 16 }
 0x206   : > { %v1909_v20 = vrot.slane %v5287_v15, 1  ;;  %v1910_v21 = vrot.slane %v1641_v19, 1  ;;  %v1769_v3 = vshll.u32 %v5287_v15, 16  ;;  %v1767_v27 = vshrl.u32 %v5287_v15, 16 }
 0x207   : > { %v1774_v61 = vshll.u32 %v1641_v19, 16  ;;  %v2093_v35 = vpop.permute.xlu0 %2092  ;;  %v5315_v45 = vpop.permute.xlu1 %1968  ;;  %v1783_v49 = vrot.slane %v1781_v57, 1  ;;  %v1788_v9 = vrot.slane %v1786_v60, 1 }
 0x208   : > { %v1911_v1 = vsel %vm566_vm0, %v1909_v20, %v1910_v21  ;;  %v1771_v26 = vrot.slane %v1769_v3, 1 }
 0x209   : > { %1978 = vrot.lane.b32.xlu1 %v1753_v14, %s4381_s16  ;;  %2202 = vrot.lane.b32.xlu0 %v1911_v1, %s4390_s26  ;;  %v1776_v34 = vrot.slane %v1774_v61, 1  ;;  %v1784_v7 = vor.u32 %v1783_v49, %v1779_v56  ;;  %v2285_v14 = vsel %vm1070_vm8, %v2253_v12, %v5273_v58  ;;  %v1912_v58 = vrot.slane %v5301_v40, 1 }
 0x20a   : > { %v1772_v32 = vor.u32 %v1771_v26, %v1767_v27  ;;  %v1913_v26 = vrot.slane %v1643_v44, 1 }
 0x20b   : > { %v2157_v2 = vpop.permute.xlu0 %2156  ;;  %v1789_v3 = vsel %vm341_vm1, %v1784_v7, %v1788_v9 }
 0x20c   : > { %v1777_v17 = vsel %vm341_vm1, %v1772_v32, %v1776_v34 }
 0x20d   : > { %2138 = vrot.lane.b32.xlu1 %v5287_v15, %s4388_s17  ;;  %2044 = vrot.lane.b32.xlu0 %v5287_v15, %s4384_s19 }
 0x210   : > { %v4143_v37 = vpop.f32.mrf.mxu0 }
 0x211   : > { %2046 = vrot.lane.b32.xlu1 %v5301_v40, %s4384_s19  ;;  %v1356_v41 = vadd.f32 %v4143_v37, %v5058_v59  ;;  %2076 = vrot.lane.b32.xlu0 %v1777_v17, %s4386_s10 }
 0x212   : > { %v1347_v43 = vpop.f32.mrf.mxu0 }
 0x213   : > { %vm1416_vm12 = vcmp.gt.f32.partialorder %v1356_v41, 0.0  ;;  %v1448_v46 = vmul.f32 0.2, %v1356_v41  ;;  %v1348_v47 = vadd.f32 %v5058_v59, %v1347_v43 }
 0x214   : > { %v4144_v50 = vpop.f32.mrf.mxu0 }
 0x215   : > { %v1480_v52 = vsel %vm1416_vm12, %v1356_v41, %v1448_v46  ;;  %vm1414_vm5 = vcmp.gt.f32.partialorder %v1348_v47, 0.0  ;;  %v1446_v8 = vmul.f32 0.2, %v1348_v47  ;;  %2014 = vrot.lane.b32.xlu1 %v1911_v1, %s4383_s18  ;;  %v1359_v53 = vadd.f32 %v4144_v50, %v5058_v59  ;;  %2108 = vrot.lane.b32.xlu0 %v1911_v1, %s4389_s20 }
 0x216   : > { %1558 = vst.msk [vmem:[#allocation2 + $0x121] sm:$0xff] %vm938_vm4, %v1480_v52  ;;  %v1350_v54 = vpop.f32.mrf.mxu0 }
 0x217   : > { %v1478_v62 = vsel %vm1414_vm5, %v1348_v47, %v1446_v8  ;;  %vm1417_vm7 = vcmp.gt.f32.partialorder %v1359_v53, 0.0  ;;  %v1449_v51 = vmul.f32 0.2, %v1359_v53  ;;  %v5326_v4 = vpop.permute.xlu1 %2034  ;;  %v1351_v63 = vadd.f32 %v5058_v59, %v1350_v54  ;;  %v5329_v0 = vpop.permute.xlu0 %2128 }
 0x218   : > { %1556 = vst.msk [vmem:[#allocation2 + $0x109] sm:$0xff] %vm938_vm4, %v1478_v62 }
 0x219   : > { %v1481_v10 = vsel %vm1417_vm7, %v1359_v53, %v1449_v51  ;;  %vm1415_vm9 = vcmp.gt.f32.partialorder %v1351_v63, 0.0  ;;  %v1447_v11 = vmul.f32 0.2, %v1351_v63  ;;  %2170 = vrot.lane.b32.xlu1 %v1777_v17, %s4391_s28  ;;  %2140 = vrot.lane.b32.xlu0 %v5301_v40, %s4388_s17 }
 0x21a   : > { %1559 = vst.msk [vmem:[#allocation2 + $0x129] sm:$0xff] %vm938_vm4, %v1481_v10 }
 0x21b   : > { %v1479_v19 = vsel %vm1415_vm9, %v1351_v63, %v1447_v11  ;;  %v1967_v29 = vpop.permute.xlu1 %1966  ;;  %v2061_v20 = vpop.permute.xlu0 %2060 }
 0x21c   : > { %1557 = vst.msk [vmem:[#allocation2 + $0x111] sm:$0xff] %vm938_vm4, %v1479_v19  ;;  %v2317_v21 = vsel %vm1136_vm10, %v2285_v14, %v2061_v20  ;;  %v2223_v53 = vsel %vm938_vm4, %v5083_v39, %v1967_v29 }
 0x21d   : > { %v2350_v1 = vsel %vm2348_vm11, %v2317_v21, %v2093_v35  ;;  %1982 = vrot.lane.b32.xlu1 %v1777_v17, %s4381_s16  ;;  %2172 = vrot.lane.b32.xlu0 %v1789_v3, %s4391_s28  ;;  %v1914_v35 = vsel %vm566_vm0, %v1912_v58, %v1913_v26  ;;  %v2255_v51 = vsel %vm1004_vm6, %v2223_v53, %v5293_v22  ;;  %v1604_v12 = vld [vmem:[#allocation2 + $0x120] sm:$0xff] }
 0x21e   : > { %v2383_v24 = vsel %vm2381_vm13, %v2350_v1, %v5263_v48  ;;  %v2287_v39 = vsel %vm1070_vm8, %v2255_v51, %v5271_v55 }
 0x21f   : > { %v5349_v27 = vpop.permute.xlu1 %2126  ;;  %v5351_v61 = vpop.permute.xlu0 %2032  ;;  %v2416_v28 = vsel %vm2414_vm14, %v2383_v24, %v2157_v2  ;;  %v1601_v36 = vld [vmem:[#allocation2 + $0x108] sm:$0xff]  ;;  %v2319_v21 = vsel %vm1136_vm10, %v2287_v39, %v5303_v16  ;;  %v2225_v24 = vsel %vm938_vm4, %v5074_v33, %v5315_v45 }
 0x220   : > { %v2449_v32 = vsel %vm6540_vm15, %v2416_v28, %v5282_v6  ;;  %v2352_v33 = vsel %vm2348_vm11, %v2319_v21, %v5280_v5 }
 0x221   : > { %2078 = vrot.lane.b32.xlu1 %v1789_v3, %s4386_s10  ;;  %4163 = vmatprep.mubr.msk.bf16.mxu1 %vm6539_vm2, %v2449_v32  ;;  %v1605_v62 = vld [vmem:[#allocation2 + $0x128] sm:$0xff]  ;;  %v1606_v20 = vld [vmem:[#allocation2 + $0x130] sm:$0x3]  ;;  %v2385_v5 = vsel %vm2381_vm13, %v2352_v33, %v5349_v27 }
 0x222   : > { %2204 = vrot.lane.b32.xlu0 %v1914_v35, %s4390_s26  ;;  %v5389_v10 = vpack.c.bf16 %v1605_v62, %v1604_v12  ;;  %v1647_v16 = vpack.c.bf16 %v1606_v20, %v1606_v20 }
 0x223   : > { %v5360_v34 = vpop.permute.xlu1 %2098  ;;  %v5362_v48 = vpop.permute.xlu0 %2192  ;;  %v1602_v37 = vld [vmem:[#allocation2 + $0x110] sm:$0xff]  ;;  %v1603_v17 = vld [vmem:[#allocation2 + $0x118] sm:$0x3] }
 0x224   : > { %v5364_v57 = vpack.c.bf16 %v1602_v37, %v1601_v36  ;;  %v1645_v41 = vpack.c.bf16 %v1603_v17, %v1603_v17  ;;  %v1805_v1 = vshll.u32 %v5389_v10, 16 }
 0x225   : > { %2110 = vrot.lane.b32.xlu1 %v1914_v35, %s4389_s20 }
 0x226   : > { %v1915_v6 = vrot.slane %v5364_v57, 1  ;;  %v1916_v43 = vrot.slane %v1645_v41, 1  ;;  %v1793_v44 = vshll.u32 %v5364_v57, 16  ;;  %v1798_v47 = vshll.u32 %v1645_v41, 16 }
 0x227   : > { %v5369_v2 = vpop.permute.xlu1 %2002  ;;  %v5371_v46 = vpop.permute.xlu0 %2004  ;;  %v1791_v50 = vshrl.u32 %v5364_v57, 16  ;;  %v1807_v45 = vrot.slane %v1805_v1, 1 }
 0x228   : > { %v1917_v18 = vsel %vm566_vm0, %v1915_v6, %v1916_v43  ;;  %v1795_v49 = vrot.slane %v1793_v44, 1  ;;  %v1800_v8 = vrot.slane %v1798_v47, 1  ;;  %v2257_v43 = vsel %vm1004_vm6, %v2225_v24, %v5295_v23 }
 0x229   : > { %2142 = vrot.lane.b32.xlu1 %v5364_v57, %s4388_s17  ;;  %2206 = vrot.lane.b32.xlu0 %v1917_v18, %s4390_s26  ;;  %v1803_v44 = vshrl.u32 %v5389_v10, 16  ;;  %v1810_v47 = vshll.u32 %v1647_v16, 16 }
 0x22a   : > { %v1796_v52 = vor.u32 %v1795_v49, %v1791_v50  ;;  %v2289_v50 = vsel %vm1070_vm8, %v2257_v43, %v5351_v61 }
 0x22b   : > { %v5380_v54 = vpop.permute.xlu0 %2190  ;;  %v5383_v60 = vpop.permute.xlu1 %2066  ;;  %v1808_v53 = vor.u32 %v1807_v45, %v1803_v44  ;;  %v1812_v62 = vrot.slane %v1810_v47, 1 }
 0x22c   : > { %v1801_v56 = vsel %vm341_vm1, %v1796_v52, %v1800_v8 }
 0x22d   : > { %2174 = vrot.lane.b32.xlu1 %v1801_v56, %s4391_s28  ;;  %2016 = vrot.lane.b32.xlu0 %v1914_v35, %s4383_s18  ;;  %v1813_v39 = vsel %vm341_vm1, %v1808_v53, %v1812_v62 }
 0x22f   : > { %v2097_v63 = vpop.permute.xlu0 %2096  ;;  %v5397_v14 = vpop.permute.xlu1 %1972 }
 0x230   : > { %v4147_v7 = vpop.f32.mrf.mxu0 }
 0x231   : > { %v1372_v11 = vadd.f32 %v4147_v7, %v5058_v59  ;;  %1984 = vrot.lane.b32.xlu1 %v1789_v3, %s4381_s16  ;;  %2048 = vrot.lane.b32.xlu0 %v5364_v57, %s4384_s19 }
 0x232   : > { %v1363_v9 = vpop.f32.mrf.mxu0 }
 0x233   : > { %vm1420_vm12 = vcmp.gt.f32.partialorder %v1372_v11, 0.0  ;;  %v1452_v22 = vmul.f32 0.2, %v1372_v11  ;;  %v1364_v19 = vadd.f32 %v5058_v59, %v1363_v9  ;;  %v2161_v29 = vpop.permute.xlu0 %2160  ;;  %v1919_v9 = vrot.slane %v1647_v16, 1 }
 0x234   : > { %v4148_v55 = vpop.f32.mrf.mxu0 }
 0x235   : > { %v1484_v58 = vsel %vm1420_vm12, %v1372_v11, %v1452_v22  ;;  %vm1418_vm5 = vcmp.gt.f32.partialorder %v1364_v19, 0.0  ;;  %v1450_v3 = vmul.f32 0.2, %v1364_v19  ;;  %v1375_v26 = vadd.f32 %v4148_v55, %v5058_v59  ;;  %1986 = vrot.lane.b32.xlu1 %v1801_v56, %s4381_s16  ;;  %2080 = vrot.lane.b32.xlu0 %v1801_v56, %s4386_s10  ;;  %v5415_v59 = vld [vmem:[%s6534_s2] ss:$0 sm:$0xff] }
 0x236   : > { %1562 = vst.msk [vmem:[#allocation2 + $0x151] sm:$0xff] %vm938_vm4, %v1484_v58  ;;  %v1366_v28 = vpop.f32.mrf.mxu0  ;;  %v1918_v11 = vrot.slane %v5389_v10, 1 }
 0x237   : > { %v1482_v32 = vsel %vm1418_vm5, %v1364_v19, %v1450_v3  ;;  %vm1421_vm7 = vcmp.gt.f32.partialorder %v1375_v26, 0.0  ;;  %v1453_v35 = vmul.f32 0.2, %v1375_v26  ;;  %v5410_v36 = vpop.permute.xlu1 %2038  ;;  %v1367_v37 = vadd.f32 %v5415_v59, %v1366_v28  ;;  %v5418_v17 = vpop.permute.xlu0 %2132 }
 0x238   : > { %1560 = vst.msk [vmem:[#allocation2 + $0x139] sm:$0xff] %vm938_vm4, %v1482_v32 }
 0x239   : > { %v1485_v41 = vsel %vm1421_vm7, %v1375_v26, %v1453_v35  ;;  %vm1419_vm9 = vcmp.gt.f32.partialorder %v1367_v37, 0.0  ;;  %v1451_v6 = vmul.f32 0.2, %v1367_v37  ;;  %2018 = vrot.lane.b32.xlu1 %v1917_v18, %s4383_s18  ;;  %2112 = vrot.lane.b32.xlu0 %v1917_v18, %s4389_s20 }
 0x23a   : > { %1563 = vst.msk [vmem:[#allocation2 + $0x159] sm:$0xff] %vm938_vm4, %v1485_v41 }
 0x23b   : > { %v1483_v49 = vsel %vm1419_vm9, %v1367_v37, %v1451_v6  ;;  %v2159_v52 = vpop.permute.xlu1 %2158  ;;  %v2065_v8 = vpop.permute.xlu0 %2064 }
 0x23c   : > { %1561 = vst.msk [vmem:[#allocation2 + $0x141] sm:$0xff] %vm938_vm4, %v1483_v49  ;;  %v2418_v18 = vsel %vm2414_vm14, %v2385_v5, %v2159_v52  ;;  %v2321_v23 = vsel %vm1136_vm10, %v2289_v50, %v2065_v8 }
 0x23d   : > { %v2354_v56 = vsel %vm2348_vm11, %v2321_v23, %v2097_v63  ;;  %2050 = vrot.lane.b32.xlu1 %v5389_v10, %s4384_s19  ;;  %2144 = vrot.lane.b32.xlu0 %v5389_v10, %s4388_s17  ;;  %v2451_v27 = vsel %vm6540_vm15, %v2418_v18, %v5380_v54  ;;  %v1610_v49 = vld [vmem:[#allocation2 + $0x150] sm:$0xff] }
 0x23e   : > { %v2387_v61 = vsel %vm2381_vm13, %v2354_v56, %v5329_v0  ;;  %4164 = vmatmul.mubr.msk.bf16.vlgmr.msra.gmra.mxu1 %vm6539_vm2, %v2451_v27 }
 0x23f   : > { %v1971_v51 = vpop.permute.xlu1 %1970  ;;  %v5446_v12 = vpop.permute.xlu0 %2036  ;;  %v2420_v63 = vsel %vm2414_vm14, %v2387_v61, %v2161_v29  ;;  %v1607_v22 = vld [vmem:[#allocation2 + $0x138] sm:$0xff] }
 0x240   : > { %v2453_v7 = vsel %vm6540_vm15, %v2420_v63, %v5362_v48  ;;  %v1920_v48 = vsel %vm566_vm0, %v1918_v11, %v1919_v9  ;;  %v2227_v33 = vsel %vm938_vm4, %v5140_v38, %v1971_v51 }
 0x241   : > { %4167 = vmatprep.mubr.msk.bf16.mxu1 %vm6539_vm2, %v2453_v7  ;;  %2082 = vrot.lane.b32.xlu1 %v1813_v39, %s4386_s10  ;;  %v1611_v43 = vld [vmem:[#allocation2 + $0x158] sm:$0xff]  ;;  %v2259_v44 = vsel %vm1004_vm6, %v2227_v33, %v5369_v2  ;;  %v1612_v63 = vld [vmem:[#allocation2 + $0x160] sm:$0x3] }
 0x242   : > { %2176 = vrot.lane.b32.xlu0 %v1813_v39, %s4391_s28  ;;  %v5490_v8 = vpack.c.bf16 %v1611_v43, %v1610_v49  ;;  %v2291_v18 = vsel %vm1070_vm8, %v2259_v44, %v5326_v4 }
 0x243   : > { %v5456_v0 = vpop.permute.xlu1 %2130  ;;  %v5458_v54 = vpop.permute.xlu0 %2196  ;;  %v1608_v19 = vld [vmem:[#allocation2 + $0x140] sm:$0xff]  ;;  %v1609_v29 = vld [vmem:[#allocation2 + $0x148] sm:$0x3]  ;;  %v2323_v4 = vsel %vm1136_vm10, %v2291_v18, %v5383_v60  ;;  %v2229_v60 = vsel %vm938_vm4, %v5128_v30, %v5397_v14 }
 0x244   : > { %v5461_v20 = vpack.c.bf16 %v1608_v19, %v1607_v22  ;;  %v1649_v21 = vpack.c.bf16 %v1609_v29, %v1609_v29  ;;  %v1651_v19 = vpack.c.bf16 %v1612_v63, %v1612_v63  ;;  %v1827_v30 = vshrl.u32 %v5490_v8, 16 }
 0x245   : > { %2114 = vrot.lane.b32.xlu1 %v1920_v48, %s4389_s20 }
 0x246   : > { %2208 = vrot.lane.b32.xlu0 %v1920_v48, %s4390_s26  ;;  %v1921_v55 = vrot.slane %v5461_v20, 1  ;;  %v1922_v1 = vrot.slane %v1649_v21, 1  ;;  %v1817_v58 = vshll.u32 %v5461_v20, 16  ;;  %v1822_v24 = vshll.u32 %v1649_v21, 16 }
 0x247   : > { %v5467_v3 = vpop.permute.xlu1 %2102  ;;  %v5469_v26 = vpop.permute.xlu0 %2008  ;;  %v1815_v16 = vshrl.u32 %v5461_v20, 16  ;;  %v1834_v14 = vshll.u32 %v1651_v19, 16  ;;  %v1925_v49 = vrot.slane %v1651_v19, 1 }
 0x248   : > { %v1923_v28 = vsel %vm566_vm0, %v1921_v55, %v1922_v1  ;;  %v1819_v32 = vrot.slane %v1817_v58, 1  ;;  %v1824_v37 = vrot.slane %v1822_v24, 1  ;;  %v2261_v24 = vsel %vm1004_vm6, %v2229_v60, %v5371_v46 }
 0x249   : > { %2146 = vrot.lane.b32.xlu1 %v5461_v20, %s4388_s17 }
 0x24a   : > { %2210 = vrot.lane.b32.xlu0 %v1923_v28, %s4390_s26  ;;  %v1820_v35 = vor.u32 %v1819_v32, %v1815_v16  ;;  %v2293_v16 = vsel %vm1070_vm8, %v2261_v24, %v5446_v12 }
 0x24b   : > { %v5478_v45 = vpop.permute.xlu1 %2006  ;;  %v5480_v41 = vpop.permute.xlu0 %2194 }
 0x24c   : > { %v1825_v6 = vsel %vm341_vm1, %v1820_v35, %v1824_v37 }
 0x24d   : > { %2178 = vrot.lane.b32.xlu1 %v1825_v6, %s4391_s28 }
 0x24e   : > { %v4151_v47 = vpop.f32.mrf.mxu0  ;;  %2020 = vrot.lane.b32.xlu0 %v1920_v48, %s4383_s18 }
 0x24f   : > { %v1388_v5 = vadd.f32 %v5415_v59, %v4151_v47  ;;  %v5488_v50 = vpop.permute.xlu1 %2070  ;;  %v2101_v38 = vpop.permute.xlu0 %2100 }
 0x250   : > { %v1379_v52 = vpop.f32.mrf.mxu0 }
 0x251   : > { %vm1424_vm12 = vcmp.gt.f32.partialorder %v1388_v5, 0.0  ;;  %v1456_v23 = vmul.f32 0.2, %v1388_v5  ;;  %v1380_v53 = vadd.f32 %v5415_v59, %v1379_v52  ;;  %1988 = vrot.lane.b32.xlu1 %v1813_v39, %s4381_s16  ;;  %v1829_v39 = vshll.u32 %v5490_v8, 16 }
 0x252   : > { %v4152_v2 = vpop.f32.mrf.mxu0  ;;  %2052 = vrot.lane.b32.xlu0 %v5461_v20, %s4384_s19 }
 0x253   : > { %v1488_v56 = vsel %vm1424_vm12, %v1388_v5, %v1456_v23  ;;  %vm1422_vm5 = vcmp.gt.f32.partialorder %v1380_v53, 0.0  ;;  %v1454_v27 = vmul.f32 0.2, %v1380_v53  ;;  %v1391_v61 = vadd.f32 %v5415_v59, %v4152_v2  ;;  %v5499_v62 = vpop.permute.xlu1 %1976  ;;  %v2165_v51 = vpop.permute.xlu0 %2164 }
 0x254   : > { %1566 = vst.msk [vmem:[#allocation2 + $0x181] sm:$0xff] %vm938_vm4, %v1488_v56  ;;  %v1382_v7 = vpop.f32.mrf.mxu0  ;;  %v1831_v1 = vrot.slane %v1829_v39, 1 }
 0x255   : > { %v1486_v11 = vsel %vm1422_vm5, %v1380_v53, %v1454_v27  ;;  %vm1425_vm7 = vcmp.gt.f32.partialorder %v1391_v61, 0.0  ;;  %v1457_v9 = vmul.f32 0.2, %v1391_v61  ;;  %v1383_v22 = vadd.f32 %v5415_v59, %v1382_v7  ;;  %1990 = vrot.lane.b32.xlu1 %v1825_v6, %s4381_s16 }
 0x256   : > { %1564 = vst.msk [vmem:[#allocation2 + $0x169] sm:$0xff] %vm938_vm4, %v1486_v11  ;;  %2084 = vrot.lane.b32.xlu0 %v1825_v6, %s4386_s10  ;;  %v2356_v59 = vsel %vm2348_vm11, %v2323_v4, %v5360_v34  ;;  %v1832_v46 = vor.u32 %v1831_v1, %v1827_v30 }
 0x257   : > { %v1489_v29 = vsel %vm1425_vm7, %v1391_v61, %v1457_v9  ;;  %vm1423_vm9 = vcmp.gt.f32.partialorder %v1383_v22, 0.0  ;;  %v1455_v48 = vmul.f32 0.2, %v1383_v22  ;;  %v5512_v21 = vpop.permute.xlu1 %2042  ;;  %v5514_v55 = vpop.permute.xlu0 %2136  ;;  %v2389_v34 = vsel %vm2381_vm13, %v2356_v59, %v5456_v0 }
 0x258   : > { %1567 = vst.msk [vmem:[#allocation2 + $0x189] sm:$0xff] %vm938_vm4, %v1489_v29  ;;  %v1836_v0 = vrot.slane %v1834_v14, 1 }
 0x259   : > { %v1487_v58 = vsel %vm1423_vm9, %v1383_v22, %v1455_v48  ;;  %2022 = vrot.lane.b32.xlu1 %v1923_v28, %s4383_s18  ;;  %vm2936_vm9 = vcmask 1040384  }
 0x25a   : > { %1565 = vst.msk [vmem:[#allocation2 + $0x171] sm:$0xff] %vm938_vm4, %v1487_v58  ;;  %2116 = vrot.lane.b32.xlu0 %v1923_v28, %s4389_s20 }
 0x25b   : > { %v2163_v32 = vpop.permute.xlu1 %2162  ;;  %v2069_v35 = vpop.permute.xlu0 %2068  ;;  %v1616_v14 = vld [vmem:[#allocation2 + $0x180] sm:$0xff] }
 0x25c   : > { %v2422_v37 = vsel %vm2414_vm14, %v2389_v34, %v2163_v32  ;;  %v2325_v33 = vsel %vm1136_vm10, %v2293_v16, %v2069_v35  ;;  %v2233_v34 = vsel %vm938_vm4, %v5188_v25, %v5499_v62 }
 0x25d   : > { %v2358_v6 = vsel %vm2348_vm11, %v2325_v33, %v2101_v38  ;;  %2054 = vrot.lane.b32.xlu1 %v5490_v8, %s4384_s19  ;;  %v2455_v28 = vsel %vm6540_vm15, %v2422_v37, %v5480_v41  ;;  %v1837_v38 = vsel %vm341_vm1, %v1832_v46, %v1836_v0  ;;  %v1924_v41 = vrot.slane %v5490_v8, 1  ;;  %v1620_v0 = vld [vmem:[#allocation2 + $0x1a0] sm:$0xff] }
 0x25e   : > { %v2391_v12 = vsel %vm2381_vm13, %v2358_v6, %v5418_v17  ;;  %2148 = vrot.lane.b32.xlu0 %v5490_v8, %s4388_s17  ;;  %4168 = vmatmul.mubr.msk.bf16.gmra.mxu1 %vm6539_vm2, %v2455_v28  ;;  %v1613_v17 = vld [vmem:[#allocation2 + $0x168] sm:$0xff] }
 0x25f   : > { %v1975_v43 = vpop.permute.xlu1 %1974  ;;  %v2041_v44 = vpop.permute.xlu0 %2040  ;;  %v2424_v47 = vsel %vm2414_vm14, %v2391_v12, %v2165_v51  ;;  %v1617_v58 = vld [vmem:[#allocation2 + $0x188] sm:$0xff]  ;;  %v1618_v35 = vld [vmem:[#allocation2 + $0x190] sm:$0x3]  ;;  %v1619_v12 = vld [vmem:[#allocation2 + $0x198] sm:$0xff] }
 0x260   : > { %v2457_v5 = vsel %vm6540_vm15, %v2424_v47, %v5458_v54  ;;  %v1926_v54 = vsel %vm566_vm0, %v1924_v41, %v1925_v49  ;;  %v2231_v9 = vsel %vm938_vm4, %v5197_v31, %v1975_v43  ;;  %v1654_v16 = vpack.c.bf16 %v1617_v58, %v1616_v14 }
 0x261   : > { %4171 = vmatprep.mubr.msk.bf16.mxu1 %vm6539_vm2, %v2457_v5  ;;  %2086 = vrot.lane.b32.xlu1 %v1837_v38, %s4386_s10  ;;  %v1614_v52 = vld [vmem:[#allocation2 + $0x170] sm:$0xff]  ;;  %v1615_v18 = vld [vmem:[#allocation2 + $0x178] sm:$0x3]  ;;  %v2263_v29 = vsel %vm1004_vm6, %v2231_v9, %v5478_v45  ;;  %v1655_v46 = vpack.c.bf16 %v1618_v35, %v1618_v35  ;;  %v1656_v49 = vpack.c.bf16 %v1620_v0, %v1619_v12 }
 0x262   : > { %2180 = vrot.lane.b32.xlu0 %v1837_v38, %s4391_s28  ;;  %v5549_v23 = vpack.c.bf16 %v1614_v52, %v1613_v17  ;;  %v1653_v53 = vpack.c.bf16 %v1615_v18, %v1615_v18  ;;  %v2295_v31 = vsel %vm1070_vm8, %v2263_v29, %v5410_v36  ;;  %v1933_v33 = vshll.u32 %v1654_v16, 16 }
 0x263   : > { %v2135_v2 = vpop.permute.xlu1 %2134  ;;  %v5551_v56 = vpop.permute.xlu0 %2200  ;;  %v2327_v45 = vsel %vm1136_vm10, %v2295_v31, %v5488_v50  ;;  %v2265_v50 = vsel %vm1004_vm6, %v2233_v34, %v5469_v26  ;;  %v1938_v41 = vshll.u32 %v1655_v46, 16  ;;  %v1961_v34 = vrot.slane %v1656_v49, 1 }
 0x264   : > { %v1927_v27 = vrot.slane %v5549_v23, 1  ;;  %v1928_v61 = vrot.slane %v1653_v53, 1  ;;  %v1841_v51 = vshll.u32 %v5549_v23, 16  ;;  %v1846_v63 = vshll.u32 %v1653_v53, 16  ;;  %v1621_v53 = vld [vmem:[#allocation2 + $0x1a8] sm:$0x3] }
 0x265   : > { %2118 = vrot.lane.b32.xlu1 %v1926_v54, %s4389_s20  ;;  %v1839_v39 = vshrl.u32 %v5549_v23, 16  ;;  %v2360_v37 = vsel %vm2348_vm11, %v2327_v45, %v5467_v3  ;;  %v2297_v6 = vsel %vm1070_vm8, %v2265_v50, %v2041_v44  ;;  %v1935_v47 = vrot.slane %v1933_v33, 1 }
 0x266   : > { %2212 = vrot.lane.b32.xlu0 %v1926_v54, %s4390_s26  ;;  %v1843_v11 = vrot.slane %v1841_v51, 1  ;;  %v1929_v22 = vsel %vm566_vm0, %v1927_v27, %v1928_v61  ;;  %v1848_v60 = vrot.slane %v1846_v63, 1  ;;  %v2393_v25 = vsel %vm2381_vm13, %v2360_v37, %v2135_v2 }
 0x267   : > { %v5558_v4 = vpop.permute.xlu1 %2106  ;;  %v5560_v7 = vpop.permute.xlu0 %2012  ;;  %v1657_v61 = vpack.c.bf16 %v1621_v53, %v1621_v53  ;;  %v1950_v51 = vshll.u32 %v1656_v49, 16 }
 0x268   : > { %v1844_v19 = vor.u32 %v1843_v11, %v1839_v39 }
 0x269   : > { %2150 = vrot.lane.b32.xlu1 %v5549_v23, %s4388_s17  ;;  %v1955_v29 = vshll.u32 %v1657_v61, 16 }
 0x26a   : > { %2214 = vrot.lane.b32.xlu0 %v1929_v22, %s4390_s26  ;;  %v1849_v1 = vsel %vm341_vm1, %v1844_v19, %v1848_v60  ;;  %v1948_v19 = vshrl.u32 %v1656_v49, 16  ;;  %v1952_v60 = vrot.slane %v1950_v51, 1 }
 0x26b   : > { %v2011_v48 = vpop.permute.xlu1 %2010  ;;  %v2199_v59 = vpop.permute.xlu0 %2198 }
 0x26c   : > { %v1953_v31 = vor.u32 %v1952_v60, %v1948_v19 }
 0x26d   : > { %2182 = vrot.lane.b32.xlu1 %v1849_v1, %s4391_s28 }
 0x26e   : > { %2024 = vrot.lane.b32.xlu0 %v1926_v54, %s4383_s18 }
 0x26f   : > { %v5576_v24 = vpop.permute.xlu1 %2074  ;;  %v2105_v30 = vpop.permute.xlu0 %2104 }
 0x271   : > { %1992 = vrot.lane.b32.xlu1 %v1837_v38, %s4381_s16  ;;  %v1931_v38 = vshrl.u32 %v1654_v16, 16 }
 0x272   : > { %2056 = vrot.lane.b32.xlu0 %v5549_v23, %s4384_s19 }
 0x273   : > { %v5586_v36 = vpop.permute.xlu1 %1980  ;;  %v2169_v32 = vpop.permute.xlu0 %2168  ;;  %v1936_v27 = vor.u32 %v1935_v47, %v1931_v38 }
 0x274   : > { %v2237_v33 = vsel %vm938_vm4, %v5230_v13, %v5586_v36 }
 0x275   : > { %1994 = vrot.lane.b32.xlu1 %v1849_v1, %s4381_s16 }
 0x276   : > { %2088 = vrot.lane.b32.xlu0 %v1849_v1, %s4386_s10 }
 0x277   : > { %v2167_v62 = vpop.permute.xlu1 %2166  ;;  %v2073_v28 = vpop.permute.xlu0 %2072 }
 0x278   : > { %v2426_v43 = vsel %vm2414_vm14, %v2393_v25, %v2167_v62  ;;  %v2329_v3 = vsel %vm1136_vm10, %v2297_v6, %v2073_v28  ;;  %v2269_v6 = vsel %vm1004_vm6, %v2237_v33, %v5560_v7 }
 0x279   : > { %v2362_v5 = vsel %vm2348_vm11, %v2329_v3, %v2105_v30  ;;  %2026 = vrot.lane.b32.xlu1 %v1929_v22, %s4383_s18  ;;  %v2459_v26 = vsel %vm6540_vm15, %v2426_v43, %v2199_v59  ;;  %v1957_v30 = vrot.slane %v1955_v29, 1 }
 0x27a   : > { %v2395_v44 = vsel %vm2381_vm13, %v2362_v5, %v5514_v55  ;;  %2120 = vrot.lane.b32.xlu0 %v1929_v22, %s4389_s20  ;;  %4172 = vmatmul.mubr.msk.bf16.gmra.mxu1 %vm6539_vm2, %v2459_v26  ;;  %v1940_v55 = vrot.slane %v1938_v41, 1  ;;  %v1945_v22 = vrot.slane %v1655_v46, 1 }
 0x27b   : > { %v1979_v17 = vpop.permute.xlu1 %1978  ;;  %v2203_v52 = vpop.permute.xlu0 %2202  ;;  %v2428_v18 = vsel %vm2414_vm14, %v2395_v44, %v2169_v32  ;;  %v1958_v45 = vsel %vm341_vm1, %v1953_v31, %v1957_v30  ;;  %v1962_v32 = vrot.slane %v1657_v61, 1 }
 0x27c   : > { %v2235_v2 = vsel %vm938_vm4, %v5239_v42, %v1979_v17  ;;  %v2461_v54 = vsel %vm6540_vm15, %v2428_v18, %v5551_v56  ;;  %v1941_v9 = vsel %vm341_vm1, %v1936_v27, %v1940_v55  ;;  %v1944_v42 = vrot.slane %v1654_v16, 1 }
 0x27d   : > { %4175 = vmatprep.mubr.msk.bf16.mxu1 %vm6539_vm2, %v2461_v54  ;;  %2058 = vrot.lane.b32.xlu1 %v1654_v16, %s4384_s19  ;;  %v2267_v63 = vsel %vm1004_vm6, %v2235_v2, %v2011_v48  ;;  %v1963_v46 = vsel %vm566_vm0, %v1961_v34, %v1962_v32 }
 0x27e   : > { %2152 = vrot.lane.b32.xlu0 %v1654_v16, %s4388_s17  ;;  %v2299_v56 = vsel %vm1070_vm8, %v2267_v63, %v5512_v21  ;;  %v1946_v48 = vsel %vm566_vm0, %v1944_v42, %v1945_v22 }
 0x27f   : > { %v2139_v39 = vpop.permute.xlu1 %2138  ;;  %v2045_v11 = vpop.permute.xlu0 %2044  ;;  %v2331_v58 = vsel %vm1136_vm10, %v2299_v56, %v5576_v24 }
 0x280   : > { %v2364_v16 = vsel %vm2348_vm11, %v2331_v58, %v5558_v4  ;;  %v2301_v28 = vsel %vm1070_vm8, %v2269_v6, %v2045_v11 }
 0x281   : > { %2090 = vrot.lane.b32.xlu1 %v1941_v9, %s4386_s10  ;;  %v2397_v35 = vsel %vm2381_vm13, %v2364_v16, %v2139_v39 }
 0x282   : > { %2184 = vrot.lane.b32.xlu0 %v1941_v9, %s4391_s28 }
 0x283   : > { %v2047_v59 = vpop.permute.xlu1 %2046  ;;  %v2077_v1 = vpop.permute.xlu0 %2076 }
 0x284   : > { %v2333_v12 = vsel %vm1136_vm10, %v2301_v28, %v2077_v1 }
 0x285   : > { %2122 = vrot.lane.b32.xlu1 %v1946_v48, %s4389_s20 }
 0x286   : > { %2216 = vrot.lane.b32.xlu0 %v1946_v48, %s4390_s26 }
 0x287   : > { %v2015_v14 = vpop.permute.xlu1 %2014  ;;  %v2109_v21 = vpop.permute.xlu0 %2108 }
 0x288   : > { %v2366_v13 = vsel %vm2348_vm11, %v2333_v12, %v2109_v21 }
 0x289   : > { %2154 = vrot.lane.b32.xlu1 %v1656_v49, %s4388_s17 }
 0x28b   : > { %v2171_v24 = vpop.permute.xlu1 %2170  ;;  %v2141_v37 = vpop.permute.xlu0 %2140 }
 0x28c   : > { %v2430_v50 = vsel %vm2414_vm14, %v2397_v35, %v2171_v24  ;;  %v2399_v36 = vsel %vm2381_vm13, %v2366_v13, %v2141_v37 }
 0x28d   : > { %2186 = vrot.lane.b32.xlu1 %v1958_v45, %s4391_s28  ;;  %v2463_v4 = vsel %vm6540_vm15, %v2430_v50, %v2203_v52 }
 0x28e   : > { %4176 = vmatmul.mubr.msk.bf16.gmra.mxu1 %vm6539_vm2, %v2463_v4 }
 0x28f   : > { %v1983_v25 = vpop.permute.xlu1 %1982  ;;  %v2173_v62 = vpop.permute.xlu0 %2172 }
 0x290   : > { %v2239_v43 = vsel %vm938_vm4, %v5287_v15, %v1983_v25  ;;  %v2432_v3 = vsel %vm2414_vm14, %v2399_v36, %v2173_v62 }
 0x291   : > { %2218 = vrot.lane.b32.xlu1 %v1963_v46, %s4390_s26  ;;  %v2271_v5 = vsel %vm1004_vm6, %v2239_v43, %v2015_v14 }
 0x292   : > { %v2303_v44 = vsel %vm1070_vm8, %v2271_v5, %v2047_v59 }
 0x293   : > { %v2079_v0 = vpop.permute.xlu1 %2078 }
 0x294   : > { %v2205_v47 = vpop.permute.xlu0 %2204  ;;  %v2335_v49 = vsel %vm1136_vm10, %v2303_v44, %v2079_v0 }
 0x295   : > { %v2465_v7 = vsel %vm6540_vm15, %v2432_v3, %v2205_v47 }
 0x296   : > { %4179 = vmatprep.mubr.msk.bf16.mxu1 %vm6539_vm2, %v2465_v7 }
 0x297   : > { %v2111_v26 = vpop.permute.xlu1 %2110 }
 0x298   : > { %v2368_v17 = vsel %vm2348_vm11, %v2335_v49, %v2111_v26 }
 0x29b   : > { %v2143_v38 = vpop.permute.xlu1 %2142  ;;  %v2207_v41 = vpop.permute.xlu0 %2206 }
 0x29c   : > { %v2401_v15 = vsel %vm2381_vm13, %v2368_v17, %v2143_v38 }
 0x29f   : > { %v2175_v52 = vpop.permute.xlu1 %2174  ;;  %v2017_v18 = vpop.permute.xlu0 %2016 }
 0x2a0   : > { %v2434_v53 = vsel %vm2414_vm14, %v2401_v15, %v2175_v52 }
 0x2a1   : > { %v2467_v2 = vsel %vm6540_vm15, %v2434_v53, %v2207_v41 }
 0x2a2   : > { %4180 = vmatmul.mubr.msk.bf16.gmra.mxu1 %vm6539_vm2, %v2467_v2 }
 0x2a3   : > { %v1985_v54 = vpop.permute.xlu1 %1984  ;;  %v2049_v27 = vpop.permute.xlu0 %2048 }
 0x2a4   : > { %v2241_v39 = vsel %vm938_vm4, %v5301_v40, %v1985_v54 }
 0x2a5   : > { %v2273_v11 = vsel %vm1004_vm6, %v2241_v39, %v2017_v18 }
 0x2a6   : > { %v2305_v22 = vsel %vm1070_vm8, %v2273_v11, %v2049_v27 }
 0x2a7   : > { %v1987_v55 = vpop.permute.xlu1 %1986  ;;  %v2081_v61 = vpop.permute.xlu0 %2080 }
 0x2a8   : > { %v2337_v60 = vsel %vm1136_vm10, %v2305_v22, %v2081_v61  ;;  %v2243_v31 = vsel %vm938_vm4, %v5364_v57, %v1987_v55 }
 0x2ab   : > { %v2019_v51 = vpop.permute.xlu1 %2018  ;;  %v2113_v63 = vpop.permute.xlu0 %2112 }
 0x2ac   : > { %v2370_v29 = vsel %vm2348_vm11, %v2337_v60, %v2113_v63  ;;  %v2275_v30 = vsel %vm1004_vm6, %v2243_v31, %v2019_v51 }
 0x2af   : > { %v2051_v9 = vpop.permute.xlu1 %2050  ;;  %v2145_v42 = vpop.permute.xlu0 %2144 }
 0x2b0   : > { %v2403_v59 = vsel %vm2381_vm13, %v2370_v29, %v2145_v42  ;;  %v2307_v21 = vsel %vm1070_vm8, %v2275_v30, %v2051_v9 }
 0x2b3   : > { %v2083_v56 = vpop.permute.xlu1 %2082 }
 0x2b4   : > { %v2177_v19 = vpop.permute.xlu0 %2176  ;;  %v2339_v45 = vsel %vm1136_vm10, %v2307_v21, %v2083_v56 }
 0x2b5   : > { %v2436_v48 = vsel %vm2414_vm14, %v2403_v59, %v2177_v19 }
 0x2b7   : > { %v2115_v1 = vpop.permute.xlu1 %2114 }
 0x2b8   : > { %v2209_v58 = vpop.permute.xlu0 %2208  ;;  %v2372_v34 = vsel %vm2348_vm11, %v2339_v45, %v2115_v1 }
 0x2b9   : > { %v2469_v40 = vsel %vm6540_vm15, %v2436_v48, %v2209_v58 }
 0x2ba   : > { %4183 = vmatprep.mubr.msk.bf16.mxu1 %vm6539_vm2, %v2469_v40 }
 0x2bb   : > { %v2147_v14 = vpop.permute.xlu1 %2146 }
 0x2bc   : > { %v2211_v16 = vpop.permute.xlu0 %2210  ;;  %v2405_v32 = vsel %vm2381_vm13, %v2372_v34, %v2147_v14 }
 0x2bf   : > { %v2179_v35 = vpop.permute.xlu1 %2178 }
 0x2c0   : > { %v2438_v24 = vsel %vm2414_vm14, %v2405_v32, %v2179_v35  ;;  %v2021_v37 = vpop.permute.xlu0 %2020 }
 0x2c1   : > { %v2471_v57 = vsel %vm6540_vm15, %v2438_v24, %v2211_v16 }
 0x2c2   : > { %4184 = vmatmul.mubr.msk.bf16.gmra.mxu1 %vm6539_vm2, %v2471_v57 }
 0x2c3   : > { %v1989_v33 = vpop.permute.xlu1 %1988 }
 0x2c4   : > { %v2053_v50 = vpop.permute.xlu0 %2052  ;;  %v2245_v25 = vsel %vm938_vm4, %v5389_v10, %v1989_v33 }
 0x2c5   : > { %v2277_v28 = vsel %vm1004_vm6, %v2245_v25, %v2021_v37  ;;  %v5720_v25 = vld [vmem:[%s6536_s4] ss:$0 sm:$0xff] }
 0x2c6   : > { %v2309_v36 = vsel %vm1070_vm8, %v2277_v28, %v2053_v50 }
 0x2c7   : > { %v1991_v4 = vpop.permute.xlu1 %1990 }
 0x2c8   : > { %v2085_v46 = vpop.permute.xlu0 %2084  ;;  %v2247_v38 = vsel %vm938_vm4, %v5461_v20, %v1991_v4 }
 0x2c9   : > { %v2341_v3 = vsel %vm1136_vm10, %v2309_v36, %v2085_v46 }
 0x2cb   : > { %v2023_v6 = vpop.permute.xlu1 %2022 }
 0x2cc   : > { %v2117_v62 = vpop.permute.xlu0 %2116  ;;  %v2279_v41 = vsel %vm1004_vm6, %v2247_v38, %v2023_v6 }
 0x2cd   : > { %v2374_v47 = vsel %vm2348_vm11, %v2341_v3, %v2117_v62 }
 0x2cf   : > { %v2055_v12 = vpop.permute.xlu1 %2054 }
 0x2d0   : > { %v2149_v13 = vpop.permute.xlu0 %2148  ;;  %v2311_v17 = vsel %vm1070_vm8, %v2279_v41, %v2055_v12  ;;  %v4273_v41 = vld [vmem:[%s4491_s13 + $0x60] sm:$0xff] }
 0x2d1   : > { %v2407_v7 = vsel %vm2381_vm13, %v2374_v47, %v2149_v13  ;;  %v4269_v13 = vld [vmem:[%s4491_s13 + $0x30] sm:$0xff] }
 0x2d2   : > { %v5726_v36 = vsel %vm905_vm3, %v4269_v13, 0.0 }
 0x2d3   : > { %v2087_v0 = vpop.permute.xlu1 %2086 }
 0x2d4   : > { %v2181_v43 = vpop.permute.xlu0 %2180  ;;  %v2343_v52 = vsel %vm1136_vm10, %v2311_v17, %v2087_v0  ;;  %v4270_v0 = vld [vmem:[%s4491_s13 + $0x18] sm:$0xff]  ;;  %v4274_v17 = vld [vmem:[%s4491_s13 + $0x48] sm:$0xff] }
 0x2d5   : > { %v2440_v26 = vsel %vm2414_vm14, %v2407_v7, %v2181_v43  ;;  %v5730_v43 = vsel %vm905_vm3, %v4270_v0, 0.0  ;;  %v4281_v0 = vld [vmem:[%s4491_s13 + $0xc0] sm:$0xff] }
 0x2d7   : > { %v2119_v5 = vpop.permute.xlu1 %2118 }
 0x2d8   : > { %v2213_v44 = vpop.permute.xlu0 %2212  ;;  %v2376_v18 = vsel %vm2348_vm11, %v2343_v52, %v2119_v5  ;;  %v4271_v5 = vld [vmem:[%s4491_s13 + $0x38] sm:$0xff] }
 0x2d9   : > { %v2473_v10 = vsel %vm6540_vm15, %v2440_v26, %v2213_v44  ;;  %v5735_v26 = vsel %vm905_vm3, %v4271_v5, 0.0 }
 0x2da   : > { %4187 = vmatprep.mubr.msk.bf16.mxu1 %vm6539_vm2, %v2473_v10  ;;  %v4272_v10 = vld [vmem:[%s4491_s13 + $0x20] sm:$0xff] }
 0x2db   : > { %v2151_v49 = vpop.permute.xlu1 %2150  ;;  %v5740_v38 = vsel %vm905_vm3, %v4272_v10, 0.0 }
 0x2dc   : > { %v2215_v15 = vpop.permute.xlu0 %2214  ;;  %v2409_v53 = vsel %vm2381_vm13, %v2376_v18, %v2151_v49  ;;  %v5744_v49 = vsel %vm905_vm3, %v4273_v41, 0.0 }
 0x2df   : > { %v2183_v2 = vpop.permute.xlu1 %2182 }
 0x2e0   : > { %v2442_v54 = vsel %vm2414_vm14, %v2409_v53, %v2183_v2  ;;  %v2025_v27 = vpop.permute.xlu0 %2024  ;;  %v4275_v53 = vld [vmem:[%s4491_s13 + $0x68] sm:$0xff] }
 0x2e1   : > { %v2475_v20 = vsel %vm6540_vm15, %v2442_v54, %v2215_v15  ;;  %v5748_v15 = vsel %vm905_vm3, %v4274_v17, 0.0  ;;  %v5752_v2 = vsel %vm905_vm3, %v4275_v53, 0.0  ;;  %v4392_v54 = vmov 1983009808  }
 0x2e2   : > { %4188 = vmatmul.mubr.msk.bf16.gmra.mxu1 %vm6539_vm2, %v2475_v20  ;;  %v3247_v20 = vlaneseq }
 0x2e3   : > { %v1993_v55 = vpop.permute.xlu1 %1992 }
 0x2e4   : > { %v2057_v61 = vpop.permute.xlu0 %2056  ;;  %v2249_v11 = vsel %vm938_vm4, %v5490_v8, %v1993_v55 }
 0x2e5   : > { %v2281_v42 = vsel %vm1004_vm6, %v2249_v11, %v2025_v27  ;;  %v5754_v27 = vunpack.c.l.s4 %v4392_v54  ;;  %v5765_v11 = vld [vmem:[%s6537_s5] ss:$0 sm:$0xff] }
 0x2e6   : > { %v2313_v19 = vsel %vm1070_vm8, %v2281_v42, %v2057_v61  ;;  %v4276_v61 = vld [vmem:[%s4491_s13 + $0x50] sm:$0xff] }
 0x2e7   : > { %v1995_v51 = vpop.permute.xlu1 %1994 }
 0x2e8   : > { %v2089_v63 = vpop.permute.xlu0 %2088  ;;  %v2251_v14 = vsel %vm938_vm4, %v5549_v23, %v1995_v51  ;;  %v5759_v51 = vsel %vm905_vm3, %v4276_v61, 0.0 }
 0x2e9   : > { %v2345_v59 = vsel %vm1136_vm10, %v2313_v19, %v2089_v63 }
 0x2eb   : > { %v2027_v39 = vpop.permute.xlu1 %2026 }
 0x2ec   : > { %v2121_v9 = vpop.permute.xlu0 %2120  ;;  %v2283_v21 = vsel %vm1004_vm6, %v2251_v14, %v2027_v39  ;;  %v4278_v14 = vld [vmem:[%s4491_s13 + $0x78] sm:$0xff] }
 0x2ed   : > { %v2378_v1 = vsel %vm2348_vm11, %v2345_v59, %v2121_v9  ;;  %v3246_v59 = vunpack.c.0.s8 %v5754_v27 }
 0x2ef   : > { %v2059_v22 = vpop.permute.xlu1 %2058 }
 0x2f0   : > { %v2153_v56 = vpop.permute.xlu0 %2152  ;;  %v2315_v16 = vsel %vm1070_vm8, %v2283_v21, %v2059_v22  ;;  %v5782_v21 = vsel %vm905_vm3, %v4278_v14, 0.0 }
 0x2f1   : > { %v2411_v48 = vsel %vm2381_vm13, %v2378_v1, %v2153_v56  ;;  %v5771_v1 = vshrl.u32 %v3247_v20, 7 }
 0x2f3   : > { %v2091_v60 = vpop.permute.xlu1 %2090 }
 0x2f4   : > { %v2185_v29 = vpop.permute.xlu0 %2184  ;;  %v2347_v34 = vsel %vm1136_vm10, %v2315_v16, %v2091_v60 }
 0x2f5   : > { %v2444_v40 = vsel %vm2414_vm14, %v2411_v48, %v2185_v29  ;;  %v4393_v48 = vmov 1934713408  }
 0x2f7   : > { %v2123_v58 = vpop.permute.xlu1 %2122 }
 0x2f8   : > { %v2217_v31 = vpop.permute.xlu0 %2216  ;;  %v2380_v32 = vsel %vm2348_vm11, %v2347_v34, %v2123_v58  ;;  %v5773_v58 = vunpack.c.l.s4 %v4393_v48 }
 0x2f9   : > { %v2477_v8 = vsel %vm6540_vm15, %v2444_v40, %v2217_v31 }
 0x2fa   : > { %4191 = vmatprep.mubr.msk.bf16.mxu1 %vm6539_vm2, %v2477_v8  ;;  %v4277_v8 = vld [vmem:[%s4491_s13 + $0x90] sm:$0xff] }
 0x2fb   : > { %v2155_v30 = vpop.permute.xlu1 %2154 }
 0x2fc   : > { %v2413_v35 = vsel %vm2381_vm13, %v2380_v32, %v2155_v30  ;;  %v5778_v30 = vsel %vm905_vm3, %v4277_v8, 0.0 }
 0x2fe   : > { %v4165_v23 = vpop.f32.mrf.mxu1 }
 0x2ff   : > { %v2187_v45 = vpop.permute.xlu1 %2186  ;;  %v2603_v28 = vadd.f32 %v4165_v23, %v5720_v25  ;;  %v4279_v23 = vld [vmem:[%s4491_s13 + $0x98] sm:$0xff] }
 0x300   : > { %v2446_v24 = vsel %vm2414_vm14, %v2413_v35, %v2187_v45  ;;  %v2594_v33 = vpop.f32.mrf.mxu1 }
 0x301   : > { %v2595_v12 = vadd.f32 %v5720_v25, %v2594_v33  ;;  %v2755_v47 = vmul.f32 0.2, %v2603_v28  ;;  %vm2723_vm1 = vcmp.gt.f32.partialorder %v2603_v28, 0.0  ;;  %v5790_v33 = vsel %vm905_vm3, %v4279_v23, 0.0 }
 0x302   : > { %v4166_v50 = vpop.f32.mrf.mxu1 }
 0x303   : > { %v2219_v37 = vpop.permute.xlu1 %2218  ;;  %v2606_v7 = vadd.f32 %v4166_v50, %v5720_v25  ;;  %v2753_v18 = vmul.f32 0.2, %v2595_v12  ;;  %vm2721_vm12 = vcmp.gt.f32.partialorder %v2595_v12, 0.0  ;;  %v2787_v39 = vsel %vm2723_vm1, %v2603_v28, %v2755_v47 }
 0x304   : > { %v2479_v57 = vsel %vm6540_vm15, %v2446_v24, %v2219_v37  ;;  %v2597_v4 = vpop.f32.mrf.mxu1  ;;  %v2826_v40 = vmul.f32 %v5765_v11, %v2787_v39 }
 0x305   : > { %4192 = vmatmul.mubr.msk.bf16.gmra.mxu1 %vm6539_vm2, %v2479_v57  ;;  %v2598_v44 = vadd.f32 %v5720_v25, %v2597_v4  ;;  %v2756_v9 = vmul.f32 0.2, %v2606_v7  ;;  %vm2724_vm5 = vcmp.gt.f32.partialorder %v2606_v7, 0.0  ;;  %v2785_v29 = vsel %vm2721_vm12, %v2595_v12, %v2753_v18  ;;  %v4282_v18 = vld [vmem:[%s4491_s13 + $0xa8] sm:$0xff] }
 0x306   : > { %v2824_v32 = vmul.f32 %v5765_v11, %v2785_v29  ;;  %v2940_v47 = vrot.slane %v2826_v40, 7 }
 0x307   : > { %v2754_v42 = vmul.f32 0.2, %v2598_v44  ;;  %vm2722_vm7 = vcmp.gt.f32.partialorder %v2598_v44, 0.0  ;;  %v2788_v16 = vsel %vm2724_vm5, %v2606_v7, %v2756_v9 }
 0x308   : > { %v5793_v50 = vmul.f32 %v5765_v11, %v2788_v16  ;;  %v2937_v7 = vrot.slane %v2824_v32, 7  ;;  %v5826_v9 = vadd.f32 %v2940_v47, %v5726_v36 }
 0x309   : > { %v2786_v45 = vsel %vm2722_vm7, %v2598_v44, %v2754_v42 }
 0x30a   : > { %v5796_v4 = vmul.f32 %v5765_v11, %v2786_v45  ;;  %v2941_v53 = vrot.slane %v5793_v50, 7  ;;  %v5829_v42 = vadd.f32 %v2937_v7, %v5730_v43  ;;  %v3135_v16 = vrot.slane %v5826_v9, 1 }
 0x30c   : > { %v2938_v54 = vrot.slane %v5796_v4, 7  ;;  %v2942_v48 = vsel %vm2936_vm9, %v2940_v47, %v2941_v53  ;;  %v3130_v45 = vrot.slane %v5829_v42, 1 }
 0x30e   : > { %v2939_v36 = vsel %vm2936_vm9, %v2937_v7, %v2938_v54 }
 0x31e   : > { %v4169_v46 = vpop.f32.mrf.mxu1 }
 0x31f   : > { %v2619_v22 = vadd.f32 %v4169_v46, %v5720_v25 }
 0x320   : > { %v2610_v6 = vpop.f32.mrf.mxu1 }
 0x321   : > { %v2611_v56 = vadd.f32 %v5720_v25, %v2610_v6  ;;  %v2759_v34 = vmul.f32 0.2, %v2619_v22  ;;  %vm2727_vm12 = vcmp.gt.f32.partialorder %v2619_v22, 0.0  ;;  %v4280_v6 = vld [vmem:[%s4491_s13 + $0x80] sm:$0xff] }
 0x322   : > { %v4170_v62 = vpop.f32.mrf.mxu1 }
 0x323   : > { %v2622_v19 = vadd.f32 %v4170_v62, %v5720_v25  ;;  %v2757_v35 = vmul.f32 0.2, %v2611_v56  ;;  %vm2725_vm2 = vcmp.gt.f32.partialorder %v2611_v56, 0.0  ;;  %v5800_v62 = vsel %vm905_vm3, %v4280_v6, 0.0 }
 0x324   : > { %v2613_v3 = vpop.f32.mrf.mxu1  ;;  %v2791_v28 = vsel %vm2727_vm12, %v2619_v22, %v2759_v34  ;;  %v5860_v6 = vadd.f32 %v2939_v36, %v5740_v38 }
 0x325   : > { %v2614_v55 = vadd.f32 %v5720_v25, %v2613_v3  ;;  %v2760_v24 = vmul.f32 0.2, %v2622_v19  ;;  %vm2728_vm15 = vcmp.gt.f32.partialorder %v2622_v19, 0.0  ;;  %v5806_v3 = vsel %vm905_vm3, %v4281_v0, 0.0 }
 0x326   : > { %v2789_v5 = vsel %vm2725_vm2, %v2611_v56, %v2757_v35  ;;  %v2830_v20 = vmul.f32 %v5765_v11, %v2791_v28  ;;  %v4284_v35 = vld [vmem:[%s4491_s13 + $0xb0] sm:$0xff] }
 0x327   : > { %v2758_v31 = vmul.f32 0.2, %v2614_v55  ;;  %vm2726_vm1 = vcmp.gt.f32.partialorder %v2614_v55, 0.0  ;;  %v2792_v44 = vsel %vm2728_vm15, %v2622_v19, %v2760_v24  ;;  %v5850_v24 = vsel %vm905_vm3, %v4284_v35, 0.0 }
 0x328   : > { %v5823_v61 = vmul.f32 %v5765_v11, %v2792_v44  ;;  %v2946_v43 = vrot.slane %v2830_v20, 7 }
 0x329   : > { %v2790_v46 = vsel %vm2726_vm1, %v2614_v55, %v2758_v31  ;;  %v2828_v55 = vmul.f32 %v5765_v11, %v2789_v5 }
 0x32a   : > { %v5811_v10 = vmul.f32 %v5765_v11, %v2790_v46  ;;  %v2947_v31 = vrot.slane %v5823_v61, 7  ;;  %v3042_v28 = vadd.f32 %v2946_v43, %v5744_v49 }
 0x32b   : > { %v2943_v40 = vrot.slane %v2828_v55, 7 }
 0x32c   : > { %v2944_v22 = vrot.slane %v5811_v10, 7 }
 0x32d   : > { %v3039_v5 = vadd.f32 %v2943_v40, %v5748_v15 }
 0x32f   : > { %v3140_v35 = vrot.slane %v3039_v5, 1 }
 0x33a   : > { %v4173_v52 = vpop.f32.mrf.mxu1 }
 0x33b   : > { %v2635_v12 = vadd.f32 %v4173_v52, %v5720_v25  ;;  %v5816_v52 = vsel %vm905_vm3, %v4282_v18, 0.0 }
 0x33c   : > { %v2626_v63 = vpop.f32.mrf.mxu1 }
 0x33d   : > { %v2627_v41 = vadd.f32 %v5720_v25, %v2626_v63  ;;  %v2763_v39 = vmul.f32 0.2, %v2635_v12  ;;  %vm2731_vm15 = vcmp.gt.f32.partialorder %v2635_v12, 0.0 }
 0x33e   : > { %v4174_v60 = vpop.f32.mrf.mxu1 }
 0x33f   : > { %v2638_v57 = vadd.f32 %v4174_v60, %v5720_v25  ;;  %v2761_v56 = vmul.f32 0.2, %v2627_v41  ;;  %v4283_v60 = vld [vmem:[%s4491_s13 + $0xc8] sm:$0xff]  ;;  %vm2729_vm7 = vcmp.gt.f32.partialorder %v2627_v41, 0.0  ;;  %v2795_v8 = vsel %vm2731_vm15, %v2635_v12, %v2763_v39 }
 0x340   : > { %v2629_v37 = vpop.f32.mrf.mxu1  ;;  %v5834_v29 = vsel %vm905_vm3, %v4283_v60, 0.0  ;;  %v2834_v12 = vmul.f32 %v5765_v11, %v2795_v8 }
 0x341   : > { %v2630_v13 = vadd.f32 %v5720_v25, %v2629_v37  ;;  %v2764_v17 = vmul.f32 0.2, %v2638_v57  ;;  %vm2732_vm2 = vcmp.gt.f32.partialorder %v2638_v57, 0.0  ;;  %v5853_v37 = vadd.f32 %v2942_v48, %v5735_v26 }
 0x342   : > { %v2793_v23 = vsel %vm2729_vm7, %v2627_v41, %v2761_v56  ;;  %v2948_v26 = vsel %vm2936_vm9, %v2946_v43, %v2947_v31  ;;  %v2952_v39 = vrot.slane %v2834_v12, 7 }
 0x343   : > { %v2762_v63 = vmul.f32 0.2, %v2630_v13  ;;  %vm2730_vm5 = vcmp.gt.f32.partialorder %v2630_v13, 0.0  ;;  %v2796_v19 = vsel %vm2732_vm2, %v2638_v57, %v2764_v17  ;;  %v2945_v57 = vsel %vm2936_vm9, %v2943_v40, %v2944_v22 }
 0x344   : > { %v5846_v34 = vmul.f32 %v5765_v11, %v2796_v19  ;;  %v5873_v38 = vadd.f32 %v2945_v57, %v5759_v51  ;;  %v2832_v49 = vmul.f32 %v5765_v11, %v2793_v23  ;;  %v5879_v55 = vadd.f32 %v2948_v26, %v5752_v2 }
 0x345   : > { %v2794_v14 = vsel %vm2730_vm5, %v2630_v13, %v2762_v63 }
 0x346   : > { %v5865_v13 = vmul.f32 %v5765_v11, %v2794_v14  ;;  %v2953_v44 = vrot.slane %v5846_v34, 7  ;;  %v3141_v48 = vrot.slane %v5873_v38, 1  ;;  %v2949_v36 = vrot.slane %v2832_v49, 7 }
 0x348   : > { %v2950_v63 = vrot.slane %v5865_v13, 7  ;;  %v2954_v43 = vsel %vm2936_vm9, %v2952_v39, %v2953_v44 }
 0x349   : > { %v5898_v12 = vadd.f32 %v2954_v43, %v5790_v33  ;;  %v5913_v33 = vsel %vm566_vm0, %v3140_v35, %v3141_v48  ;;  %v5952_v43 = vsub.s32 %v3246_v59, %v5771_v1  ;;  %v3310_v59 = vunpack.c.0.s8 %v5773_v58 }
 0x34a   : > { %v2951_v57 = vsel %vm2936_vm9, %v2949_v36, %v2950_v63 }
 0x34b   : > { %v5975_v58 = vsub.s32 %v3310_v59, %v5771_v1  ;;  %v4286_v1 = vld [vmem:[%s4491_s13 + $0x58] sm:$0x3]  ;;  %v4288_v59 = vld [vmem:[%s4491_s13 + $0xd0] sm:$0x3] }
 0x34e   : > { %v4177_v32 = vpop.f32.mrf.mxu1 }
 0x34f   : > { %v2651_v46 = vadd.f32 %v4177_v32, %v5720_v25  ;;  %v3131_v32 = vrot.slane %v5860_v6, 1 }
 0x350   : > { %v2642_v0 = vpop.f32.mrf.mxu1 }
 0x351   : > { %vm2735_vm1 = vcmp.gt.f32.partialorder %v2651_v46, 0.0  ;;  %v2767_v47 = vmul.f32 0.2, %v2651_v46  ;;  %v2643_v7 = vadd.f32 %v5720_v25, %v2642_v0 }
 0x352   : > { %v4178_v41 = vpop.f32.mrf.mxu1 }
 0x353   : > { %v2799_v17 = vsel %vm2735_vm1, %v2651_v46, %v2767_v47  ;;  %vm2733_vm12 = vcmp.gt.f32.partialorder %v2643_v7, 0.0  ;;  %v2765_v18 = vmul.f32 0.2, %v2643_v7  ;;  %v2654_v20 = vadd.f32 %v4178_v41, %v5720_v25 }
 0x354   : > { %v2838_v15 = vmul.f32 %v5765_v11, %v2799_v17  ;;  %v2645_v51 = vpop.f32.mrf.mxu1  ;;  %v3146_v46 = vrot.slane %v5879_v55, 1  ;;  %v3136_v47 = vrot.slane %v5853_v37, 1  ;;  %v3145_v41 = vrot.slane %v3042_v28, 1 }
 0x355   : > { %v2797_v56 = vsel %vm2733_vm12, %v2643_v7, %v2765_v18  ;;  %vm2736_vm2 = vcmp.gt.f32.partialorder %v2654_v20, 0.0  ;;  %v2768_v19 = vmul.f32 0.2, %v2654_v20  ;;  %v2646_v60 = vadd.f32 %v5720_v25, %v2645_v51 }
 0x356   : > { %v2836_v2 = vmul.f32 %v5765_v11, %v2797_v56  ;;  %v2958_v40 = vrot.slane %v2838_v15, 7  ;;  %v3048_v7 = vadd.f32 %v2952_v39, %v5778_v30  ;;  %v5907_v17 = vadd.f32 %v2951_v57, %v5800_v62 }
 0x357   : > { %v2800_v8 = vsel %vm2736_vm2, %v2654_v20, %v2768_v19  ;;  %vm2734_vm15 = vcmp.gt.f32.partialorder %v2646_v60, 0.0  ;;  %v2766_v14 = vmul.f32 0.2, %v2646_v60  ;;  %v3045_v20 = vadd.f32 %v2949_v36, %v5782_v21 }
 0x358   : > { %v5894_v23 = vmul.f32 %v5765_v11, %v2800_v8  ;;  %v2955_v0 = vrot.slane %v2836_v2, 7  ;;  %v3054_v18 = vadd.f32 %v2958_v40, %v5806_v3  ;;  %v3132_v62 = vsel %vm566_vm0, %v3130_v45, %v3131_v32 }
 0x359   : > { %v2798_v26 = vsel %vm2734_vm15, %v2646_v60, %v2766_v14  ;;  %v3156_v3 = vrot.slane %v5898_v12, 1  ;;  %v5933_v21 = vsel %vm566_vm0, %v3145_v41, %v3146_v46  ;;  %v3155_v51 = vrot.slane %v3048_v7, 1 }
 0x35a   : > { %v2959_v5 = vrot.slane %v5894_v23, 7  ;;  %v5904_v49 = vmul.f32 %v5765_v11, %v2798_v26  ;;  %v3051_v28 = vadd.f32 %v2955_v0, %v5816_v52  ;;  %v5941_v42 = vsel %vm566_vm0, %v3135_v16, %v3136_v47 }
 0x35b   : > { %v3242_v52 = vcombine.low %v3132_v62, %v5913_v33  ;;  %v3165_v45 = vrot.slane %v3054_v18, 1  ;;  %v3150_v36 = vrot.slane %v3045_v20, 1  ;;  %v3258_v9 = vcombine.low %v5941_v42, %v5933_v21 }
 0x35c   : > { %v2960_v30 = vsel %vm2936_vm9, %v2958_v40, %v2959_v5  ;;  %v2956_v39 = vrot.slane %v5904_v49, 7  ;;  %v3160_v16 = vrot.slane %v3051_v28, 1  ;;  %v3157_v40 = vsel %vm566_vm0, %v3155_v51, %v3156_v3 }
 0x35d   : > { %v5928_v15 = vadd.f32 %v2960_v30, %v5834_v29  ;;  %v3151_v29 = vrot.slane %v5907_v17, 1  ;;  %v3250_v8 = vrot.slane %v3242_v52, %v5952_v43  ;;  %v3266_v57 = vrot.slane %v3258_v9, %v5952_v43  ;;  %v4285_v30 = vld [vmem:[%s4491_s13 + $0xb8] sm:$0x3] }
 0x35e   : > { %v2957_v56 = vsel %vm2936_vm9, %v2955_v0, %v2956_v39  ;;  %v2876_v28 = vsel %vm905_vm3, %v4285_v30, 0.0  ;;  %v3243_v51 = vcombine.high %v3132_v62, %v5913_v33  ;;  %v2864_v9 = vsel %vm905_vm3, %v4286_v1, 0.0 }
 0x35f   : > { %v3166_v19 = vrot.slane %v5928_v15, 1  ;;  %v5947_v60 = vadd.f32 %v2957_v56, %v5850_v24  ;;  %v3152_v14 = vsel %vm566_vm0, %v3150_v36, %v3151_v29  ;;  %v3306_v49 = vcombine.low %v3250_v8, %v3266_v57 }
 0x360   : > { %v3041_v30 = vadd.f32 %v2944_v22, %v2864_v9 }
 0x361   : > { %v3161_v2 = vrot.slane %v5947_v60, 1  ;;  %v3167_v24 = vsel %vm566_vm0, %v3165_v45, %v3166_v19  ;;  %v5981_v56 = vrot.slane %v3306_v49, %v5975_v58  ;;  %v3307_v45 = vcombine.high %v3250_v8, %v3266_v57  ;;  %v4290_v57 = vld [vmem:[%s4491_s13 + $0x70] sm:$0x3] }
 0x362   : > { %v3290_v27 = vcombine.low %v3157_v40, %v3167_v24  ;;  %v3291_v36 = vcombine.high %v3157_v40, %v3167_v24  ;;  %v3259_v8 = vcombine.high %v5941_v42, %v5933_v21  ;;  %v4289_v24 = vld [vmem:[%s4491_s13 + $0x28] sm:$0x3]  ;;  %v4292_v42 = vld [vmem:[%s4491_s13 + $0x40] sm:$0x3]  ;;  %v3143_v23 = vrot.slane %v3041_v30, 1 }
 0x363   : > { %v3162_v35 = vsel %vm566_vm0, %v3160_v16, %v3161_v2  ;;  %v4287_v16 = vld [vmem:[%s4491_s13 + $0x88] sm:$0x3] }
 0x364   : > { %v3274_v0 = vcombine.low %v3152_v14, %v3162_v35  ;;  %v3298_v7 = vrot.slane %v3290_v27, %v5952_v43  ;;  %v3275_v20 = vcombine.high %v3152_v14, %v3162_v35  ;;  %v2870_v27 = vsel %vm905_vm3, %v4287_v16, 0.0 }
 0x365   : > { %v2879_v14 = vsel %vm905_vm3, %v4288_v59, 0.0  ;;  %v2858_v35 = vsel %vm905_vm3, %v4289_v24, 0.0  ;;  %v3305_v21 = vrot.slane %v3291_v36, %v5952_v43 }
 0x366   : > { %v3282_v26 = vrot.slane %v3274_v0, %v5952_v43  ;;  %v3289_v40 = vrot.slane %v3275_v20, %v5952_v43  ;;  %v2867_v0 = vsel %vm905_vm3, %v4290_v57, 0.0  ;;  %v2861_v20 = vsel %vm905_vm3, %v4292_v42, 0.0 }
 0x367   : > { %v3035_v1 = vadd.f32 %v2938_v54, %v2858_v35  ;;  %v3044_v36 = vadd.f32 %v2947_v31, %v2867_v0 }
 0x368   : > { %v3338_v41 = vcombine.low %v3282_v26, %v3298_v7  ;;  %v3339_v18 = vcombine.high %v3282_v26, %v3298_v7  ;;  %v3053_v26 = vadd.f32 %v2956_v39, %v2876_v28  ;;  %v4291_v7 = vld [vmem:[%s4491_s13 + $0xa0] sm:$0x3]  ;;  %v3047_v39 = vadd.f32 %v2950_v63, %v2870_v27 }
 0x369   : > { %v2873_v49 = vsel %vm905_vm3, %v4291_v7, 0.0  ;;  %v3056_v28 = vadd.f32 %v2959_v5, %v2879_v14  ;;  %v3354_v16 = vcombine.low %v3289_v40, %v3305_v21  ;;  %v3038_v63 = vadd.f32 %v2941_v53, %v2861_v20 }
 0x36a   : > { %v5984_v52 = vrot.slane %v3338_v41, %v5975_v58  ;;  %v3353_v62 = vrot.slane %v3339_v18, %v5975_v58  ;;  %v3321_v41 = vrot.slane %v3307_v45, %v5975_v58  ;;  %v3257_v18 = vrot.slane %v3243_v51, %v5952_v43 }
 0x36b   : > { %v3273_v51 = vrot.slane %v3259_v8, %v5952_v43  ;;  %v3050_v10 = vadd.f32 %v2953_v44, %v2873_v49  ;;  %v3163_v22 = vrot.slane %v3053_v26, 1  ;;  %v3153_v4 = vrot.slane %v3047_v39, 1 }
 0x36c   : > { %v3371_v33 = vcombine.high %v5981_v56, %v5984_v52  ;;  %v3372_v45 = vcombine.low %v3321_v41, %v3353_v62  ;;  %v3168_v54 = vrot.slane %v3056_v28, 1  ;;  %v3133_v5 = vrot.slane %v3035_v1, 1 }
 0x36d   : > { %v3322_v13 = vcombine.low %v3257_v18, %v3273_v51  ;;  %v3373_v9 = vcombine.high %v3321_v41, %v3353_v62  ;;  %v3362_v27 = vrot.slane %v3354_v16, %v5975_v58  ;;  %v3148_v59 = vrot.slane %v3044_v36, 1 }
 0x36e   : > { %3788 = vrot.lane.b32.xlu0 %v3371_v33, %s4381_s16  ;;  %v3158_v61 = vrot.slane %v3050_v10, 1  ;;  %v3164_v31 = vsel %vm566_vm0, %v3161_v2, %v3163_v22  ;;  %v3370_v34 = vcombine.low %v5981_v56, %v5984_v52  ;;  %v3138_v53 = vrot.slane %v3038_v63, 1  ;;  %v4181_v22 = vpop.f32.mrf.mxu1 }
 0x36f   : > { %v3330_v50 = vrot.slane %v3322_v13, %v5975_v58  ;;  %v3144_v44 = vsel %vm566_vm0, %v3141_v48, %v3143_v23  ;;  %v3154_v14 = vsel %vm566_vm0, %v3151_v29, %v3153_v4  ;;  %v3169_v60 = vsel %vm566_vm0, %v3166_v19, %v3168_v54 }
 0x370   : > { %v3546_v2 = vcombine.low %v3154_v14, %v3164_v31  ;;  %v3355_v62 = vcombine.high %v3289_v40, %v3305_v21  ;;  %v3134_v8 = vsel %vm566_vm0, %v3131_v32, %v3133_v5  ;;  %v3149_v38 = vsel %vm566_vm0, %v3146_v46, %v3148_v59  ;;  %v2658_v4 = vpop.f32.mrf.mxu1 }
 0x371   : > { %v3374_v33 = vcombine.low %v3330_v50, %v3362_v27  ;;  %v3159_v48 = vsel %vm566_vm0, %v3156_v3, %v3158_v61  ;;  %v3514_v17 = vcombine.low %v3134_v8, %v3144_v44  ;;  %v3323_v15 = vcombine.high %v3257_v18, %v3273_v51 }
 0x372   : > { %3796 = vrot.lane.b32.xlu0 %v3372_v45, %s4383_s18  ;;  %v3562_v29 = vcombine.low %v3159_v48, %v3169_v60  ;;  %v3139_v19 = vsel %vm566_vm0, %v3136_v47, %v3138_v53  ;;  %v3375_v40 = vcombine.high %v3330_v50, %v3362_v27  ;;  %v3369_v32 = vrot.slane %v3355_v62, %v5975_v58  ;;  %v4182_v27 = vpop.f32.mrf.mxu1 }
 0x373   : > { %v3530_v6 = vcombine.low %v3139_v19, %v3149_v38  ;;  %v3554_v55 = vrot.slane %v3546_v2, %v5952_v43  ;;  %v3337_v46 = vrot.slane %v3323_v15, %v5975_v58  ;;  %v3522_v12 = vrot.slane %v3514_v17, %v5952_v43 }
 0x374   : > { %v3570_v3 = vrot.slane %v3562_v29, %v5952_v43  ;;  %v3547_v7 = vcombine.high %v3154_v14, %v3164_v31  ;;  %v3515_v18 = vcombine.high %v3134_v8, %v3144_v44  ;;  %v3563_v21 = vcombine.high %v3159_v48, %v3169_v60  ;;  %v2661_v50 = vpop.f32.mrf.mxu1 }
 0x375   : > { %v3376_v24 = vcombine.low %v3337_v46, %v3369_v32  ;;  %v3538_v35 = vrot.slane %v3530_v6, %v5952_v43  ;;  %v3377_v57 = vcombine.high %v3337_v46, %v3369_v32  ;;  %v3531_v20 = vcombine.high %v3139_v19, %v3149_v38  ;;  %v4293_v6 = vld [vmem:[%s4491_s13 + $0xf0] sm:$0xff] }
 0x376   : > { %3804 = vrot.lane.b32.xlu0 %v3373_v9, %s4384_s19  ;;  %v3610_v37 = vcombine.low %v3554_v55, %v3570_v3  ;;  %v3611_v41 = vcombine.high %v3554_v55, %v3570_v3  ;;  %v3561_v28 = vrot.slane %v3547_v7, %v5952_v43  ;;  %v3529_v45 = vrot.slane %v3515_v18, %v5952_v43  ;;  %v4294_v55 = vld [vmem:[%s4491_s13 + $0xd8] sm:$0xff] }
 0x377   : > { %v3578_v47 = vcombine.low %v3522_v12, %v3538_v35  ;;  %v3579_v42 = vcombine.high %v3522_v12, %v3538_v35  ;;  %v3577_v51 = vrot.slane %v3563_v21, %v5952_v43  ;;  %v3545_v36 = vrot.slane %v3531_v20, %v5952_v43  ;;  %v4295_v12 = vld [vmem:[%s4491_s13 + $0xf8] sm:$0xff]  ;;  %v4298_v20 = vld [vmem:[%s4491_s13 + $0x108] sm:$0xff] }
 0x378   : > { %v3618_v0 = vrot.slane %v3610_v37, %v5975_v58  ;;  %v3625_v39 = vrot.slane %v3611_v41, %v5975_v58  ;;  %v2667_v8 = vadd.f32 %v4181_v22, %v5720_v25  ;;  %v2659_v48 = vadd.f32 %v5720_v25, %v2658_v4  ;;  %v4297_v37 = vld [vmem:[%s4491_s13 + $0x120] sm:$0xff]  ;;  %v4302_v22 = vld [vmem:[%s4491_s13 + $0x138] sm:$0xff] }
 0x379   : > { %v3586_v26 = vrot.slane %v3578_v47, %v5975_v58  ;;  %v3593_v1 = vrot.slane %v3579_v42, %v5975_v58  ;;  %v3626_v10 = vcombine.low %v3561_v28, %v3577_v51  ;;  %v3594_v13 = vcombine.low %v3529_v45, %v3545_v36 }
 0x37a   : > { %3812 = vrot.lane.b32.xlu0 %v3374_v33, %s4386_s10  ;;  %v3627_v9 = vcombine.high %v3561_v28, %v3577_v51  ;;  %v3595_v59 = vcombine.high %v3529_v45, %v3545_v36  ;;  %v2771_v17 = vmul.f32 0.2, %v2667_v8  ;;  %v2670_v29 = vadd.f32 %v4182_v27, %v5720_v25  ;;  %v4301_v36 = vld [vmem:[%s4491_s13 + $0x150] sm:$0xff] }
 0x37b   : > { %v3642_v49 = vcombine.low %v3586_v26, %v3618_v0  ;;  %v3643_v30 = vcombine.high %v3586_v26, %v3618_v0  ;;  %v3644_v16 = vcombine.low %v3593_v1, %v3625_v39  ;;  %v3645_v63 = vcombine.high %v3593_v1, %v3625_v39  ;;  %v4299_v39 = vld [vmem:[%s4491_s13 + $0x128] sm:$0xff]  ;;  %v4300_v1 = vld [vmem:[%s4491_s13 + $0x110] sm:$0xff] }
 0x37c   : > { %v3634_v23 = vrot.slane %v3626_v10, %v5975_v58  ;;  %v3602_v54 = vrot.slane %v3594_v13, %v5975_v58  ;;  %v3641_v31 = vrot.slane %v3627_v9, %v5975_v58  ;;  %v3609_v53 = vrot.slane %v3595_v59, %v5975_v58 }
 0x37d   : > { %v2662_v15 = vadd.f32 %v5720_v25, %v2661_v50  ;;  %vm2739_vm5 = vcmp.gt.f32.partialorder %v2667_v8, 0.0  ;;  %v2769_v32 = vmul.f32 0.2, %v2659_v48  ;;  %v6099_v46 = vsel %vm905_vm3, %v4294_v55, 0.0 }
 0x37e   : > { %3820 = vrot.lane.b32.xlu0 %v3375_v40, %s4389_s20  ;;  %v3646_v5 = vcombine.low %v3602_v54, %v3634_v23  ;;  %v3647_v61 = vcombine.high %v3602_v54, %v3634_v23  ;;  %v3648_v14 = vcombine.low %v3609_v53, %v3641_v31  ;;  %v3649_v2 = vcombine.high %v3609_v53, %v3641_v31 }
 0x37f   : > { %v6095_v40 = vsel %vm905_vm3, %v4293_v6, 0.0  ;;  %v6103_v3 = vsel %vm905_vm3, %v4295_v12, 0.0  ;;  %vm2737_vm7 = vcmp.gt.f32.partialorder %v2659_v48, 0.0  ;;  %v6111_v47 = vsel %vm905_vm3, %v4297_v37, 0.0 }
 0x380   : > { %v2803_v0 = vsel %vm2739_vm5, %v2667_v8, %v2771_v17  ;;  %v2772_v26 = vmul.f32 0.2, %v2670_v29  ;;  %v2770_v7 = vmul.f32 0.2, %v2662_v15  ;;  %vm2740_vm1 = vcmp.gt.f32.partialorder %v2670_v29, 0.0  ;;  %v4305_v8 = vld [vmem:[%s4491_s13 + $0x180] sm:$0xff] }
 0x381   : > { %vm2738_vm12 = vcmp.gt.f32.partialorder %v2662_v15, 0.0  ;;  %v2801_v42 = vsel %vm2737_vm7, %v2659_v48, %v2769_v32  ;;  %v6123_v28 = vsel %vm905_vm3, %v4299_v39, 0.0  ;;  %v6127_v45 = vsel %vm905_vm3, %v4300_v1, 0.0  ;;  %v4307_v39 = vld [vmem:[%s4491_s13 + $0x188] sm:$0xff] }
 0x382   : > { %3828 = vrot.lane.b32.xlu0 %v3376_v24, %s4388_s17  ;;  %v4185_v44 = vpop.f32.mrf.mxu1  ;;  %v4296_v24 = vld [vmem:[%s4491_s13 + $0xe0] sm:$0xff]  ;;  %v2842_v51 = vmul.f32 %v5765_v11, %v2803_v0  ;;  %v6132_v10 = vsel %vm905_vm3, %v4301_v36, 0.0  ;;  %v6136_v13 = vsel %vm905_vm3, %v4302_v22, 0.0  ;;  %v2802_v23 = vsel %vm2738_vm12, %v2662_v15, %v2770_v7 }
 0x383   : > { %v6107_v35 = vsel %vm905_vm3, %v4296_v24, 0.0  ;;  %v2840_v54 = vmul.f32 %v5765_v11, %v2801_v42  ;;  %v6150_v53 = vmul.f32 %v5765_v11, %v2802_v23  ;;  %v6161_v48 = vsel %vm905_vm3, %v4305_v8, 0.0 }
 0x384   : > { %v2674_v60 = vpop.f32.mrf.mxu1  ;;  %v2964_v17 = vrot.slane %v2842_v51, 7  ;;  %v6190_v1 = vsel %vm905_vm3, %v4307_v39, 0.0 }
 0x385   : > { %v2675_v41 = vadd.f32 %v5720_v25, %v2674_v60 }
 0x386   : > { %3836 = vrot.lane.b32.xlu0 %v3377_v57, %s4391_s28  ;;  %v4186_v33 = vpop.f32.mrf.mxu1 }
 0x387   : > { %v2686_v18 = vadd.f32 %v4186_v33, %v5720_v25  ;;  %vm2741_vm5 = vcmp.gt.f32.partialorder %v2675_v41, 0.0 }
 0x388   : > { %v2677_v62 = vpop.f32.mrf.mxu1 }
 0x389   : > { %v2678_v57 = vadd.f32 %v5720_v25, %v2677_v62  ;;  %v2776_v9 = vmul.f32 0.2, %v2686_v18  ;;  %vm2744_vm7 = vcmp.gt.f32.partialorder %v2686_v18, 0.0 }
 0x38a   : > { %3844 = vrot.lane.b32.xlu0 %v3642_v49, %s4390_s26  ;;  %v2683_v49 = vadd.f32 %v4185_v44, %v5720_v25 }
 0x38b   : > { %vm2742_vm2 = vcmp.gt.f32.partialorder %v2678_v57, 0.0  ;;  %v2808_v6 = vsel %vm2744_vm7, %v2686_v18, %v2776_v9  ;;  %v4308_v9 = vld [vmem:[%s4491_s13 + $0x170] sm:$0xff] }
 0x38c   : > { %v2775_v4 = vmul.f32 0.2, %v2683_v49  ;;  %vm2743_vm15 = vcmp.gt.f32.partialorder %v2683_v49, 0.0  ;;  %v6179_v7 = vmul.f32 %v5765_v11, %v2808_v6 }
 0x38e   : > { %3852 = vrot.lane.b32.xlu0 %v3643_v30, %s4394_s14  ;;  %v6119_v30 = vsel %vm905_vm3, %v4298_v20, 0.0  ;;  %v2971_v36 = vrot.slane %v6179_v7, 7 }
 0x392   : > { %3860 = vrot.lane.b32.xlu0 %v3644_v16, %s4395_s15  ;;  %v2774_v16 = vmul.f32 0.2, %v2678_v57 }
 0x394   : > { %v2806_v44 = vsel %vm2742_vm2, %v2678_v57, %v2774_v16  ;;  %v2962_v57 = vrot.slane %v6150_v53, 7 }
 0x395   : > { %v6166_v32 = vmul.f32 %v5765_v11, %v2806_v44 }
 0x396   : > { %3868 = vrot.lane.b32.xlu0 %v3645_v63, %s4396_s29  ;;  %v2804_v63 = vsel %vm2740_vm1, %v2670_v29, %v2772_v26  ;;  %v2961_v29 = vrot.slane %v2840_v54, 7 }
 0x397   : > { %v6147_v50 = vmul.f32 %v5765_v11, %v2804_v63 }
 0x398   : > { %v6185_v18 = vadd.f32 %v2961_v29, %v6099_v46 }
 0x399   : > { %v2965_v37 = vrot.slane %v6147_v50, 7 }
 0x39a   : > { %3876 = vrot.lane.b32.xlu0 %v3646_v5, %s6541_s9  ;;  %s4400_s9 = smov 120   ;;  %v2773_v5 = vmul.f32 0.2, %v2675_v41 }
 0x39b   : > { %v2966_v51 = vsel %vm2936_vm9, %v2964_v17, %v2965_v37 }
 0x39c   : > { %v2805_v15 = vsel %vm2741_vm5, %v2675_v41, %v2773_v5  ;;  %v6182_v41 = vadd.f32 %v2964_v17, %v6095_v40  ;;  %v2963_v40 = vsel %vm2936_vm9, %v2961_v29, %v2962_v57 }
 0x39d   : > { %v2844_v26 = vmul.f32 %v5765_v11, %v2805_v15 }
 0x39e   : > { %3884 = vrot.lane.b32.xlu0 %v3647_v61, %s4398_s11  ;;  %v4303_v61 = vld [vmem:[%s4491_s13 + $0x158] sm:$0xff]  ;;  %v3175_v23 = vrot.slane %v6182_v41, 1 }
 0x39f   : > { %v6144_v31 = vsel %vm905_vm3, %v4303_v61, 0.0  ;;  %v2967_v16 = vrot.slane %v2844_v26, 7 }
 0x3a1   : > { %v3063_v6 = vadd.f32 %v2967_v16, %v6119_v30 }
 0x3a2   : > { %3892 = vrot.lane.b32.xlu0 %v3648_v14, %s4399_s12  ;;  %v6086_v38 = vpop.f32.mrf.mxu1  ;;  %v4304_v14 = vld [vmem:[%s4491_s13 + $0x140] sm:$0xff] }
 0x3a3   : > { %v6154_v60 = vsel %vm905_vm3, %v4304_v14, 0.0  ;;  %v2699_v33 = vadd.f32 %v6086_v38, %v5720_v25  ;;  %v4306_v38 = vld [vmem:[%s4491_s13 + $0x168] sm:$0xff] }
 0x3a4   : > { %v6091_v19 = vpop.f32.mrf.mxu1  ;;  %v6172_v24 = vsel %vm905_vm3, %v4306_v38, 0.0 }
 0x3a5   : > { %v2691_v55 = vadd.f32 %v5720_v25, %v6091_v19  ;;  %vm2747_vm12 = vcmp.gt.f32.partialorder %v2699_v33, 0.0 }
 0x3a6   : > { %3900 = vrot.lane.b32.xlu0 %v3649_v2, %s4400_s9  ;;  %v4190_v21 = vpop.f32.mrf.mxu1  ;;  %v2807_v2 = vsel %vm2743_vm15, %v2683_v49, %v2775_v4  ;;  %v2779_v49 = vmul.f32 0.2, %v2699_v33  ;;  %v3170_v4 = vrot.slane %v6185_v18, 1 }
 0x3a7   : > { %v2702_v59 = vadd.f32 %v4190_v21, %v5720_v25  ;;  %v2846_v0 = vmul.f32 %v5765_v11, %v2807_v2  ;;  %v2968_v21 = vrot.slane %v6166_v32, 7  ;;  %v2777_v42 = vmul.f32 0.2, %v2691_v55 }
 0x3a8   : > { %v2693_v27 = vpop.f32.mrf.mxu1  ;;  %vm2745_vm15 = vcmp.gt.f32.partialorder %v2691_v55, 0.0  ;;  %v2811_v22 = vsel %vm2747_vm12, %v2699_v33, %v2779_v49  ;;  %v6216_v2 = vadd.f32 %v2963_v40, %v6107_v35 }
 0x3a9   : > { %v2694_v62 = vadd.f32 %v5720_v25, %v2693_v27  ;;  %v2780_v12 = vmul.f32 0.2, %v2702_v59  ;;  %vm2748_vm1 = vcmp.gt.f32.partialorder %v2702_v59, 0.0  ;;  %v2970_v46 = vrot.slane %v2846_v0, 7 }
 0x3aa   : > { %v6206_v27 = vsel %vm905_vm3, %v4308_v9, 0.0  ;;  %v2969_v61 = vsel %vm2936_vm9, %v2967_v16, %v2968_v21  ;;  %v2809_v44 = vsel %vm2745_vm15, %v2691_v55, %v2777_v42  ;;  %v3171_v9 = vrot.slane %v6216_v2, 1 }
 0x3ab   : > { %v2778_v19 = vmul.f32 0.2, %v2694_v62  ;;  %vm2746_vm2 = vcmp.gt.f32.partialorder %v2694_v62, 0.0  ;;  %v2812_v20 = vsel %vm2748_vm1, %v2702_v59, %v2780_v12  ;;  %v6209_v59 = vadd.f32 %v2966_v51, %v6103_v3 }
 0x3ac   : > { %v6202_v54 = vmul.f32 %v5765_v11, %v2812_v20  ;;  %v3066_v33 = vadd.f32 %v2970_v46, %v6111_v47  ;;  %v2972_v3 = vsel %vm2936_vm9, %v2970_v46, %v2971_v36  ;;  %v6229_v35 = vadd.f32 %v2969_v61, %v6127_v45 }
 0x3ad   : > { %v2810_v63 = vsel %vm2746_vm2, %v2694_v62, %v2778_v19  ;;  %v2850_v62 = vmul.f32 %v5765_v11, %v2811_v22  ;;  %v2848_v47 = vmul.f32 %v5765_v11, %v2809_v44  ;;  %v6235_v49 = vadd.f32 %v2972_v3, %v6123_v28 }
 0x3ae   : > { %v6221_v8 = vmul.f32 %v5765_v11, %v2810_v63  ;;  %v2977_v55 = vrot.slane %v6202_v54, 7  ;;  %v3181_v40 = vrot.slane %v6229_v35, 1  ;;  %v3180_v61 = vrot.slane %v3063_v6, 1 }
 0x3af   : > { %v2976_v19 = vrot.slane %v2850_v62, 7  ;;  %v2973_v46 = vrot.slane %v2848_v47, 7  ;;  %vm6546_vm2 = vcmask 588800   ;;  %vm3930_vm15 = vcmask 785408  }
 0x3b0   : > { %v2974_v42 = vrot.slane %v6221_v8, 7 }
 0x3b1   : > { %v2978_v16 = vsel %vm2936_vm9, %v2976_v19, %v2977_v55 }
 0x3b2   : > { %v6254_v62 = vadd.f32 %v2978_v16, %v6144_v31  ;;  %v6267_v31 = vsel %vm566_vm0, %v3180_v61, %v3181_v40 }
 0x3c5   : > { %v4193_v5 = vpop.f32.mrf.mxu1 }
 0x3c6   : > { %v2715_v14 = vadd.f32 %v4193_v5, %v5720_v25 }
 0x3c7   : > { %v2706_v17 = vpop.f32.mrf.mxu1 }
 0x3c8   : > { %vm2751_vm5 = vcmp.gt.f32.partialorder %v2715_v14, 0.0  ;;  %v2783_v29 = vmul.f32 0.2, %v2715_v14  ;;  %v2707_v15 = vadd.f32 %v5720_v25, %v2706_v17 }
 0x3c9   : > { %v4194_v12 = vpop.f32.mrf.mxu1 }
 0x3ca   : > { %v2815_v38 = vsel %vm2751_vm5, %v2715_v14, %v2783_v29  ;;  %vm2749_vm7 = vcmp.gt.f32.partialorder %v2707_v15, 0.0  ;;  %v2781_v0 = vmul.f32 0.2, %v2707_v15  ;;  %v2718_v26 = vadd.f32 %v4194_v12, %v5720_v25 }
 0x3cb   : > { %v2854_v30 = vmul.f32 %v5765_v11, %v2815_v38  ;;  %v2709_v45 = vpop.f32.mrf.mxu1  ;;  %v3186_v14 = vrot.slane %v6235_v49, 1  ;;  %v3176_v29 = vrot.slane %v6209_v59, 1  ;;  %v3185_v12 = vrot.slane %v3066_v33, 1 }
 0x3cc   : > { %v2813_v20 = vsel %vm2749_vm7, %v2707_v15, %v2781_v0  ;;  %vm2752_vm1 = vcmp.gt.f32.partialorder %v2718_v26, 0.0  ;;  %v2784_v39 = vmul.f32 0.2, %v2718_v26  ;;  %v2710_v51 = vadd.f32 %v5720_v25, %v2709_v45 }
 0x3cd   : > { %v2852_v28 = vmul.f32 %v5765_v11, %v2813_v20  ;;  %v2982_v22 = vrot.slane %v2854_v30, 7  ;;  %v2975_v25 = vsel %vm2936_vm9, %v2973_v46, %v2974_v42  ;;  %v3072_v15 = vadd.f32 %v2976_v19, %v6132_v10 }
 0x3ce   : > { %v2816_v63 = vsel %vm2752_vm1, %v2718_v26, %v2784_v39  ;;  %vm2750_vm12 = vcmp.gt.f32.partialorder %v2710_v51, 0.0  ;;  %v2782_v5 = vmul.f32 0.2, %v2710_v51  ;;  %v6261_v38 = vadd.f32 %v2975_v25, %v6154_v60 }
 0x3cf   : > { %v6250_v44 = vmul.f32 %v5765_v11, %v2816_v63  ;;  %v2979_v17 = vrot.slane %v2852_v28, 7  ;;  %v3078_v0 = vadd.f32 %v2982_v22, %v6161_v48  ;;  %v3069_v26 = vadd.f32 %v2973_v46, %v6136_v13 }
 0x3d0   : > { %v2814_v3 = vsel %vm2750_vm12, %v2710_v51, %v2782_v5  ;;  %v3196_v60 = vrot.slane %v6254_v62, 1  ;;  %v6286_v13 = vsel %vm566_vm0, %v3185_v12, %v3186_v14  ;;  %v3195_v30 = vrot.slane %v3072_v15, 1 }
 0x3d1   : > { %v2983_v6 = vrot.slane %v6250_v44, 7  ;;  %v2853_v47 = vmul.f32 %v5765_v11, %v2814_v3  ;;  %v3172_v11 = vsel %vm566_vm0, %v3170_v4, %v3171_v9  ;;  %v3075_v48 = vadd.f32 %v2979_v17, %v6172_v24 }
 0x3d2   : > { %v3177_v18 = vsel %vm566_vm0, %v3175_v23, %v3176_v29  ;;  %v3378_v4 = vcombine.low %v3172_v11, %v6267_v31  ;;  %v3191_v24 = vrot.slane %v6261_v38, 1  ;;  %v3190_v51 = vrot.slane %v3069_v26, 1  ;;  %v4309_v26 = vld [vmem:[%s4491_s13 + $0x178] sm:$0x3] }
 0x3d3   : > { %v2984_v10 = vsel %vm2936_vm9, %v2982_v22, %v2983_v6  ;;  %v2980_v19 = vrot.slane %v2853_v47, 7  ;;  %v3394_v46 = vcombine.low %v3177_v18, %v6286_v13  ;;  %v3200_v16 = vrot.slane %v3075_v48, 1 }
 0x3d4   : > { %v6281_v33 = vadd.f32 %v2984_v10, %v6190_v1  ;;  %v3205_v1 = vrot.slane %v3078_v0, 1  ;;  %v3197_v41 = vsel %vm566_vm0, %v3195_v30, %v3196_v60  ;;  %v3386_v22 = vrot.slane %v3378_v4, %v5952_v43 }
 0x3d5   : > { %v2981_v45 = vsel %vm2936_vm9, %v2979_v17, %v2980_v19  ;;  %v3402_v61 = vrot.slane %v3394_v46, %v5952_v43  ;;  %v2900_v10 = vsel %vm905_vm3, %v4309_v26, 0.0  ;;  %v3379_v30 = vcombine.high %v3172_v11, %v6267_v31  ;;  %v4310_v46 = vld [vmem:[%s4491_s13 + $0x118] sm:$0x3]  ;;  %v4315_v26 = vld [vmem:[%s4491_s13 + $0x160] sm:$0x3] }
 0x3d6   : > { %v3206_v20 = vrot.slane %v6281_v33, 1  ;;  %v6298_v39 = vadd.f32 %v2981_v45, %v6206_v27  ;;  %v3192_v27 = vsel %vm566_vm0, %v3190_v51, %v3191_v24  ;;  %vm3927_vm9 = vcmask 719872  }
 0x3d7   : > { %v3442_v15 = vcombine.low %v3386_v22, %v3402_v61  ;;  %vm3933_vm5 = vcmask 850944   ;;  %vm3936_vm7 = vcmask 916480   ;;  %vm3939_vm1 = vcmask 982016  }
 0x3d8   : > { %v3201_v28 = vrot.slane %v6298_v39, 1  ;;  %v3207_v23 = vsel %vm566_vm0, %v3205_v1, %v3206_v20  ;;  %v3443_v1 = vcombine.high %v3386_v22, %v3402_v61  ;;  %v4314_v61 = vld [vmem:[%s4491_s13 + $0x130] sm:$0x3] }
 0x3d9   : > { %v3426_v63 = vcombine.low %v3197_v41, %v3207_v23  ;;  %v6324_v45 = vrot.slane %v3442_v15, %v5975_v58  ;;  %v3427_v51 = vcombine.high %v3197_v41, %v3207_v23  ;;  %v4313_v41 = vld [vmem:[%s4491_s13 + $0xe8] sm:$0x3]  ;;  %v3077_v15 = vadd.f32 %v2980_v19, %v2900_v10 }
 0x3da   : > { %v3202_v5 = vsel %vm566_vm0, %v3200_v16, %v3201_v28  ;;  %v2888_v16 = vsel %vm905_vm3, %v4310_v46, 0.0  ;;  %v2882_v23 = vsel %vm905_vm3, %v4313_v41, 0.0  ;;  %v2897_v46 = vsel %vm905_vm3, %v4315_v26, 0.0 }
 0x3db   : > { %v3410_v25 = vcombine.low %v3192_v27, %v3202_v5  ;;  %v3434_v3 = vrot.slane %v3426_v63, %v5952_v43  ;;  %v3411_v0 = vcombine.high %v3192_v27, %v3202_v5  ;;  %v4311_v63 = vld [vmem:[%s4491_s13 + $0x148] sm:$0x3]  ;;  %v4312_v5 = vld [vmem:[%s4491_s13 + $0x190] sm:$0x3]  ;;  %v3059_v32 = vadd.f32 %v2962_v57, %v2882_v23 }
 0x3dc   : > { %v2894_v27 = vsel %vm905_vm3, %v4311_v63, 0.0  ;;  %v3074_v8 = vadd.f32 %v2977_v55, %v2897_v46 }
 0x3dd   : > { %v3418_v17 = vrot.slane %v3410_v25, %v5952_v43  ;;  %v2903_v25 = vsel %vm905_vm3, %v4312_v5, 0.0  ;;  %v3425_v22 = vrot.slane %v3411_v0, %v5952_v43  ;;  %v3065_v0 = vadd.f32 %v2968_v21, %v2888_v16  ;;  %v4316_v5 = vld [vmem:[%s4491_s13 + $0x100] sm:$0x3]  ;;  %s6544_s13 = smov 96  }
 0x3de   : > { %v3071_v63 = vadd.f32 %v2974_v42, %v2894_v27  ;;  %v3080_v19 = vadd.f32 %v2983_v6, %v2903_v25  ;;  %v3203_v42 = vrot.slane %v3077_v15, 1  ;;  %v3173_v7 = vrot.slane %v3059_v32, 1 }
 0x3df   : > { %v3474_v47 = vcombine.low %v3418_v17, %v3434_v3  ;;  %v3475_v12 = vcombine.high %v3418_v17, %v3434_v3  ;;  %v3395_v17 = vcombine.high %v3177_v18, %v6286_v13  ;;  %v2891_v3 = vsel %vm905_vm3, %v4314_v61, 0.0 }
 0x3e0   : > { %v6320_v48 = vpop.permute.xlu0 %3788  ;;  %v3393_v13 = vrot.slane %v3379_v30, %v5952_v43  ;;  %v3441_v18 = vrot.slane %v3427_v51, %v5952_v43  ;;  %v3068_v21 = vadd.f32 %v2971_v36, %v2891_v3  ;;  %v3183_v16 = vrot.slane %v3065_v0, 1 }
 0x3e1   : > { %v6327_v4 = vrot.slane %v3474_v47, %v5975_v58  ;;  %v3489_v11 = vrot.slane %v3475_v12, %v5975_v58  ;;  %v3457_v12 = vrot.slane %v3443_v1, %v5975_v58  ;;  %v3409_v30 = vrot.slane %v3395_v17, %v5952_v43 }
 0x3e2   : > { %v3490_v41 = vcombine.low %v3425_v22, %v3441_v18  ;;  %v3193_v27 = vrot.slane %v3071_v63, 1  ;;  %v3208_v25 = vrot.slane %v3080_v19, 1  ;;  %v3188_v36 = vrot.slane %v3068_v21, 1 }
 0x3e3   : > { %v3507_v31 = vcombine.high %v6324_v45, %v6327_v4  ;;  %v3506_v10 = vcombine.low %v6324_v45, %v6327_v4  ;;  %v3508_v1 = vcombine.low %v3457_v12, %v3489_v11  ;;  %v3458_v6 = vcombine.low %v3393_v13, %v3409_v30 }
 0x3e4   : > { %v6344_v47 = vpop.permute.xlu0 %3796  ;;  %v3509_v53 = vcombine.high %v3457_v12, %v3489_v11  ;;  %v3498_v57 = vrot.slane %v3490_v41, %v5975_v58  ;;  %v3198_v17 = vrot.slane %v3074_v8, 1  ;;  %v3204_v54 = vsel %vm566_vm0, %v3201_v28, %v3203_v42 }
 0x3e5   : > { %3790 = vrot.lane.b32.xlu1 %v3507_v31, %s4381_s16  ;;  %v2885_v31 = vsel %vm905_vm3, %v4316_v5, 0.0  ;;  %v3466_v50 = vrot.slane %v3458_v6, %v5975_v58  ;;  %v3184_v11 = vsel %vm566_vm0, %v3181_v40, %v3183_v16  ;;  %v3194_v23 = vsel %vm566_vm0, %v3191_v24, %v3193_v27 }
 0x3e6   : > { %v3062_v51 = vadd.f32 %v2965_v37, %v2885_v31  ;;  %v3209_v39 = vsel %vm566_vm0, %v3206_v20, %v3208_v25  ;;  %v3682_v28 = vcombine.low %v3194_v23, %v3204_v54  ;;  %v3491_v3 = vcombine.high %v3425_v22, %v3441_v18 }
 0x3e7   : > { %v3510_v61 = vcombine.low %v3466_v50, %v3498_v57  ;;  %v3174_v15 = vsel %vm566_vm0, %v3171_v9, %v3173_v7  ;;  %v3189_v35 = vsel %vm566_vm0, %v3186_v14, %v3188_v36  ;;  %v3199_v40 = vsel %vm566_vm0, %v3196_v60, %v3198_v17 }
 0x3e8   : > { %v6369_v44 = vpop.permute.xlu0 %3804  ;;  %v3178_v37 = vrot.slane %v3062_v51, 1  ;;  %v3650_v24 = vcombine.low %v3174_v15, %v3184_v11  ;;  %v3698_v33 = vcombine.low %v3199_v40, %v3209_v39  ;;  %v3459_v20 = vcombine.high %v3393_v13, %v3409_v30 }
 0x3e9   : > { %3798 = vrot.lane.b32.xlu1 %v3508_v1, %s4383_s18  ;;  %v3511_v9 = vcombine.high %v3466_v50, %v3498_v57  ;;  %v3505_v49 = vrot.slane %v3491_v3, %v5975_v58  ;;  %v3690_v14 = vrot.slane %v3682_v28, %v5952_v43  ;;  %v3683_v31 = vcombine.high %v3194_v23, %v3204_v54  ;;  %s242_s18 = sand.u32 1, %s4369_s22  }
 0x3ea   : > { %v3179_v2 = vsel %vm566_vm0, %v3176_v29, %v3178_v37  ;;  %v3473_v62 = vrot.slane %v3459_v20, %v5975_v58  ;;  %v3658_v60 = vrot.slane %v3650_v24, %v5952_v43  ;;  %v3706_v46 = vrot.slane %v3698_v33, %v5952_v43 }
 0x3eb   : > { %v3666_v22 = vcombine.low %v3179_v2, %v3189_v35  ;;  %v3651_v32 = vcombine.high %v3174_v15, %v3184_v11  ;;  %v3699_v21 = vcombine.high %v3199_v40, %v3209_v39  ;;  %v3667_v42 = vcombine.high %v3179_v2, %v3189_v35 }
 0x3ec   : > { %v6378_v55 = vpop.permute.xlu0 %3812  ;;  %v3512_v12 = vcombine.low %v3473_v62, %v3505_v49  ;;  %v3746_v13 = vcombine.low %v3690_v14, %v3706_v46  ;;  %v3513_v0 = vcombine.high %v3473_v62, %v3505_v49  ;;  %v3747_v30 = vcombine.high %v3690_v14, %v3706_v46 }
 0x3ed   : > { %3806 = vrot.lane.b32.xlu1 %v3509_v53, %s4384_s19  ;;  %v3674_v59 = vrot.slane %v3666_v22, %v5952_v43  ;;  %v3697_v16 = vrot.slane %v3683_v31, %v5952_v43  ;;  %v3665_v53 = vrot.slane %v3651_v32, %v5952_v43  ;;  %v3713_v57 = vrot.slane %v3699_v21, %v5952_v43  ;;  %s4024_s19 = sshll.u32 %s242_s18, 4 }
 0x3ee   : > { %v3754_v63 = vrot.slane %v3746_v13, %v5975_v58  ;;  %v3761_v51 = vrot.slane %v3747_v30, %v5975_v58  ;;  %v3681_v36 = vrot.slane %v3667_v42, %v5952_v43  ;;  %v3906_v37 = vsel %vm938_vm4, %v3370_v34, %v6320_v48 }
 0x3ef   : > { %v3714_v18 = vcombine.low %v3658_v60, %v3674_v59  ;;  %v3715_v8 = vcombine.high %v3658_v60, %v3674_v59  ;;  %v3762_v17 = vcombine.low %v3697_v16, %v3713_v57  ;;  %v3908_v39 = vsel %vm1004_vm6, %v3906_v37, %v6344_v47 }
 0x3f0   : > { %v3821_v38 = vpop.permute.xlu0 %3820  ;;  %v3730_v50 = vcombine.low %v3665_v53, %v3681_v36  ;;  %v3910_v43 = vsel %vm1070_vm8, %v3908_v39, %v6369_v44  ;;  %v3763_v48 = vcombine.high %v3697_v16, %v3713_v57  ;;  %vm3924_vm0 = vcmask 654336  }
 0x3f1   : > { %3814 = vrot.lane.b32.xlu1 %v3510_v61, %s4386_s10  ;;  %v3722_v5 = vrot.slane %v3714_v18, %v5975_v58  ;;  %v3729_v25 = vrot.slane %v3715_v8, %v5975_v58  ;;  %v3770_v23 = vrot.slane %v3762_v17, %v5975_v58  ;;  %v3912_v56 = vsel %vm1136_vm10, %v3910_v43, %v6378_v55  ;;  %s6457_s10 = scalar_lea.vmem [#allocation3], %s4024_s19 }
 0x3f2   : > { %v3738_v61 = vrot.slane %v3730_v50, %v5975_v58  ;;  %v3914_v52 = vsel %vm2348_vm11, %v3912_v56, %v3821_v38  ;;  %v3731_v44 = vcombine.high %v3665_v53, %v3681_v36  ;;  %vm6545_vm3 = vcmask 523264  }
 0x3f3   : > { %v3778_v1 = vcombine.low %v3722_v5, %v3754_v63  ;;  %v3779_v6 = vcombine.high %v3722_v5, %v3754_v63  ;;  %v3780_v7 = vcombine.low %v3729_v25, %v3761_v51  ;;  %v3781_v11 = vcombine.high %v3729_v25, %v3761_v51  ;;  %vm6547_vm12 = vmmov %vm6545_vm3 }
 0x3f4   : > { %v3829_v26 = vpop.permute.xlu0 %3828  ;;  %v3782_v34 = vcombine.low %v3738_v61, %v3770_v23  ;;  %v3783_v40 = vcombine.high %v3738_v61, %v3770_v23  ;;  %v3777_v38 = vrot.slane %v3763_v48, %v5975_v58  ;;  %v3745_v2 = vrot.slane %v3731_v44, %v5975_v58 }
 0x3f5   : > { %3822 = vrot.lane.b32.xlu1 %v3511_v9, %s4389_s20  ;;  %v3916_v3 = vsel %vm2381_vm13, %v3914_v52, %v3829_v26  ;;  %s4074_s20 = sshll.u32 %s4459_s25, 8  ;;  %s6491_s25 = scalar_lea.sflag [#allocation4], %s242_s18 }
 0x3f6   : > { %v3784_v49 = vcombine.low %v3745_v2, %v3777_v38  ;;  %v3785_v60 = vcombine.high %v3745_v2, %v3777_v38 }
 0x3f8   : > { %v3837_v29 = vpop.permute.xlu0 %3836 }
 0x3f9   : > { %3830 = vrot.lane.b32.xlu1 %v3512_v12, %s4388_s17  ;;  %v3918_v47 = vsel %vm2414_vm14, %v3916_v3, %v3837_v29  ;;  %s3958_s17 = sshll.u32 %s6457_s10, 4  ;;  %s6478_s17 = int_to_ptr.vmem [resolvable:$true] %s3958_s17 }
 0x3fc   : > { %v3845_v19 = vpop.permute.xlu0 %3844 }
 0x3fd   : > { %3838 = vrot.lane.b32.xlu1 %v3513_v0, %s4391_s28  ;;  %v3920_v35 = vsel %vm6545_vm3, %v3918_v47, %v3845_v19  ;;  %vm6548_vm3 = vmmov %vm6546_vm2 }
 0x400   : > { %v3853_v41 = vpop.permute.xlu0 %3852 }
 0x401   : > { %3846 = vrot.lane.b32.xlu1 %v3778_v1, %s4390_s26  ;;  %v3922_v55 = vsel %vm6546_vm2, %v3920_v35, %v3853_v41 }
 0x404   : > { %v3861_v27 = vpop.permute.xlu0 %3860 }
 0x405   : > { %3854 = vrot.lane.b32.xlu1 %v3779_v6, %s4394_s14  ;;  %v3925_v24 = vsel %vm3924_vm0, %v3922_v55, %v3861_v27  ;;  %s6485_s14 = scalar_lea.hbm %s6538_s6, %s4074_s20 }
 0x408   : > { %v3869_v54 = vpop.permute.xlu0 %3868 }
 0x409   : > { %3862 = vrot.lane.b32.xlu1 %v3780_v7, %s4395_s15  ;;  %v3928_v20 = vsel %vm3927_vm9, %v3925_v24, %v3869_v54  ;;  %s4317_s15 = scalar_lea.vmem %s6478_s17, 256 }
 0x40a   : > { %p4318_p11 = scmp.ne.s32.totalorder %s6478_s17, %s4317_s15 }
 0x40c   : > { %v3877_v28 = vpop.permute.xlu0 %3876  ;;  %p4319_p12 = pnand %p4318_p11, %p4476_p5 }
 0x40d   : > { %3870 = vrot.lane.b32.xlu1 %v3781_v11, %s4396_s29  ;;  %v3931_v22 = vsel %vm3930_vm15, %v3928_v20, %v3877_v28  ;;  %s4401_s29 = smov [#allocation3]  }
 0x40e   : > { %p4320_p13 = pneg %p4319_p12 }
 0x410   : > { %v3885_v15 = vpop.permute.xlu0 %3884 }
 0x411   : > { %3878 = vrot.lane.b32.xlu1 %v3782_v34, %s6544_s13  ;;  %v3934_v9 = vsel %vm3933_vm5, %v3931_v22, %v3885_v15 }
 0x414   : > { %v3893_v33 = vpop.permute.xlu0 %3892 }
 0x415   : > { %3886 = vrot.lane.b32.xlu1 %v3783_v40, %s4398_s11  ;;  %v3937_v14 = vsel %vm3936_vm7, %v3934_v9, %v3893_v33 }
 0x418   : > { %v3901_v26 = vpop.permute.xlu0 %3900 }
 0x419   : > { %v3940_v62 = vsel %vm3939_vm1, %v3937_v14, %v3901_v26  ;;  %3894 = vrot.lane.b32.xlu1 %v3784_v49, %s4399_s12 }
 0x41a   : > { %3942 = vst [vmem:[%s6457_s10] sm:$0xff] %v3940_v62 }
 0x41d   : > { %3902 = vrot.lane.b32.xlu1 %v3785_v60, %s4400_s9  ;;  %s4321_s9 = sshll.u32 %s4401_s29, 4  ;;  %s4322_s9 = int_to_ptr.vmem [resolvable:$false] %s4321_s9 }
 0x41e   : > { %s4323_s11 = scalar_lea.vmem %s4322_s9, 512  ;;  %p4324_p0 = scmp.lt.s32.totalorder %s6478_s17, %s4322_s9 }
 0x41f   : > { %p4325_p1 = scmp.lt.s32.totalorder %s4323_s11, %s4317_s15 }
 0x421   : > { %p4326_p2 = por %p4325_p1, %p4324_p0 }
 0x423   : > { %p4327_p3 = pnand %p4326_p2, %p4320_p13 }
 0x457   : > { %v3791_v58 = vpop.permute.xlu1 %3790 }
 0x458   : > { %v3907_v31 = vsel %vm938_vm4, %v3506_v10, %v3791_v58 }
 0x45b   : > { %v3799_v46 = vpop.permute.xlu1 %3798 }
 0x45c   : > { %v3909_v1 = vsel %vm1004_vm6, %v3907_v31, %v3799_v46 }
 0x45f   : > { %v3807_v12 = vpop.permute.xlu1 %3806 }
 0x460   : > { %v3911_v41 = vsel %vm1070_vm8, %v3909_v1, %v3807_v12 }
 0x463   : > { %v3815_v59 = vpop.permute.xlu1 %3814 }
 0x464   : > { %v3913_v32 = vsel %vm1136_vm10, %v3911_v41, %v3815_v59 }
 0x467   : > { %v3823_v13 = vpop.permute.xlu1 %3822 }
 0x468   : > { %v3915_v21 = vsel %vm2348_vm11, %v3913_v32, %v3823_v13 }
 0x46b   : > { %v3831_v29 = vpop.permute.xlu1 %3830 }
 0x46c   : > { %v3917_v8 = vsel %vm2381_vm13, %v3915_v21, %v3831_v29 }
 0x46f   : > { %v3839_v18 = vpop.permute.xlu1 %3838 }
 0x470   : > { %v3919_v6 = vsel %vm2414_vm14, %v3917_v8, %v3839_v18 }
 0x473   : > { %v3847_v0 = vpop.permute.xlu1 %3846 }
 0x474   : > { %v3921_v45 = vsel %vm6547_vm12, %v3919_v6, %v3847_v0 }
 0x477   : > { %v3855_v63 = vpop.permute.xlu1 %3854 }
 0x478   : > { %v3923_v4 = vsel %vm6548_vm3, %v3921_v45, %v3855_v63 }
 0x47b   : > { %v3863_v19 = vpop.permute.xlu1 %3862 }
 0x47c   : > { %v3926_v10 = vsel %vm3924_vm0, %v3923_v4, %v3863_v19 }
 0x47f   : > { %v3871_v5 = vpop.permute.xlu1 %3870 }
 0x480   : > { %v3929_v16 = vsel %vm3927_vm9, %v3926_v10, %v3871_v5 }
 0x483   : > { %v3879_v30 = vpop.permute.xlu1 %3878 }
 0x484   : > { %v3932_v27 = vsel %vm3930_vm15, %v3929_v16, %v3879_v30 }
 0x487   : > { %v3887_v42 = vpop.permute.xlu1 %3886 }
 0x488   : > { %v3935_v25 = vsel %vm3933_vm5, %v3932_v27, %v3887_v42 }
 0x48b   : > { %v3895_v51 = vpop.permute.xlu1 %3894 }
 0x48c   : > { %v3938_v53 = vsel %vm3936_vm7, %v3935_v25, %v3895_v51 }
 0x48f   : > { %v3903_v57 = vpop.permute.xlu1 %3902 }
 0x490   : > { %v3941_v7 = vsel %vm3939_vm1, %v3938_v53, %v3903_v57 }
 0x491   : > { %3943 = vst [vmem:[%s6457_s10 + $0x8] sm:$0xff] %v3941_v7 }
 0x492   : > { %4330 = shalt.err (!%p4327_p3)
}
 0x493   : > { %s4331_s12 = scalar_lea.hbm %s6485_s14, 256  ;;  %s4335_s19 = scalar_lea.hbm %s6538_s6, 512 }
 0x494   : > { %p4332_p4 = scmp.ne.s32.totalorder %s6485_s14, %s4331_s12  ;;  %p4336_p9 = scmp.lt.s32.totalorder %s6485_s14, %s6538_s6 }
 0x495   : > { %p4337_p10 = scmp.lt.s32.totalorder %s4335_s19, %s4331_s12 }
 0x496   : > { %p4333_p7 = pnand %p4332_p4, %p4476_p5 }
 0x497   : > { %p4338_p11 = por %p4337_p10, %p4336_p9 }
 0x498   : > { %p4334_p8 = pneg %p4333_p7 }
 0x49a   : > { %p4339_p12 = pnand %p4338_p11, %p4334_p8 }
 0x49c   : > { %4342 = shalt.err (!%p4339_p12)
}
 0x49d   : > { %s4402_s26 = smov 128  }
 0x49e   : > { %4198 = dma.vmem_to_hbm [thread:$0]  (%p4476_p5), %s6478_s17, 256, %s6485_s14, %s6491_s25, %s4402_s26, %s4402_s26, %s4381_s16  }
 0x49f PF: > { %p4204_p13 = scmp.ge.s32.totalorder %s4377_s24, 2  ;;  %s3973_s28 = sand.u32 1, %s4365_s21  }
 0x4a0   : > { %s3974_s15 = scalar_lea.sflag [#allocation4], %s3973_s28 }
 0x4a1   : > { %p4201_p0 = pnand %p4204_p13, %p4480_p6 }
 0x4a3   : > { %p4202_p1 = pneg %p4201_p0 }
 0x4a5   : > { %4360 = dma.done.wait (%p4202_p1), %s3974_s15, 256  }
 0x4a6   : > { %4362 = vsyncadd (%p4202_p1), %s3974_s15, 4294967040  ;;  %p16_p2 = scmp.ge.s32.totalorder %s4463_s27, 4   ;;  %s6549_s21 = smov %s4369_s22 }
 0x4a7   : > { %s6550_s22 = smov %s4373_s23  ;;  %s6551_s23 = smov %s4474_s30 }
 0x4a8   : > { %s6552_s24 = smov %s4463_s27  ;;  %18 = sbr.rel (!%p16_p2) target bundleno = 3 (0x3), region = 81 }
 0x4ad   :  { %3979 = vsyncpa [#allocation4], 1 }
 0x4ae   :  { %3981 = vsyncpa [#allocation4 + $0x1], 1 }

</bundles_post_ra>
